<compile_context>
chip_gen: v7x
topology: tpu7x:2x2x1
jax: 0.10.0
libtpu: 0.0.40
codegen_flags: <defaults>
</compile_context>

<pallas_src>
import jax
import jax.numpy as jnp
from jax.experimental import pallas as pl
from jax.experimental.pallas import tpu as pltpu

IN_F = 128
HID_F = 9216
OUT_F = 64
TK = 4608  # hidden-dimension tile (9216 / 4608 = 2 grid steps)


def net_kernel(x_ref, w1t_ref, b1_ref, w2_ref, b2_ref, o_ref, acc_ref, xbf_ref):
    k = pl.program_id(0)

    @pl.when(k == 0)
    def _():
        acc_ref[...] = jnp.zeros_like(acc_ref)
        # x is resident across the grid; cast to bf16 exactly once.
        xbf_ref[...] = x_ref[...].astype(jnp.bfloat16)

    # fc1 chunk + bias + ReLU   ([B,128]bf16 @ [128,TK]bf16 -> [B,TK]f32)
    h = jnp.dot(xbf_ref[...], w1t_ref[...], preferred_element_type=jnp.float32)
    h = jnp.maximum(h + b1_ref[...].astype(jnp.float32), 0.0)

    # fc2 partial contraction   ([B,TK]bf16 @ [TK,64]bf16 -> [B,64]f32)
    acc_ref[...] += jnp.dot(h.astype(jnp.bfloat16), w2_ref[...],
                            preferred_element_type=jnp.float32)

    @pl.when(k == pl.num_programs(0) - 1)
    def _():
        z = acc_ref[...] + b2_ref[...]
        m = jnp.max(z, axis=-1, keepdims=True)
        s = z - m
        lse = jnp.log(jnp.sum(jnp.exp(s), axis=-1, keepdims=True))
        o_ref[...] = (s - lse).astype(o_ref.dtype)


def prepare_params(w1, b1, w2, b2):
    """One-time parameter prep (NOT called per forward): transpose to
    row-major matmul layout and cast weights/b1 to bf16 for HBM streaming."""
    w1t = w1.T.astype(jnp.bfloat16)                  # [128, 9216]
    b1r = b1.reshape(1, HID_F).astype(jnp.bfloat16)  # [1, 9216]
    w2t = w2.T.astype(jnp.bfloat16)                  # [9216, 64]
    b2r = b2.reshape(1, OUT_F)                       # [1, 64]  (f32)
    return w1t, b1r, w2t, b2r


def net_forward(x, w1t, b1r, w2t, b2r):
    """x: [B,128] f32; w1t: [128,9216] bf16; b1r: [1,9216] bf16;
       w2t: [9216,64] bf16; b2r: [1,64] f32."""
    B = x.shape[0]
    grid = (HID_F // TK,)
    return pl.pallas_call(
        net_kernel,
        out_shape=jax.ShapeDtypeStruct((B, OUT_F), x.dtype),
        grid_spec=pltpu.PrefetchScalarGridSpec(
            num_scalar_prefetch=0,
            grid=grid,
            in_specs=[
                pl.BlockSpec((B, IN_F), lambda k: (0, 0)),    # x (resident)
                pl.BlockSpec((IN_F, TK), lambda k: (0, k)),   # W1^T tile (bf16)
                pl.BlockSpec((1, TK), lambda k: (0, k)),      # b1 tile (bf16)
                pl.BlockSpec((TK, OUT_F), lambda k: (k, 0)),  # W2^T tile (bf16)
                pl.BlockSpec((1, OUT_F), lambda k: (0, 0)),   # b2 (resident)
            ],
            out_specs=pl.BlockSpec((B, OUT_F), lambda k: (0, 0)),
            scratch_shapes=[
                pltpu.VMEM((B, OUT_F), jnp.float32),   # fc2 accumulator
                pltpu.VMEM((B, IN_F), jnp.bfloat16),   # hoisted bf16 copy of x
            ],
        ),
        compiler_params=pltpu.CompilerParams(
            dimension_semantics=("arbitrary",),
            vmem_limit_bytes=32 * 1024 * 1024,
        ),
    )(x, w1t, b1r, w2t, b2r)


def net_reference_f32(x, w1, b1, w2, b2):
    h = jnp.maximum(x @ w1.T + b1, 0.0)
    z = h @ w2.T + b2
    return jax.nn.log_softmax(z, axis=1)


def net_reference_bf16(x, w1t, b1r, w2t, b2r):
    # Same arithmetic as the kernel (bf16 operands, f32 accumulation).
    h = jnp.dot(x.astype(jnp.bfloat16), w1t, preferred_element_type=jnp.float32)
    h = jnp.maximum(h + b1r.astype(jnp.float32), 0.0)
    z = jnp.dot(h.astype(jnp.bfloat16), w2t, preferred_element_type=jnp.float32)
    z = z + b2r
    return jax.nn.log_softmax(z, axis=1)


if __name__ == "__main__":
    key = jax.random.PRNGKey(0)
    kx, k1, k2, k3, k4 = jax.random.split(key, 5)

    B = 8
    x = jax.random.normal(kx, (B, IN_F), dtype=jnp.float32)

    # PyTorch-style Linear init: U(-1/sqrt(fan_in), 1/sqrt(fan_in))
    bound1 = 1.0 / jnp.sqrt(IN_F)
    w1 = jax.random.uniform(k1, (HID_F, IN_F), jnp.float32, -bound1, bound1)
    b1 = jax.random.uniform(k2, (HID_F,), jnp.float32, -bound1, bound1)
    bound2 = 1.0 / jnp.sqrt(HID_F)
    w2 = jax.random.uniform(k3, (OUT_F, HID_F), jnp.float32, -bound2, bound2)
    b2 = jax.random.uniform(k4, (OUT_F,), jnp.float32, -bound2, bound2)

    # One-time prep outside the jitted forward (no per-call transposes/casts).
    w1t, b1r, w2t, b2r = prepare_params(w1, b1, w2, b2)
    w1t, b1r, w2t, b2r = jax.block_until_ready((w1t, b1r, w2t, b2r))

    fwd = jax.jit(net_forward)
    out = fwd(x, w1t, b1r, w2t, b2r)
    out = jax.block_until_ready(out)
    assert out.shape == (B, OUT_F)

    # Match against a reference using the identical bf16 arithmetic (tight),
    # and against the full-f32 PyTorch-equivalent math (loose, bf16 weights).
    ref_bf16 = net_reference_bf16(x, w1t, b1r, w2t, b2r)
    ref_f32 = net_reference_f32(x, w1, b1, w2, b2)
    assert jnp.allclose(out, ref_bf16, atol=1e-3, rtol=1e-3), "mismatch vs bf16 reference"
    assert jnp.allclose(out, ref_f32, atol=5e-2, rtol=5e-2), "mismatch vs f32 reference"

    print("KERNEL_OK")
</pallas_src>

<mosaic_0001>
module attributes {stable_mosaic.version = 11 : i64} {
  func.func @net_kernel(%arg0: i32, %arg1: memref<8x128xf32, #tpu.memory_space<vmem>>, %arg2: memref<128x4608xbf16, #tpu.memory_space<vmem>>, %arg3: memref<1x4608xbf16, #tpu.memory_space<vmem>>, %arg4: memref<4608x64xbf16, #tpu.memory_space<vmem>>, %arg5: memref<1x64xf32, #tpu.memory_space<vmem>>, %arg6: memref<8x64xf32, #tpu.memory_space<vmem>>, %arg7: memref<8x64xf32, #tpu.memory_space<vmem>>, %arg8: memref<8x128xbf16, #tpu.memory_space<vmem>>) attributes {dimension_semantics = [#tpu.dimension_semantics<arbitrary>], iteration_bounds = array<i64: 2>, scalar_prefetch = 0 : i64, scratch_operands = 2 : i64, tpu.core_type = #tpu.core_type<tc>, window_params = [{pipeline_mode = #tpu.pipeline_mode<synchronous>, transform_indices = @transform_0, window_bounds = array<i64: 8, 128>}, {transform_indices = @transform_1, window_bounds = array<i64: 128, 4608>}, {transform_indices = @transform_2, window_bounds = array<i64: 1, 4608>}, {transform_indices = @transform_3, window_bounds = array<i64: 4608, 64>}, {pipeline_mode = #tpu.pipeline_mode<synchronous>, transform_indices = @transform_4, window_bounds = array<i64: 1, 64>}, {pipeline_mode = #tpu.pipeline_mode<synchronous>, transform_indices = @transform_5, window_bounds = array<i64: 8, 64>}]} {
    %c0_i32 = arith.constant 0 : i32
    %0 = arith.cmpi eq, %arg0, %c0_i32 : i32
    %1 = arith.extui %0 : i1 to i32
    %c0_i32_0 = arith.constant 0 : i32
    %2 = arith.cmpi ne, %1, %c0_i32_0 : i32
    scf.if %2 {
      %cst_15 = arith.constant 0.000000e+00 : f32
      %21 = vector.broadcast %cst_15 : f32 to vector<8x64xf32>
      %c0_16 = arith.constant 0 : index
      %c0_17 = arith.constant 0 : index
      %22 = vector.load %arg7[%c0_16, %c0_17] : memref<8x64xf32, #tpu.memory_space<vmem>>, vector<8x64xf32>
      tpu.vector_store %arg7[%c0_16, %c0_17], %21 {strides = array<i32>} : memref<8x64xf32, #tpu.memory_space<vmem>>, vector<8x64xf32>,
      %c0_18 = arith.constant 0 : index
      %c0_19 = arith.constant 0 : index
      %23 = vector.load %arg1[%c0_18, %c0_19] : memref<8x128xf32, #tpu.memory_space<vmem>>, vector<8x128xf32>
      %24 = arith.truncf %23 : vector<8x128xf32> to vector<8x128xbf16>
      %c0_20 = arith.constant 0 : index
      %c0_21 = arith.constant 0 : index
      %25 = vector.load %arg8[%c0_20, %c0_21] : memref<8x128xbf16, #tpu.memory_space<vmem>>, vector<8x128xbf16>
      tpu.vector_store %arg8[%c0_20, %c0_21], %24 {strides = array<i32>} : memref<8x128xbf16, #tpu.memory_space<vmem>>, vector<8x128xbf16>,
    } else {
    }
    %c0 = arith.constant 0 : index
    %c0_1 = arith.constant 0 : index
    %3 = vector.load %arg8[%c0, %c0_1] : memref<8x128xbf16, #tpu.memory_space<vmem>>, vector<8x128xbf16>
    %c0_2 = arith.constant 0 : index
    %c0_3 = arith.constant 0 : index
    %4 = vector.load %arg2[%c0_2, %c0_3] : memref<128x4608xbf16, #tpu.memory_space<vmem>>, vector<128x4608xbf16>
    %cst = arith.constant dense<0.000000e+00> : vector<8x4608xf32>
    %5 = tpu.matmul %3, %4, %cst {dimension_numbers = #tpu.dot_dimension_numbers<[1], [0], [0], [1], [0, 0, 1, 1], [], []>} : vector<8x128xbf16>, vector<128x4608xbf16>, vector<8x4608xf32> -> vector<8x4608xf32>
    %c0_4 = arith.constant 0 : index
    %c0_5 = arith.constant 0 : index
    %6 = vector.load %arg3[%c0_4, %c0_5] : memref<1x4608xbf16, #tpu.memory_space<vmem>>, vector<1x4608xbf16>
    %7 = arith.extf %6 : vector<1x4608xbf16> to vector<1x4608xf32>
    %8 = vector.broadcast %7 : vector<1x4608xf32> to vector<8x4608xf32>
    %9 = arith.addf %5, %8 : vector<8x4608xf32>
    %cst_6 = arith.constant 0.000000e+00 : f32
    %10 = vector.broadcast %cst_6 : f32 to vector<8x4608xf32>
    %11 = arith.maximumf %9, %10 : vector<8x4608xf32>
    %c0_7 = arith.constant 0 : index
    %c0_8 = arith.constant 0 : index
    %12 = vector.load %arg7[%c0_7, %c0_8] : memref<8x64xf32, #tpu.memory_space<vmem>>, vector<8x64xf32>
    %13 = arith.truncf %11 : vector<8x4608xf32> to vector<8x4608xbf16>
    %c0_9 = arith.constant 0 : index
    %c0_10 = arith.constant 0 : index
    %14 = vector.load %arg4[%c0_9, %c0_10] : memref<4608x64xbf16, #tpu.memory_space<vmem>>, vector<4608x64xbf16>
    %cst_11 = arith.constant dense<0.000000e+00> : vector<8x64xf32>
    %15 = tpu.matmul %13, %14, %cst_11 {dimension_numbers = #tpu.dot_dimension_numbers<[1], [0], [0], [1], [0, 0, 1, 1], [], []>} : vector<8x4608xbf16>, vector<4608x64xbf16>, vector<8x64xf32> -> vector<8x64xf32>
    %16 = arith.addf %12, %15 : vector<8x64xf32>
    %c0_12 = arith.constant 0 : index
    %c0_13 = arith.constant 0 : index
    %17 = vector.load %arg7[%c0_12, %c0_13] : memref<8x64xf32, #tpu.memory_space<vmem>>, vector<8x64xf32>
    tpu.vector_store %arg7[%c0_12, %c0_13], %16 {strides = array<i32>} : memref<8x64xf32, #tpu.memory_space<vmem>>, vector<8x64xf32>,
    %c1_i32 = arith.constant 1 : i32
    %18 = arith.cmpi eq, %arg0, %c1_i32 : i32
    %19 = arith.extui %18 : i1 to i32
    %c0_i32_14 = arith.constant 0 : i32
    %20 = arith.cmpi ne, %19, %c0_i32_14 : i32
    scf.if %20 {
      %c0_15 = arith.constant 0 : index
      %c0_16 = arith.constant 0 : index
      %21 = vector.load %arg7[%c0_15, %c0_16] : memref<8x64xf32, #tpu.memory_space<vmem>>, vector<8x64xf32>
      %c0_17 = arith.constant 0 : index
      %c0_18 = arith.constant 0 : index
      %22 = vector.load %arg5[%c0_17, %c0_18] : memref<1x64xf32, #tpu.memory_space<vmem>>, vector<1x64xf32>
      %23 = vector.broadcast %22 : vector<1x64xf32> to vector<8x64xf32>
      %24 = arith.addf %21, %23 : vector<8x64xf32>
      %cst_19 = arith.constant dense<0xFF800000> : vector<8xf32>
      %25 = vector.multi_reduction <maximumf>, %24, %cst_19 [1] : vector<8x64xf32> to vector<8xf32>
      %26 = vector.shape_cast %25 : vector<8xf32> to vector<8x1xf32>
      %27 = vector.broadcast %26 : vector<8x1xf32> to vector<8x64xf32>
      %28 = arith.subf %24, %27 : vector<8x64xf32>
      %29 = math.exp %28 : vector<8x64xf32>
      %cst_20 = arith.constant dense<0.000000e+00> : vector<8xf32>
      %30 = vector.multi_reduction <add>, %29, %cst_20 [1] : vector<8x64xf32> to vector<8xf32>
      %31 = vector.shape_cast %30 : vector<8xf32> to vector<8x1xf32>
      %32 = math.log %31 : vector<8x1xf32>
      %33 = vector.broadcast %32 : vector<8x1xf32> to vector<8x64xf32>
      %34 = arith.subf %28, %33 : vector<8x64xf32>
      %c0_21 = arith.constant 0 : index
      %c0_22 = arith.constant 0 : index
      %35 = vector.load %arg6[%c0_21, %c0_22] : memref<8x64xf32, #tpu.memory_space<vmem>>, vector<8x64xf32>
      tpu.vector_store %arg6[%c0_21, %c0_22], %34 {strides = array<i32>} : memref<8x64xf32, #tpu.memory_space<vmem>>, vector<8x64xf32>,
    } else {
    }
    return
  }
  func.func @transform_0(%arg0: i32) -> (i32, i32) {
    %c0_i32 = arith.constant 0 : i32
    %c0_i32_0 = arith.constant 0 : i32
    %c0_i32_1 = arith.constant 0 : i32
    return %c0_i32, %c0_i32_0 : i32, i32
  }
  func.func @transform_1(%arg0: i32) -> (i32, i32) {
    %c0_i32 = arith.constant 0 : i32
    %c0_i32_0 = arith.constant 0 : i32
    return %c0_i32, %arg0 : i32, i32
  }
  func.func @transform_2(%arg0: i32) -> (i32, i32) {
    %c0_i32 = arith.constant 0 : i32
    %c0_i32_0 = arith.constant 0 : i32
    return %c0_i32, %arg0 : i32, i32
  }
  func.func @transform_3(%arg0: i32) -> (i32, i32) {
    %c0_i32 = arith.constant 0 : i32
    %c0_i32_0 = arith.constant 0 : i32
    return %arg0, %c0_i32 : i32, i32
  }
  func.func @transform_4(%arg0: i32) -> (i32, i32) {
    %c0_i32 = arith.constant 0 : i32
    %c0_i32_0 = arith.constant 0 : i32
    %c0_i32_1 = arith.constant 0 : i32
    return %c0_i32, %c0_i32_0 : i32, i32
  }
  func.func @transform_5(%arg0: i32) -> (i32, i32) {
    %c0_i32 = arith.constant 0 : i32
    %c0_i32_0 = arith.constant 0 : i32
    %c0_i32_1 = arith.constant 0 : i32
    return %c0_i32, %c0_i32_0 : i32, i32
  }
}

</mosaic_0001>

<bundles_post_ra>
// kernel: net_forward.1
= control target key start
LH: loop header
LB: loop body
LE: loop exit
PB: predicated region body
PF: predicated region fallthrough
CT: control target
= control target key end

     0   :  { %10 = vsyncpa [#allocation6], 0  ;;  %s8703_s18 = smov 0   ;;  %s8705_s19 = smov 0   ;;  %s10269_s0 = inlined_call_operand.vmem [shape: f32[8,128], index: 0, kind: input, shape index: {}]   ;;  %s10270_s1 = inlined_call_operand.vmem [shape: bf16[128,9216], index: 1, kind: input, shape index: {}]   ;;  %s10271_s2 = inlined_call_operand.vmem [shape: bf16[1,9216], index: 2, kind: input, shape index: {}]   ;;  %s10272_s3 = inlined_call_operand.vmem [shape: bf16[9216,64], index: 3, kind: input, shape index: {}]   ;;  %s10273_s4 = inlined_call_operand.vmem [shape: f32[1,64], index: 4, kind: input, shape index: {}]   ;;  %s10274_s5 = inlined_call_operand.hbm [shape: f32[8,64], index: 5, kind: output, shape index: {}]  }
   0x1   :  { %s8707_s20 = smov 0  }
   0x2 LB: > { %s8719_s21 = sadd.s32 4294967295, %s8668_s20   ;;  %s8722_s22 = sadd.s32 1, %s8668_s20   ;;  %s8668_s20 = sphi %s8707_s20, %s10277_s20   ;;  %s8664_s19 = sphi %s8705_s19, %s10276_s19   ;;  %s8660_s18 = sphi %s8703_s18, %s10275_s18  }
   0x3   : > { %s41_s23 = ssub.s32 %s8668_s20, %s8722_s22  ;;  %s44_s24 = sadd.s32 1, %s8664_s19 }
   0x4   : > { %p42_p0 = scmp.eq.s32.totalorder %s41_s23, 0  ;;  %p51_p1 = scmp.ne.s32.totalorder %s8664_s19, %s8660_s18 }
   0x5   : > { %p52_p2 = scmp.eq.s32.totalorder %s8668_s20, 0  ;;  %p6872_p4 = scmp.ge.s32.totalorder %s8668_s20, 2 }
   0x6   : > { %s8731_s25 = scalar_select %p42_p0, %s8664_s19, %s44_s24  }
   0x7   : > { %p53_p3 = por %p52_p2, %p51_p1  ;;  %177 = sbr.rel (%p6872_p4) target bundleno = 163 (0xa3), region = 24 }
   0xe   : > { %180 = sbr.rel (!%p53_p3) target bundleno = 163 (0xa3), region = 28  ;;  %s182_s26 = sand.u32 (%p53_p3), 1, %s8664_s19  }
   0xf   : > { %s7459_s27 = smul.u32 (%p53_p3), 144, %s8668_s20 }
  0x10   : > { %s7856_s28 = smul.u32 (%p53_p3), 2304, %s182_s26 }
  0x11   : > { %s8739_s6 = scalar_lea.vmem (%p53_p3), %s10270_s1, %s7459_s27 }
  0x12   : > { %v200_v0 = vld [vmem:[%s8739_s6] sm:$0xff] (%p53_p3)  ;;  %v202_v1 = vld [vmem:[%s8739_s6 + $0x8] sm:$0xff] (%p53_p3)  ;;  %v204_v2 = vld [vmem:[%s8739_s6 + $0x10] sm:$0xff] (%p53_p3)  ;;  %s8744_s7 = scalar_lea.vmem (%p53_p3), [#allocation4], %s7856_s28 }
  0x13   : > { %201 = vst [vmem:[%s8744_s7] sm:$0xff] (%p53_p3), %v200_v0  ;;  %203 = vst [vmem:[%s8744_s7 + $0x8] sm:$0xff] (%p53_p3), %v202_v1  ;;  %v206_v3 = vld [vmem:[%s8739_s6 + $0x18] sm:$0xff] (%p53_p3)  ;;  %v208_v4 = vld [vmem:[%s8739_s6 + $0x20] sm:$0xff] (%p53_p3) }
  0x14   : > { %205 = vst [vmem:[%s8744_s7 + $0x10] sm:$0xff] (%p53_p3), %v204_v2  ;;  %v210_v5 = vld [vmem:[%s8739_s6 + $0x28] sm:$0xff] (%p53_p3)  ;;  %207 = vst [vmem:[%s8744_s7 + $0x18] sm:$0xff] (%p53_p3), %v206_v3  ;;  %v212_v6 = vld [vmem:[%s8739_s6 + $0x30] sm:$0xff] (%p53_p3) }
  0x15   : > { %209 = vst [vmem:[%s8744_s7 + $0x20] sm:$0xff] %v208_v4  ;;  %211 = vst [vmem:[%s8744_s7 + $0x28] sm:$0xff] %v210_v5  ;;  %v214_v7 = vld [vmem:[%s8739_s6 + $0x38] sm:$0xff]  ;;  %v216_v8 = vld [vmem:[%s8739_s6 + $0x40] sm:$0xff] }
  0x16   : > { %213 = vst [vmem:[%s8744_s7 + $0x30] sm:$0xff] %v212_v6  ;;  %215 = vst [vmem:[%s8744_s7 + $0x38] sm:$0xff] %v214_v7  ;;  %v218_v9 = vld [vmem:[%s8739_s6 + $0x48] sm:$0xff]  ;;  %v220_v10 = vld [vmem:[%s8739_s6 + $0x50] sm:$0xff] }
  0x17   : > { %217 = vst [vmem:[%s8744_s7 + $0x40] sm:$0xff] %v216_v8  ;;  %v222_v11 = vld [vmem:[%s8739_s6 + $0x58] sm:$0xff]  ;;  %219 = vst [vmem:[%s8744_s7 + $0x48] sm:$0xff] %v218_v9  ;;  %v224_v12 = vld [vmem:[%s8739_s6 + $0x60] sm:$0xff] }
  0x18   : > { %221 = vst [vmem:[%s8744_s7 + $0x50] sm:$0xff] %v220_v10  ;;  %223 = vst [vmem:[%s8744_s7 + $0x58] sm:$0xff] %v222_v11  ;;  %v226_v13 = vld [vmem:[%s8739_s6 + $0x68] sm:$0xff]  ;;  %v228_v14 = vld [vmem:[%s8739_s6 + $0x70] sm:$0xff] }
  0x19   : > { %225 = vst [vmem:[%s8744_s7 + $0x60] sm:$0xff] %v224_v12  ;;  %227 = vst [vmem:[%s8744_s7 + $0x68] sm:$0xff] %v226_v13  ;;  %v230_v15 = vld [vmem:[%s8739_s6 + $0x78] sm:$0xff]  ;;  %v232_v16 = vld [vmem:[%s8739_s6 + $0x80] sm:$0xff] }
  0x1a   : > { %229 = vst [vmem:[%s8744_s7 + $0x70] sm:$0xff] %v228_v14  ;;  %v234_v17 = vld [vmem:[%s8739_s6 + $0x88] sm:$0xff]  ;;  %231 = vst [vmem:[%s8744_s7 + $0x78] sm:$0xff] %v230_v15  ;;  %v236_v18 = vld [vmem:[%s8739_s6 + $0x120] sm:$0xff] }
  0x1b   : > { %233 = vst [vmem:[%s8744_s7 + $0x80] sm:$0xff] %v232_v16  ;;  %235 = vst [vmem:[%s8744_s7 + $0x88] sm:$0xff] %v234_v17  ;;  %v238_v19 = vld [vmem:[%s8739_s6 + $0x128] sm:$0xff]  ;;  %v240_v20 = vld [vmem:[%s8739_s6 + $0x130] sm:$0xff] }
  0x1c   : > { %237 = vst [vmem:[%s8744_s7 + $0x90] sm:$0xff] %v236_v18  ;;  %239 = vst [vmem:[%s8744_s7 + $0x98] sm:$0xff] %v238_v19  ;;  %v242_v21 = vld [vmem:[%s8739_s6 + $0x138] sm:$0xff]  ;;  %v244_v22 = vld [vmem:[%s8739_s6 + $0x140] sm:$0xff] }
  0x1d   : > { %241 = vst [vmem:[%s8744_s7 + $0xa0] sm:$0xff] %v240_v20  ;;  %v246_v23 = vld [vmem:[%s8739_s6 + $0x148] sm:$0xff]  ;;  %243 = vst [vmem:[%s8744_s7 + $0xa8] sm:$0xff] %v242_v21  ;;  %v248_v24 = vld [vmem:[%s8739_s6 + $0x150] sm:$0xff] }
  0x1e   : > { %245 = vst [vmem:[%s8744_s7 + $0xb0] sm:$0xff] %v244_v22  ;;  %247 = vst [vmem:[%s8744_s7 + $0xb8] sm:$0xff] %v246_v23  ;;  %v250_v25 = vld [vmem:[%s8739_s6 + $0x158] sm:$0xff]  ;;  %v252_v26 = vld [vmem:[%s8739_s6 + $0x160] sm:$0xff] }
  0x1f   : > { %249 = vst [vmem:[%s8744_s7 + $0xc0] sm:$0xff] %v248_v24  ;;  %251 = vst [vmem:[%s8744_s7 + $0xc8] sm:$0xff] %v250_v25  ;;  %v254_v27 = vld [vmem:[%s8739_s6 + $0x168] sm:$0xff]  ;;  %v256_v28 = vld [vmem:[%s8739_s6 + $0x170] sm:$0xff] }
  0x20   : > { %253 = vst [vmem:[%s8744_s7 + $0xd0] sm:$0xff] %v252_v26  ;;  %v258_v29 = vld [vmem:[%s8739_s6 + $0x178] sm:$0xff]  ;;  %255 = vst [vmem:[%s8744_s7 + $0xd8] sm:$0xff] %v254_v27  ;;  %v260_v30 = vld [vmem:[%s8739_s6 + $0x180] sm:$0xff] }
  0x21   : > { %257 = vst [vmem:[%s8744_s7 + $0xe0] sm:$0xff] %v256_v28  ;;  %259 = vst [vmem:[%s8744_s7 + $0xe8] sm:$0xff] %v258_v29  ;;  %v262_v31 = vld [vmem:[%s8739_s6 + $0x188] sm:$0xff]  ;;  %v264_v32 = vld [vmem:[%s8739_s6 + $0x190] sm:$0xff] }
  0x22   : > { %261 = vst [vmem:[%s8744_s7 + $0xf0] sm:$0xff] %v260_v30  ;;  %263 = vst [vmem:[%s8744_s7 + $0xf8] sm:$0xff] %v262_v31  ;;  %v266_v33 = vld [vmem:[%s8739_s6 + $0x198] sm:$0xff]  ;;  %v268_v34 = vld [vmem:[%s8739_s6 + $0x1a0] sm:$0xff] }
  0x23   : > { %265 = vst [vmem:[%s8744_s7 + $0x100] sm:$0xff] %v264_v32  ;;  %v270_v35 = vld [vmem:[%s8739_s6 + $0x1a8] sm:$0xff]  ;;  %267 = vst [vmem:[%s8744_s7 + $0x108] sm:$0xff] %v266_v33  ;;  %v272_v36 = vld [vmem:[%s8739_s6 + $0x240] sm:$0xff] }
  0x24   : > { %269 = vst [vmem:[%s8744_s7 + $0x110] sm:$0xff] %v268_v34  ;;  %271 = vst [vmem:[%s8744_s7 + $0x118] sm:$0xff] %v270_v35  ;;  %v274_v37 = vld [vmem:[%s8739_s6 + $0x248] sm:$0xff]  ;;  %v276_v38 = vld [vmem:[%s8739_s6 + $0x250] sm:$0xff] }
  0x25   : > { %273 = vst [vmem:[%s8744_s7 + $0x120] sm:$0xff] %v272_v36  ;;  %275 = vst [vmem:[%s8744_s7 + $0x128] sm:$0xff] %v274_v37  ;;  %v278_v39 = vld [vmem:[%s8739_s6 + $0x258] sm:$0xff]  ;;  %v280_v40 = vld [vmem:[%s8739_s6 + $0x260] sm:$0xff] }
  0x26   : > { %277 = vst [vmem:[%s8744_s7 + $0x130] sm:$0xff] %v276_v38  ;;  %v282_v41 = vld [vmem:[%s8739_s6 + $0x268] sm:$0xff]  ;;  %279 = vst [vmem:[%s8744_s7 + $0x138] sm:$0xff] %v278_v39  ;;  %v284_v42 = vld [vmem:[%s8739_s6 + $0x270] sm:$0xff] }
  0x27   : > { %281 = vst [vmem:[%s8744_s7 + $0x140] sm:$0xff] %v280_v40  ;;  %283 = vst [vmem:[%s8744_s7 + $0x148] sm:$0xff] %v282_v41  ;;  %v286_v43 = vld [vmem:[%s8739_s6 + $0x278] sm:$0xff]  ;;  %v288_v44 = vld [vmem:[%s8739_s6 + $0x280] sm:$0xff] }
  0x28   : > { %285 = vst [vmem:[%s8744_s7 + $0x150] sm:$0xff] %v284_v42  ;;  %287 = vst [vmem:[%s8744_s7 + $0x158] sm:$0xff] %v286_v43  ;;  %v290_v45 = vld [vmem:[%s8739_s6 + $0x288] sm:$0xff]  ;;  %v292_v46 = vld [vmem:[%s8739_s6 + $0x290] sm:$0xff] }
  0x29   : > { %289 = vst [vmem:[%s8744_s7 + $0x160] sm:$0xff] %v288_v44  ;;  %v294_v47 = vld [vmem:[%s8739_s6 + $0x298] sm:$0xff]  ;;  %291 = vst [vmem:[%s8744_s7 + $0x168] sm:$0xff] %v290_v45  ;;  %v296_v48 = vld [vmem:[%s8739_s6 + $0x2a0] sm:$0xff] }
  0x2a   : > { %293 = vst [vmem:[%s8744_s7 + $0x170] sm:$0xff] %v292_v46  ;;  %295 = vst [vmem:[%s8744_s7 + $0x178] sm:$0xff] %v294_v47  ;;  %v298_v49 = vld [vmem:[%s8739_s6 + $0x2a8] sm:$0xff]  ;;  %v300_v50 = vld [vmem:[%s8739_s6 + $0x2b0] sm:$0xff] }
  0x2b   : > { %297 = vst [vmem:[%s8744_s7 + $0x180] sm:$0xff] %v296_v48  ;;  %299 = vst [vmem:[%s8744_s7 + $0x188] sm:$0xff] %v298_v49  ;;  %v302_v51 = vld [vmem:[%s8739_s6 + $0x2b8] sm:$0xff]  ;;  %v304_v52 = vld [vmem:[%s8739_s6 + $0x2c0] sm:$0xff] }
  0x2c   : > { %301 = vst [vmem:[%s8744_s7 + $0x190] sm:$0xff] %v300_v50  ;;  %v306_v53 = vld [vmem:[%s8739_s6 + $0x2c8] sm:$0xff]  ;;  %303 = vst [vmem:[%s8744_s7 + $0x198] sm:$0xff] %v302_v51  ;;  %v308_v54 = vld [vmem:[%s8739_s6 + $0x360] sm:$0xff] }
  0x2d   : > { %305 = vst [vmem:[%s8744_s7 + $0x1a0] sm:$0xff] %v304_v52  ;;  %307 = vst [vmem:[%s8744_s7 + $0x1a8] sm:$0xff] %v306_v53  ;;  %v310_v55 = vld [vmem:[%s8739_s6 + $0x368] sm:$0xff]  ;;  %v312_v56 = vld [vmem:[%s8739_s6 + $0x370] sm:$0xff] }
  0x2e   : > { %309 = vst [vmem:[%s8744_s7 + $0x1b0] sm:$0xff] %v308_v54  ;;  %311 = vst [vmem:[%s8744_s7 + $0x1b8] sm:$0xff] %v310_v55  ;;  %v314_v57 = vld [vmem:[%s8739_s6 + $0x378] sm:$0xff]  ;;  %v316_v58 = vld [vmem:[%s8739_s6 + $0x380] sm:$0xff] }
  0x2f   : > { %313 = vst [vmem:[%s8744_s7 + $0x1c0] sm:$0xff] %v312_v56  ;;  %v318_v59 = vld [vmem:[%s8739_s6 + $0x388] sm:$0xff]  ;;  %315 = vst [vmem:[%s8744_s7 + $0x1c8] sm:$0xff] %v314_v57  ;;  %v320_v60 = vld [vmem:[%s8739_s6 + $0x390] sm:$0xff] }
  0x30   : > { %317 = vst [vmem:[%s8744_s7 + $0x1d0] sm:$0xff] %v316_v58  ;;  %319 = vst [vmem:[%s8744_s7 + $0x1d8] sm:$0xff] %v318_v59  ;;  %v322_v61 = vld [vmem:[%s8739_s6 + $0x398] sm:$0xff]  ;;  %v324_v62 = vld [vmem:[%s8739_s6 + $0x3a0] sm:$0xff] }
  0x31   : > { %321 = vst [vmem:[%s8744_s7 + $0x1e0] sm:$0xff] %v320_v60  ;;  %323 = vst [vmem:[%s8744_s7 + $0x1e8] sm:$0xff] %v322_v61  ;;  %v326_v63 = vld [vmem:[%s8739_s6 + $0x3a8] sm:$0xff]  ;;  %v328_v0 = vld [vmem:[%s8739_s6 + $0x3b0] sm:$0xff] }
  0x32   : > { %325 = vst [vmem:[%s8744_s7 + $0x1f0] sm:$0xff] %v324_v62  ;;  %v330_v1 = vld [vmem:[%s8739_s6 + $0x3b8] sm:$0xff]  ;;  %327 = vst [vmem:[%s8744_s7 + $0x1f8] sm:$0xff] %v326_v63  ;;  %v332_v2 = vld [vmem:[%s8739_s6 + $0x3c0] sm:$0xff] }
  0x33   : > { %329 = vst [vmem:[%s8744_s7 + $0x200] sm:$0xff] %v328_v0  ;;  %331 = vst [vmem:[%s8744_s7 + $0x208] sm:$0xff] %v330_v1  ;;  %v334_v3 = vld [vmem:[%s8739_s6 + $0x3c8] sm:$0xff]  ;;  %v336_v4 = vld [vmem:[%s8739_s6 + $0x3d0] sm:$0xff] }
  0x34   : > { %333 = vst [vmem:[%s8744_s7 + $0x210] sm:$0xff] %v332_v2  ;;  %335 = vst [vmem:[%s8744_s7 + $0x218] sm:$0xff] %v334_v3  ;;  %v338_v5 = vld [vmem:[%s8739_s6 + $0x3d8] sm:$0xff]  ;;  %v340_v6 = vld [vmem:[%s8739_s6 + $0x3e0] sm:$0xff] }
  0x35   : > { %337 = vst [vmem:[%s8744_s7 + $0x220] sm:$0xff] %v336_v4  ;;  %v342_v7 = vld [vmem:[%s8739_s6 + $0x3e8] sm:$0xff]  ;;  %339 = vst [vmem:[%s8744_s7 + $0x228] sm:$0xff] %v338_v5  ;;  %v344_v8 = vld [vmem:[%s8739_s6 + $0x480] sm:$0xff] }
  0x36   : > { %341 = vst [vmem:[%s8744_s7 + $0x230] sm:$0xff] %v340_v6  ;;  %343 = vst [vmem:[%s8744_s7 + $0x238] sm:$0xff] %v342_v7  ;;  %v346_v9 = vld [vmem:[%s8739_s6 + $0x488] sm:$0xff]  ;;  %v348_v10 = vld [vmem:[%s8739_s6 + $0x490] sm:$0xff] }
  0x37   : > { %345 = vst [vmem:[%s8744_s7 + $0x240] sm:$0xff] %v344_v8  ;;  %347 = vst [vmem:[%s8744_s7 + $0x248] sm:$0xff] %v346_v9  ;;  %v350_v11 = vld [vmem:[%s8739_s6 + $0x498] sm:$0xff]  ;;  %v352_v12 = vld [vmem:[%s8739_s6 + $0x4a0] sm:$0xff] }
  0x38   : > { %349 = vst [vmem:[%s8744_s7 + $0x250] sm:$0xff] %v348_v10  ;;  %v354_v13 = vld [vmem:[%s8739_s6 + $0x4a8] sm:$0xff]  ;;  %351 = vst [vmem:[%s8744_s7 + $0x258] sm:$0xff] %v350_v11  ;;  %v356_v14 = vld [vmem:[%s8739_s6 + $0x4b0] sm:$0xff] }
  0x39   : > { %353 = vst [vmem:[%s8744_s7 + $0x260] sm:$0xff] %v352_v12  ;;  %355 = vst [vmem:[%s8744_s7 + $0x268] sm:$0xff] %v354_v13  ;;  %v358_v15 = vld [vmem:[%s8739_s6 + $0x4b8] sm:$0xff]  ;;  %v360_v16 = vld [vmem:[%s8739_s6 + $0x4c0] sm:$0xff] }
  0x3a   : > { %357 = vst [vmem:[%s8744_s7 + $0x270] sm:$0xff] %v356_v14  ;;  %359 = vst [vmem:[%s8744_s7 + $0x278] sm:$0xff] %v358_v15  ;;  %v362_v17 = vld [vmem:[%s8739_s6 + $0x4c8] sm:$0xff]  ;;  %v364_v18 = vld [vmem:[%s8739_s6 + $0x4d0] sm:$0xff] }
  0x3b   : > { %361 = vst [vmem:[%s8744_s7 + $0x280] sm:$0xff] %v360_v16  ;;  %v366_v19 = vld [vmem:[%s8739_s6 + $0x4d8] sm:$0xff]  ;;  %363 = vst [vmem:[%s8744_s7 + $0x288] sm:$0xff] %v362_v17  ;;  %v368_v20 = vld [vmem:[%s8739_s6 + $0x4e0] sm:$0xff] }
  0x3c   : > { %365 = vst [vmem:[%s8744_s7 + $0x290] sm:$0xff] %v364_v18  ;;  %367 = vst [vmem:[%s8744_s7 + $0x298] sm:$0xff] %v366_v19  ;;  %v370_v21 = vld [vmem:[%s8739_s6 + $0x4e8] sm:$0xff]  ;;  %v372_v22 = vld [vmem:[%s8739_s6 + $0x4f0] sm:$0xff] }
  0x3d   : > { %369 = vst [vmem:[%s8744_s7 + $0x2a0] sm:$0xff] %v368_v20  ;;  %371 = vst [vmem:[%s8744_s7 + $0x2a8] sm:$0xff] %v370_v21  ;;  %v374_v23 = vld [vmem:[%s8739_s6 + $0x4f8] sm:$0xff]  ;;  %v376_v24 = vld [vmem:[%s8739_s6 + $0x500] sm:$0xff] }
  0x3e   : > { %373 = vst [vmem:[%s8744_s7 + $0x2b0] sm:$0xff] %v372_v22  ;;  %v378_v25 = vld [vmem:[%s8739_s6 + $0x508] sm:$0xff]  ;;  %375 = vst [vmem:[%s8744_s7 + $0x2b8] sm:$0xff] %v374_v23  ;;  %v380_v26 = vld [vmem:[%s8739_s6 + $0x5a0] sm:$0xff] }
  0x3f   : > { %377 = vst [vmem:[%s8744_s7 + $0x2c0] sm:$0xff] %v376_v24  ;;  %379 = vst [vmem:[%s8744_s7 + $0x2c8] sm:$0xff] %v378_v25  ;;  %v382_v27 = vld [vmem:[%s8739_s6 + $0x5a8] sm:$0xff]  ;;  %v384_v28 = vld [vmem:[%s8739_s6 + $0x5b0] sm:$0xff] }
  0x40   : > { %381 = vst [vmem:[%s8744_s7 + $0x2d0] sm:$0xff] %v380_v26  ;;  %383 = vst [vmem:[%s8744_s7 + $0x2d8] sm:$0xff] %v382_v27  ;;  %v386_v29 = vld [vmem:[%s8739_s6 + $0x5b8] sm:$0xff]  ;;  %v388_v30 = vld [vmem:[%s8739_s6 + $0x5c0] sm:$0xff] }
  0x41   : > { %385 = vst [vmem:[%s8744_s7 + $0x2e0] sm:$0xff] %v384_v28  ;;  %v390_v31 = vld [vmem:[%s8739_s6 + $0x5c8] sm:$0xff]  ;;  %387 = vst [vmem:[%s8744_s7 + $0x2e8] sm:$0xff] %v386_v29  ;;  %v392_v32 = vld [vmem:[%s8739_s6 + $0x5d0] sm:$0xff] }
  0x42   : > { %389 = vst [vmem:[%s8744_s7 + $0x2f0] sm:$0xff] %v388_v30  ;;  %391 = vst [vmem:[%s8744_s7 + $0x2f8] sm:$0xff] %v390_v31  ;;  %v394_v33 = vld [vmem:[%s8739_s6 + $0x5d8] sm:$0xff]  ;;  %v396_v34 = vld [vmem:[%s8739_s6 + $0x5e0] sm:$0xff] }
  0x43   : > { %393 = vst [vmem:[%s8744_s7 + $0x300] sm:$0xff] %v392_v32  ;;  %395 = vst [vmem:[%s8744_s7 + $0x308] sm:$0xff] %v394_v33  ;;  %v398_v35 = vld [vmem:[%s8739_s6 + $0x5e8] sm:$0xff]  ;;  %v400_v36 = vld [vmem:[%s8739_s6 + $0x5f0] sm:$0xff] }
  0x44   : > { %397 = vst [vmem:[%s8744_s7 + $0x310] sm:$0xff] %v396_v34  ;;  %v402_v37 = vld [vmem:[%s8739_s6 + $0x5f8] sm:$0xff]  ;;  %399 = vst [vmem:[%s8744_s7 + $0x318] sm:$0xff] %v398_v35  ;;  %v404_v38 = vld [vmem:[%s8739_s6 + $0x600] sm:$0xff] }
  0x45   : > { %401 = vst [vmem:[%s8744_s7 + $0x320] sm:$0xff] %v400_v36  ;;  %403 = vst [vmem:[%s8744_s7 + $0x328] sm:$0xff] %v402_v37  ;;  %v406_v39 = vld [vmem:[%s8739_s6 + $0x608] sm:$0xff]  ;;  %v408_v40 = vld [vmem:[%s8739_s6 + $0x610] sm:$0xff] }
  0x46   : > { %405 = vst [vmem:[%s8744_s7 + $0x330] sm:$0xff] %v404_v38  ;;  %407 = vst [vmem:[%s8744_s7 + $0x338] sm:$0xff] %v406_v39  ;;  %v410_v41 = vld [vmem:[%s8739_s6 + $0x618] sm:$0xff]  ;;  %v412_v42 = vld [vmem:[%s8739_s6 + $0x620] sm:$0xff] }
  0x47   : > { %409 = vst [vmem:[%s8744_s7 + $0x340] sm:$0xff] %v408_v40  ;;  %v414_v43 = vld [vmem:[%s8739_s6 + $0x628] sm:$0xff]  ;;  %411 = vst [vmem:[%s8744_s7 + $0x348] sm:$0xff] %v410_v41  ;;  %v416_v44 = vld [vmem:[%s8739_s6 + $0x6c0] sm:$0xff] }
  0x48   : > { %413 = vst [vmem:[%s8744_s7 + $0x350] sm:$0xff] %v412_v42  ;;  %415 = vst [vmem:[%s8744_s7 + $0x358] sm:$0xff] %v414_v43  ;;  %v418_v45 = vld [vmem:[%s8739_s6 + $0x6c8] sm:$0xff]  ;;  %v420_v46 = vld [vmem:[%s8739_s6 + $0x6d0] sm:$0xff] }
  0x49   : > { %417 = vst [vmem:[%s8744_s7 + $0x360] sm:$0xff] %v416_v44  ;;  %419 = vst [vmem:[%s8744_s7 + $0x368] sm:$0xff] %v418_v45  ;;  %v422_v47 = vld [vmem:[%s8739_s6 + $0x6d8] sm:$0xff]  ;;  %v424_v48 = vld [vmem:[%s8739_s6 + $0x6e0] sm:$0xff] }
  0x4a   : > { %421 = vst [vmem:[%s8744_s7 + $0x370] sm:$0xff] %v420_v46  ;;  %v426_v49 = vld [vmem:[%s8739_s6 + $0x6e8] sm:$0xff]  ;;  %423 = vst [vmem:[%s8744_s7 + $0x378] sm:$0xff] %v422_v47  ;;  %v428_v50 = vld [vmem:[%s8739_s6 + $0x6f0] sm:$0xff] }
  0x4b   : > { %425 = vst [vmem:[%s8744_s7 + $0x380] sm:$0xff] %v424_v48  ;;  %427 = vst [vmem:[%s8744_s7 + $0x388] sm:$0xff] %v426_v49  ;;  %v430_v51 = vld [vmem:[%s8739_s6 + $0x6f8] sm:$0xff]  ;;  %v432_v52 = vld [vmem:[%s8739_s6 + $0x700] sm:$0xff] }
  0x4c   : > { %429 = vst [vmem:[%s8744_s7 + $0x390] sm:$0xff] %v428_v50  ;;  %431 = vst [vmem:[%s8744_s7 + $0x398] sm:$0xff] %v430_v51  ;;  %v434_v53 = vld [vmem:[%s8739_s6 + $0x708] sm:$0xff]  ;;  %v436_v54 = vld [vmem:[%s8739_s6 + $0x710] sm:$0xff] }
  0x4d   : > { %433 = vst [vmem:[%s8744_s7 + $0x3a0] sm:$0xff] %v432_v52  ;;  %v438_v55 = vld [vmem:[%s8739_s6 + $0x718] sm:$0xff]  ;;  %435 = vst [vmem:[%s8744_s7 + $0x3a8] sm:$0xff] %v434_v53  ;;  %v440_v56 = vld [vmem:[%s8739_s6 + $0x720] sm:$0xff] }
  0x4e   : > { %437 = vst [vmem:[%s8744_s7 + $0x3b0] sm:$0xff] %v436_v54  ;;  %439 = vst [vmem:[%s8744_s7 + $0x3b8] sm:$0xff] %v438_v55  ;;  %v442_v57 = vld [vmem:[%s8739_s6 + $0x728] sm:$0xff]  ;;  %v444_v58 = vld [vmem:[%s8739_s6 + $0x730] sm:$0xff] }
  0x4f   : > { %441 = vst [vmem:[%s8744_s7 + $0x3c0] sm:$0xff] %v440_v56  ;;  %443 = vst [vmem:[%s8744_s7 + $0x3c8] sm:$0xff] %v442_v57  ;;  %v446_v59 = vld [vmem:[%s8739_s6 + $0x738] sm:$0xff]  ;;  %v448_v60 = vld [vmem:[%s8739_s6 + $0x740] sm:$0xff] }
  0x50   : > { %445 = vst [vmem:[%s8744_s7 + $0x3d0] sm:$0xff] %v444_v58  ;;  %v450_v61 = vld [vmem:[%s8739_s6 + $0x748] sm:$0xff]  ;;  %447 = vst [vmem:[%s8744_s7 + $0x3d8] sm:$0xff] %v446_v59  ;;  %v452_v62 = vld [vmem:[%s8739_s6 + $0x7e0] sm:$0xff] }
  0x51   : > { %449 = vst [vmem:[%s8744_s7 + $0x3e0] sm:$0xff] %v448_v60  ;;  %451 = vst [vmem:[%s8744_s7 + $0x3e8] sm:$0xff] %v450_v61  ;;  %v454_v63 = vld [vmem:[%s8739_s6 + $0x7e8] sm:$0xff]  ;;  %v456_v0 = vld [vmem:[%s8739_s6 + $0x7f0] sm:$0xff] }
  0x52   : > { %453 = vst [vmem:[%s8744_s7 + $0x3f0] sm:$0xff] %v452_v62  ;;  %455 = vst [vmem:[%s8744_s7 + $0x3f8] sm:$0xff] %v454_v63  ;;  %v458_v1 = vld [vmem:[%s8739_s6 + $0x7f8] sm:$0xff]  ;;  %v460_v2 = vld [vmem:[%s8739_s6 + $0x800] sm:$0xff] }
  0x53   : > { %457 = vst [vmem:[%s8744_s7 + $0x400] sm:$0xff] %v456_v0  ;;  %v462_v3 = vld [vmem:[%s8739_s6 + $0x808] sm:$0xff]  ;;  %459 = vst [vmem:[%s8744_s7 + $0x408] sm:$0xff] %v458_v1  ;;  %v464_v4 = vld [vmem:[%s8739_s6 + $0x810] sm:$0xff] }
  0x54   : > { %461 = vst [vmem:[%s8744_s7 + $0x410] sm:$0xff] %v460_v2  ;;  %463 = vst [vmem:[%s8744_s7 + $0x418] sm:$0xff] %v462_v3  ;;  %v466_v5 = vld [vmem:[%s8739_s6 + $0x818] sm:$0xff]  ;;  %v468_v6 = vld [vmem:[%s8739_s6 + $0x820] sm:$0xff] }
  0x55   : > { %465 = vst [vmem:[%s8744_s7 + $0x420] sm:$0xff] %v464_v4  ;;  %467 = vst [vmem:[%s8744_s7 + $0x428] sm:$0xff] %v466_v5  ;;  %v470_v7 = vld [vmem:[%s8739_s6 + $0x828] sm:$0xff]  ;;  %v472_v8 = vld [vmem:[%s8739_s6 + $0x830] sm:$0xff] }
  0x56   : > { %469 = vst [vmem:[%s8744_s7 + $0x430] sm:$0xff] %v468_v6  ;;  %v474_v9 = vld [vmem:[%s8739_s6 + $0x838] sm:$0xff]  ;;  %471 = vst [vmem:[%s8744_s7 + $0x438] sm:$0xff] %v470_v7  ;;  %v476_v10 = vld [vmem:[%s8739_s6 + $0x840] sm:$0xff] }
  0x57   : > { %473 = vst [vmem:[%s8744_s7 + $0x440] sm:$0xff] %v472_v8  ;;  %475 = vst [vmem:[%s8744_s7 + $0x448] sm:$0xff] %v474_v9  ;;  %v478_v11 = vld [vmem:[%s8739_s6 + $0x848] sm:$0xff]  ;;  %v480_v12 = vld [vmem:[%s8739_s6 + $0x850] sm:$0xff] }
  0x58   : > { %477 = vst [vmem:[%s8744_s7 + $0x450] sm:$0xff] %v476_v10  ;;  %479 = vst [vmem:[%s8744_s7 + $0x458] sm:$0xff] %v478_v11  ;;  %v482_v13 = vld [vmem:[%s8739_s6 + $0x858] sm:$0xff]  ;;  %v484_v14 = vld [vmem:[%s8739_s6 + $0x860] sm:$0xff] }
  0x59   : > { %481 = vst [vmem:[%s8744_s7 + $0x460] sm:$0xff] %v480_v12  ;;  %v486_v15 = vld [vmem:[%s8739_s6 + $0x868] sm:$0xff]  ;;  %483 = vst [vmem:[%s8744_s7 + $0x468] sm:$0xff] %v482_v13  ;;  %v488_v16 = vld [vmem:[%s8739_s6 + $0x900] sm:$0xff] }
  0x5a   : > { %485 = vst [vmem:[%s8744_s7 + $0x470] sm:$0xff] %v484_v14  ;;  %487 = vst [vmem:[%s8744_s7 + $0x478] sm:$0xff] %v486_v15  ;;  %v490_v17 = vld [vmem:[%s8739_s6 + $0x908] sm:$0xff]  ;;  %v492_v18 = vld [vmem:[%s8739_s6 + $0x910] sm:$0xff] }
  0x5b   : > { %489 = vst [vmem:[%s8744_s7 + $0x480] sm:$0xff] %v488_v16  ;;  %491 = vst [vmem:[%s8744_s7 + $0x488] sm:$0xff] %v490_v17  ;;  %v494_v19 = vld [vmem:[%s8739_s6 + $0x918] sm:$0xff]  ;;  %v496_v20 = vld [vmem:[%s8739_s6 + $0x920] sm:$0xff] }
  0x5c   : > { %493 = vst [vmem:[%s8744_s7 + $0x490] sm:$0xff] %v492_v18  ;;  %v498_v21 = vld [vmem:[%s8739_s6 + $0x928] sm:$0xff]  ;;  %495 = vst [vmem:[%s8744_s7 + $0x498] sm:$0xff] %v494_v19  ;;  %v500_v22 = vld [vmem:[%s8739_s6 + $0x930] sm:$0xff] }
  0x5d   : > { %497 = vst [vmem:[%s8744_s7 + $0x4a0] sm:$0xff] %v496_v20  ;;  %499 = vst [vmem:[%s8744_s7 + $0x4a8] sm:$0xff] %v498_v21  ;;  %v502_v23 = vld [vmem:[%s8739_s6 + $0x938] sm:$0xff]  ;;  %v504_v24 = vld [vmem:[%s8739_s6 + $0x940] sm:$0xff] }
  0x5e   : > { %501 = vst [vmem:[%s8744_s7 + $0x4b0] sm:$0xff] %v500_v22  ;;  %503 = vst [vmem:[%s8744_s7 + $0x4b8] sm:$0xff] %v502_v23  ;;  %v506_v25 = vld [vmem:[%s8739_s6 + $0x948] sm:$0xff]  ;;  %v508_v26 = vld [vmem:[%s8739_s6 + $0x950] sm:$0xff] }
  0x5f   : > { %505 = vst [vmem:[%s8744_s7 + $0x4c0] sm:$0xff] %v504_v24  ;;  %v510_v27 = vld [vmem:[%s8739_s6 + $0x958] sm:$0xff]  ;;  %507 = vst [vmem:[%s8744_s7 + $0x4c8] sm:$0xff] %v506_v25  ;;  %v512_v28 = vld [vmem:[%s8739_s6 + $0x960] sm:$0xff] }
  0x60   : > { %509 = vst [vmem:[%s8744_s7 + $0x4d0] sm:$0xff] %v508_v26  ;;  %511 = vst [vmem:[%s8744_s7 + $0x4d8] sm:$0xff] %v510_v27  ;;  %v514_v29 = vld [vmem:[%s8739_s6 + $0x968] sm:$0xff]  ;;  %v516_v30 = vld [vmem:[%s8739_s6 + $0x970] sm:$0xff] }
  0x61   : > { %513 = vst [vmem:[%s8744_s7 + $0x4e0] sm:$0xff] %v512_v28  ;;  %515 = vst [vmem:[%s8744_s7 + $0x4e8] sm:$0xff] %v514_v29  ;;  %v518_v31 = vld [vmem:[%s8739_s6 + $0x978] sm:$0xff]  ;;  %v520_v32 = vld [vmem:[%s8739_s6 + $0x980] sm:$0xff] }
  0x62   : > { %517 = vst [vmem:[%s8744_s7 + $0x4f0] sm:$0xff] %v516_v30  ;;  %v522_v33 = vld [vmem:[%s8739_s6 + $0x988] sm:$0xff]  ;;  %519 = vst [vmem:[%s8744_s7 + $0x4f8] sm:$0xff] %v518_v31  ;;  %v524_v34 = vld [vmem:[%s8739_s6 + $0xa20] sm:$0xff] }
  0x63   : > { %521 = vst [vmem:[%s8744_s7 + $0x500] sm:$0xff] %v520_v32  ;;  %523 = vst [vmem:[%s8744_s7 + $0x508] sm:$0xff] %v522_v33  ;;  %v526_v35 = vld [vmem:[%s8739_s6 + $0xa28] sm:$0xff]  ;;  %v528_v36 = vld [vmem:[%s8739_s6 + $0xa30] sm:$0xff] }
  0x64   : > { %525 = vst [vmem:[%s8744_s7 + $0x510] sm:$0xff] %v524_v34  ;;  %527 = vst [vmem:[%s8744_s7 + $0x518] sm:$0xff] %v526_v35  ;;  %v530_v37 = vld [vmem:[%s8739_s6 + $0xa38] sm:$0xff]  ;;  %v532_v38 = vld [vmem:[%s8739_s6 + $0xa40] sm:$0xff] }
  0x65   : > { %529 = vst [vmem:[%s8744_s7 + $0x520] sm:$0xff] %v528_v36  ;;  %v534_v39 = vld [vmem:[%s8739_s6 + $0xa48] sm:$0xff]  ;;  %531 = vst [vmem:[%s8744_s7 + $0x528] sm:$0xff] %v530_v37  ;;  %v536_v40 = vld [vmem:[%s8739_s6 + $0xa50] sm:$0xff] }
  0x66   : > { %533 = vst [vmem:[%s8744_s7 + $0x530] sm:$0xff] %v532_v38  ;;  %535 = vst [vmem:[%s8744_s7 + $0x538] sm:$0xff] %v534_v39  ;;  %v538_v41 = vld [vmem:[%s8739_s6 + $0xa58] sm:$0xff]  ;;  %v540_v42 = vld [vmem:[%s8739_s6 + $0xa60] sm:$0xff] }
  0x67   : > { %537 = vst [vmem:[%s8744_s7 + $0x540] sm:$0xff] %v536_v40  ;;  %539 = vst [vmem:[%s8744_s7 + $0x548] sm:$0xff] %v538_v41  ;;  %v542_v43 = vld [vmem:[%s8739_s6 + $0xa68] sm:$0xff]  ;;  %v544_v44 = vld [vmem:[%s8739_s6 + $0xa70] sm:$0xff] }
  0x68   : > { %541 = vst [vmem:[%s8744_s7 + $0x550] sm:$0xff] %v540_v42  ;;  %v546_v45 = vld [vmem:[%s8739_s6 + $0xa78] sm:$0xff]  ;;  %543 = vst [vmem:[%s8744_s7 + $0x558] sm:$0xff] %v542_v43  ;;  %v548_v46 = vld [vmem:[%s8739_s6 + $0xa80] sm:$0xff] }
  0x69   : > { %545 = vst [vmem:[%s8744_s7 + $0x560] sm:$0xff] %v544_v44  ;;  %547 = vst [vmem:[%s8744_s7 + $0x568] sm:$0xff] %v546_v45  ;;  %v550_v47 = vld [vmem:[%s8739_s6 + $0xa88] sm:$0xff]  ;;  %v552_v48 = vld [vmem:[%s8739_s6 + $0xa90] sm:$0xff] }
  0x6a   : > { %549 = vst [vmem:[%s8744_s7 + $0x570] sm:$0xff] %v548_v46  ;;  %551 = vst [vmem:[%s8744_s7 + $0x578] sm:$0xff] %v550_v47  ;;  %v554_v49 = vld [vmem:[%s8739_s6 + $0xa98] sm:$0xff]  ;;  %v556_v50 = vld [vmem:[%s8739_s6 + $0xaa0] sm:$0xff] }
  0x6b   : > { %553 = vst [vmem:[%s8744_s7 + $0x580] sm:$0xff] %v552_v48  ;;  %v558_v51 = vld [vmem:[%s8739_s6 + $0xaa8] sm:$0xff]  ;;  %555 = vst [vmem:[%s8744_s7 + $0x588] sm:$0xff] %v554_v49  ;;  %v560_v52 = vld [vmem:[%s8739_s6 + $0xb40] sm:$0xff] }
  0x6c   : > { %557 = vst [vmem:[%s8744_s7 + $0x590] sm:$0xff] %v556_v50  ;;  %559 = vst [vmem:[%s8744_s7 + $0x598] sm:$0xff] %v558_v51  ;;  %v562_v53 = vld [vmem:[%s8739_s6 + $0xb48] sm:$0xff]  ;;  %v564_v54 = vld [vmem:[%s8739_s6 + $0xb50] sm:$0xff] }
  0x6d   : > { %561 = vst [vmem:[%s8744_s7 + $0x5a0] sm:$0xff] %v560_v52  ;;  %563 = vst [vmem:[%s8744_s7 + $0x5a8] sm:$0xff] %v562_v53  ;;  %v566_v55 = vld [vmem:[%s8739_s6 + $0xb58] sm:$0xff]  ;;  %v568_v56 = vld [vmem:[%s8739_s6 + $0xb60] sm:$0xff] }
  0x6e   : > { %565 = vst [vmem:[%s8744_s7 + $0x5b0] sm:$0xff] %v564_v54  ;;  %v570_v57 = vld [vmem:[%s8739_s6 + $0xb68] sm:$0xff]  ;;  %567 = vst [vmem:[%s8744_s7 + $0x5b8] sm:$0xff] %v566_v55  ;;  %v572_v58 = vld [vmem:[%s8739_s6 + $0xb70] sm:$0xff] }
  0x6f   : > { %569 = vst [vmem:[%s8744_s7 + $0x5c0] sm:$0xff] %v568_v56  ;;  %571 = vst [vmem:[%s8744_s7 + $0x5c8] sm:$0xff] %v570_v57  ;;  %v574_v59 = vld [vmem:[%s8739_s6 + $0xb78] sm:$0xff]  ;;  %v576_v60 = vld [vmem:[%s8739_s6 + $0xb80] sm:$0xff] }
  0x70   : > { %573 = vst [vmem:[%s8744_s7 + $0x5d0] sm:$0xff] %v572_v58  ;;  %575 = vst [vmem:[%s8744_s7 + $0x5d8] sm:$0xff] %v574_v59  ;;  %v578_v61 = vld [vmem:[%s8739_s6 + $0xb88] sm:$0xff]  ;;  %v580_v62 = vld [vmem:[%s8739_s6 + $0xb90] sm:$0xff] }
  0x71   : > { %577 = vst [vmem:[%s8744_s7 + $0x5e0] sm:$0xff] %v576_v60  ;;  %v582_v63 = vld [vmem:[%s8739_s6 + $0xb98] sm:$0xff]  ;;  %579 = vst [vmem:[%s8744_s7 + $0x5e8] sm:$0xff] %v578_v61  ;;  %v584_v0 = vld [vmem:[%s8739_s6 + $0xba0] sm:$0xff] }
  0x72   : > { %581 = vst [vmem:[%s8744_s7 + $0x5f0] sm:$0xff] %v580_v62  ;;  %583 = vst [vmem:[%s8744_s7 + $0x5f8] sm:$0xff] %v582_v63  ;;  %v586_v1 = vld [vmem:[%s8739_s6 + $0xba8] sm:$0xff]  ;;  %v588_v2 = vld [vmem:[%s8739_s6 + $0xbb0] sm:$0xff] }
  0x73   : > { %585 = vst [vmem:[%s8744_s7 + $0x600] sm:$0xff] %v584_v0  ;;  %587 = vst [vmem:[%s8744_s7 + $0x608] sm:$0xff] %v586_v1  ;;  %v590_v3 = vld [vmem:[%s8739_s6 + $0xbb8] sm:$0xff]  ;;  %v592_v4 = vld [vmem:[%s8739_s6 + $0xbc0] sm:$0xff] }
  0x74   : > { %589 = vst [vmem:[%s8744_s7 + $0x610] sm:$0xff] %v588_v2  ;;  %v594_v5 = vld [vmem:[%s8739_s6 + $0xbc8] sm:$0xff]  ;;  %591 = vst [vmem:[%s8744_s7 + $0x618] sm:$0xff] %v590_v3  ;;  %v596_v6 = vld [vmem:[%s8739_s6 + $0xc60] sm:$0xff] }
  0x75   : > { %593 = vst [vmem:[%s8744_s7 + $0x620] sm:$0xff] %v592_v4  ;;  %595 = vst [vmem:[%s8744_s7 + $0x628] sm:$0xff] %v594_v5  ;;  %v598_v7 = vld [vmem:[%s8739_s6 + $0xc68] sm:$0xff]  ;;  %v600_v8 = vld [vmem:[%s8739_s6 + $0xc70] sm:$0xff] }
  0x76   : > { %597 = vst [vmem:[%s8744_s7 + $0x630] sm:$0xff] %v596_v6  ;;  %599 = vst [vmem:[%s8744_s7 + $0x638] sm:$0xff] %v598_v7  ;;  %v602_v9 = vld [vmem:[%s8739_s6 + $0xc78] sm:$0xff]  ;;  %v604_v10 = vld [vmem:[%s8739_s6 + $0xc80] sm:$0xff] }
  0x77   : > { %601 = vst [vmem:[%s8744_s7 + $0x640] sm:$0xff] %v600_v8  ;;  %v606_v11 = vld [vmem:[%s8739_s6 + $0xc88] sm:$0xff]  ;;  %603 = vst [vmem:[%s8744_s7 + $0x648] sm:$0xff] %v602_v9  ;;  %v608_v12 = vld [vmem:[%s8739_s6 + $0xc90] sm:$0xff] }
  0x78   : > { %605 = vst [vmem:[%s8744_s7 + $0x650] sm:$0xff] %v604_v10  ;;  %607 = vst [vmem:[%s8744_s7 + $0x658] sm:$0xff] %v606_v11  ;;  %v610_v13 = vld [vmem:[%s8739_s6 + $0xc98] sm:$0xff]  ;;  %v612_v14 = vld [vmem:[%s8739_s6 + $0xca0] sm:$0xff] }
  0x79   : > { %609 = vst [vmem:[%s8744_s7 + $0x660] sm:$0xff] %v608_v12  ;;  %611 = vst [vmem:[%s8744_s7 + $0x668] sm:$0xff] %v610_v13  ;;  %v614_v15 = vld [vmem:[%s8739_s6 + $0xca8] sm:$0xff]  ;;  %v616_v16 = vld [vmem:[%s8739_s6 + $0xcb0] sm:$0xff] }
  0x7a   : > { %613 = vst [vmem:[%s8744_s7 + $0x670] sm:$0xff] %v612_v14  ;;  %v618_v17 = vld [vmem:[%s8739_s6 + $0xcb8] sm:$0xff]  ;;  %615 = vst [vmem:[%s8744_s7 + $0x678] sm:$0xff] %v614_v15  ;;  %v620_v18 = vld [vmem:[%s8739_s6 + $0xcc0] sm:$0xff] }
  0x7b   : > { %617 = vst [vmem:[%s8744_s7 + $0x680] sm:$0xff] %v616_v16  ;;  %619 = vst [vmem:[%s8744_s7 + $0x688] sm:$0xff] %v618_v17  ;;  %v622_v19 = vld [vmem:[%s8739_s6 + $0xcc8] sm:$0xff]  ;;  %v624_v20 = vld [vmem:[%s8739_s6 + $0xcd0] sm:$0xff] }
  0x7c   : > { %621 = vst [vmem:[%s8744_s7 + $0x690] sm:$0xff] %v620_v18  ;;  %623 = vst [vmem:[%s8744_s7 + $0x698] sm:$0xff] %v622_v19  ;;  %v626_v21 = vld [vmem:[%s8739_s6 + $0xcd8] sm:$0xff]  ;;  %v628_v22 = vld [vmem:[%s8739_s6 + $0xce0] sm:$0xff] }
  0x7d   : > { %625 = vst [vmem:[%s8744_s7 + $0x6a0] sm:$0xff] %v624_v20  ;;  %v630_v23 = vld [vmem:[%s8739_s6 + $0xce8] sm:$0xff]  ;;  %627 = vst [vmem:[%s8744_s7 + $0x6a8] sm:$0xff] %v626_v21  ;;  %v632_v24 = vld [vmem:[%s8739_s6 + $0xd80] sm:$0xff] }
  0x7e   : > { %629 = vst [vmem:[%s8744_s7 + $0x6b0] sm:$0xff] %v628_v22  ;;  %631 = vst [vmem:[%s8744_s7 + $0x6b8] sm:$0xff] %v630_v23  ;;  %v634_v25 = vld [vmem:[%s8739_s6 + $0xd88] sm:$0xff]  ;;  %v636_v26 = vld [vmem:[%s8739_s6 + $0xd90] sm:$0xff] }
  0x7f   : > { %633 = vst [vmem:[%s8744_s7 + $0x6c0] sm:$0xff] %v632_v24  ;;  %635 = vst [vmem:[%s8744_s7 + $0x6c8] sm:$0xff] %v634_v25  ;;  %v638_v27 = vld [vmem:[%s8739_s6 + $0xd98] sm:$0xff]  ;;  %v640_v28 = vld [vmem:[%s8739_s6 + $0xda0] sm:$0xff] }
  0x80   : > { %637 = vst [vmem:[%s8744_s7 + $0x6d0] sm:$0xff] %v636_v26  ;;  %v642_v29 = vld [vmem:[%s8739_s6 + $0xda8] sm:$0xff]  ;;  %639 = vst [vmem:[%s8744_s7 + $0x6d8] sm:$0xff] %v638_v27  ;;  %v644_v30 = vld [vmem:[%s8739_s6 + $0xdb0] sm:$0xff] }
  0x81   : > { %641 = vst [vmem:[%s8744_s7 + $0x6e0] sm:$0xff] %v640_v28  ;;  %643 = vst [vmem:[%s8744_s7 + $0x6e8] sm:$0xff] %v642_v29  ;;  %v646_v31 = vld [vmem:[%s8739_s6 + $0xdb8] sm:$0xff]  ;;  %v648_v32 = vld [vmem:[%s8739_s6 + $0xdc0] sm:$0xff] }
  0x82   : > { %645 = vst [vmem:[%s8744_s7 + $0x6f0] sm:$0xff] %v644_v30  ;;  %647 = vst [vmem:[%s8744_s7 + $0x6f8] sm:$0xff] %v646_v31  ;;  %v650_v33 = vld [vmem:[%s8739_s6 + $0xdc8] sm:$0xff]  ;;  %v652_v34 = vld [vmem:[%s8739_s6 + $0xdd0] sm:$0xff] }
  0x83   : > { %649 = vst [vmem:[%s8744_s7 + $0x700] sm:$0xff] %v648_v32  ;;  %v654_v35 = vld [vmem:[%s8739_s6 + $0xdd8] sm:$0xff]  ;;  %651 = vst [vmem:[%s8744_s7 + $0x708] sm:$0xff] %v650_v33  ;;  %v656_v36 = vld [vmem:[%s8739_s6 + $0xde0] sm:$0xff] }
  0x84   : > { %653 = vst [vmem:[%s8744_s7 + $0x710] sm:$0xff] %v652_v34  ;;  %655 = vst [vmem:[%s8744_s7 + $0x718] sm:$0xff] %v654_v35  ;;  %v658_v37 = vld [vmem:[%s8739_s6 + $0xde8] sm:$0xff]  ;;  %v660_v38 = vld [vmem:[%s8739_s6 + $0xdf0] sm:$0xff] }
  0x85   : > { %657 = vst [vmem:[%s8744_s7 + $0x720] sm:$0xff] %v656_v36  ;;  %659 = vst [vmem:[%s8744_s7 + $0x728] sm:$0xff] %v658_v37  ;;  %v662_v39 = vld [vmem:[%s8739_s6 + $0xdf8] sm:$0xff]  ;;  %v664_v40 = vld [vmem:[%s8739_s6 + $0xe00] sm:$0xff] }
  0x86   : > { %661 = vst [vmem:[%s8744_s7 + $0x730] sm:$0xff] %v660_v38  ;;  %v666_v41 = vld [vmem:[%s8739_s6 + $0xe08] sm:$0xff]  ;;  %663 = vst [vmem:[%s8744_s7 + $0x738] sm:$0xff] %v662_v39  ;;  %v668_v42 = vld [vmem:[%s8739_s6 + $0xea0] sm:$0xff] }
  0x87   : > { %665 = vst [vmem:[%s8744_s7 + $0x740] sm:$0xff] %v664_v40  ;;  %667 = vst [vmem:[%s8744_s7 + $0x748] sm:$0xff] %v666_v41  ;;  %v670_v43 = vld [vmem:[%s8739_s6 + $0xea8] sm:$0xff]  ;;  %v672_v44 = vld [vmem:[%s8739_s6 + $0xeb0] sm:$0xff] }
  0x88   : > { %669 = vst [vmem:[%s8744_s7 + $0x750] sm:$0xff] %v668_v42  ;;  %671 = vst [vmem:[%s8744_s7 + $0x758] sm:$0xff] %v670_v43  ;;  %v674_v45 = vld [vmem:[%s8739_s6 + $0xeb8] sm:$0xff]  ;;  %v676_v46 = vld [vmem:[%s8739_s6 + $0xec0] sm:$0xff] }
  0x89   : > { %673 = vst [vmem:[%s8744_s7 + $0x760] sm:$0xff] %v672_v44  ;;  %v678_v47 = vld [vmem:[%s8739_s6 + $0xec8] sm:$0xff]  ;;  %675 = vst [vmem:[%s8744_s7 + $0x768] sm:$0xff] %v674_v45  ;;  %v680_v48 = vld [vmem:[%s8739_s6 + $0xed0] sm:$0xff] }
  0x8a   : > { %677 = vst [vmem:[%s8744_s7 + $0x770] sm:$0xff] %v676_v46  ;;  %679 = vst [vmem:[%s8744_s7 + $0x778] sm:$0xff] %v678_v47  ;;  %v682_v49 = vld [vmem:[%s8739_s6 + $0xed8] sm:$0xff]  ;;  %v684_v50 = vld [vmem:[%s8739_s6 + $0xee0] sm:$0xff] }
  0x8b   : > { %681 = vst [vmem:[%s8744_s7 + $0x780] sm:$0xff] %v680_v48  ;;  %683 = vst [vmem:[%s8744_s7 + $0x788] sm:$0xff] %v682_v49  ;;  %v686_v51 = vld [vmem:[%s8739_s6 + $0xee8] sm:$0xff]  ;;  %v688_v52 = vld [vmem:[%s8739_s6 + $0xef0] sm:$0xff] }
  0x8c   : > { %685 = vst [vmem:[%s8744_s7 + $0x790] sm:$0xff] %v684_v50  ;;  %v690_v53 = vld [vmem:[%s8739_s6 + $0xef8] sm:$0xff]  ;;  %687 = vst [vmem:[%s8744_s7 + $0x798] sm:$0xff] %v686_v51  ;;  %v692_v54 = vld [vmem:[%s8739_s6 + $0xf00] sm:$0xff] }
  0x8d   : > { %689 = vst [vmem:[%s8744_s7 + $0x7a0] sm:$0xff] %v688_v52  ;;  %691 = vst [vmem:[%s8744_s7 + $0x7a8] sm:$0xff] %v690_v53  ;;  %v694_v55 = vld [vmem:[%s8739_s6 + $0xf08] sm:$0xff]  ;;  %v696_v56 = vld [vmem:[%s8739_s6 + $0xf10] sm:$0xff] }
  0x8e   : > { %693 = vst [vmem:[%s8744_s7 + $0x7b0] sm:$0xff] %v692_v54  ;;  %695 = vst [vmem:[%s8744_s7 + $0x7b8] sm:$0xff] %v694_v55  ;;  %v698_v57 = vld [vmem:[%s8739_s6 + $0xf18] sm:$0xff]  ;;  %v700_v58 = vld [vmem:[%s8739_s6 + $0xf20] sm:$0xff] }
  0x8f   : > { %697 = vst [vmem:[%s8744_s7 + $0x7c0] sm:$0xff] %v696_v56  ;;  %v702_v59 = vld [vmem:[%s8739_s6 + $0xf28] sm:$0xff]  ;;  %699 = vst [vmem:[%s8744_s7 + $0x7c8] sm:$0xff] %v698_v57  ;;  %v704_v60 = vld [vmem:[%s8739_s6 + $0xfc0] sm:$0xff] }
  0x90   : > { %701 = vst [vmem:[%s8744_s7 + $0x7d0] sm:$0xff] %v700_v58  ;;  %703 = vst [vmem:[%s8744_s7 + $0x7d8] sm:$0xff] %v702_v59  ;;  %v706_v61 = vld [vmem:[%s8739_s6 + $0xfc8] sm:$0xff]  ;;  %v708_v62 = vld [vmem:[%s8739_s6 + $0xfd0] sm:$0xff] }
  0x91   : > { %705 = vst [vmem:[%s8744_s7 + $0x7e0] sm:$0xff] %v704_v60  ;;  %707 = vst [vmem:[%s8744_s7 + $0x7e8] sm:$0xff] %v706_v61  ;;  %v710_v63 = vld [vmem:[%s8739_s6 + $0xfd8] sm:$0xff]  ;;  %v712_v0 = vld [vmem:[%s8739_s6 + $0xfe0] sm:$0xff] }
  0x92   : > { %709 = vst [vmem:[%s8744_s7 + $0x7f0] sm:$0xff] %v708_v62  ;;  %v714_v1 = vld [vmem:[%s8739_s6 + $0xfe8] sm:$0xff]  ;;  %711 = vst [vmem:[%s8744_s7 + $0x7f8] sm:$0xff] %v710_v63  ;;  %v716_v2 = vld [vmem:[%s8739_s6 + $0xff0] sm:$0xff] }
  0x93   : > { %713 = vst [vmem:[%s8744_s7 + $0x800] sm:$0xff] %v712_v0  ;;  %715 = vst [vmem:[%s8744_s7 + $0x808] sm:$0xff] %v714_v1  ;;  %v718_v3 = vld [vmem:[%s8739_s6 + $0xff8] sm:$0xff]  ;;  %v720_v4 = vld [vmem:[%s8739_s6 + $0x1000] sm:$0xff] }
  0x94   : > { %717 = vst [vmem:[%s8744_s7 + $0x810] sm:$0xff] %v716_v2  ;;  %719 = vst [vmem:[%s8744_s7 + $0x818] sm:$0xff] %v718_v3  ;;  %v722_v5 = vld [vmem:[%s8739_s6 + $0x1008] sm:$0xff]  ;;  %v724_v6 = vld [vmem:[%s8739_s6 + $0x1010] sm:$0xff] }
  0x95   : > { %721 = vst [vmem:[%s8744_s7 + $0x820] sm:$0xff] %v720_v4  ;;  %v726_v7 = vld [vmem:[%s8739_s6 + $0x1018] sm:$0xff]  ;;  %723 = vst [vmem:[%s8744_s7 + $0x828] sm:$0xff] %v722_v5  ;;  %v728_v8 = vld [vmem:[%s8739_s6 + $0x1020] sm:$0xff] }
  0x96   : > { %725 = vst [vmem:[%s8744_s7 + $0x830] sm:$0xff] %v724_v6  ;;  %727 = vst [vmem:[%s8744_s7 + $0x838] sm:$0xff] %v726_v7  ;;  %v730_v9 = vld [vmem:[%s8739_s6 + $0x1028] sm:$0xff]  ;;  %v732_v10 = vld [vmem:[%s8739_s6 + $0x1030] sm:$0xff] }
  0x97   : > { %729 = vst [vmem:[%s8744_s7 + $0x840] sm:$0xff] %v728_v8  ;;  %731 = vst [vmem:[%s8744_s7 + $0x848] sm:$0xff] %v730_v9  ;;  %v734_v11 = vld [vmem:[%s8739_s6 + $0x1038] sm:$0xff]  ;;  %v736_v12 = vld [vmem:[%s8739_s6 + $0x1040] sm:$0xff] }
  0x98   : > { %733 = vst [vmem:[%s8744_s7 + $0x850] sm:$0xff] %v732_v10  ;;  %v738_v13 = vld [vmem:[%s8739_s6 + $0x1048] sm:$0xff]  ;;  %735 = vst [vmem:[%s8744_s7 + $0x858] sm:$0xff] %v734_v11  ;;  %v740_v14 = vld [vmem:[%s8739_s6 + $0x10e0] sm:$0xff] }
  0x99   : > { %737 = vst [vmem:[%s8744_s7 + $0x860] sm:$0xff] %v736_v12  ;;  %739 = vst [vmem:[%s8744_s7 + $0x868] sm:$0xff] %v738_v13  ;;  %v742_v15 = vld [vmem:[%s8739_s6 + $0x10e8] sm:$0xff]  ;;  %v744_v16 = vld [vmem:[%s8739_s6 + $0x10f0] sm:$0xff] }
  0x9a   : > { %741 = vst [vmem:[%s8744_s7 + $0x870] sm:$0xff] %v740_v14  ;;  %743 = vst [vmem:[%s8744_s7 + $0x878] sm:$0xff] %v742_v15  ;;  %v746_v17 = vld [vmem:[%s8739_s6 + $0x10f8] sm:$0xff]  ;;  %v748_v18 = vld [vmem:[%s8739_s6 + $0x1100] sm:$0xff] }
  0x9b   : > { %745 = vst [vmem:[%s8744_s7 + $0x880] sm:$0xff] %v744_v16  ;;  %v750_v19 = vld [vmem:[%s8739_s6 + $0x1108] sm:$0xff]  ;;  %747 = vst [vmem:[%s8744_s7 + $0x888] sm:$0xff] %v746_v17  ;;  %v752_v20 = vld [vmem:[%s8739_s6 + $0x1110] sm:$0xff] }
  0x9c   : > { %749 = vst [vmem:[%s8744_s7 + $0x890] sm:$0xff] %v748_v18  ;;  %751 = vst [vmem:[%s8744_s7 + $0x898] sm:$0xff] %v750_v19  ;;  %v754_v21 = vld [vmem:[%s8739_s6 + $0x1118] sm:$0xff]  ;;  %v756_v22 = vld [vmem:[%s8739_s6 + $0x1120] sm:$0xff] }
  0x9d   : > { %753 = vst [vmem:[%s8744_s7 + $0x8a0] sm:$0xff] %v752_v20  ;;  %755 = vst [vmem:[%s8744_s7 + $0x8a8] sm:$0xff] %v754_v21  ;;  %v758_v23 = vld [vmem:[%s8739_s6 + $0x1128] sm:$0xff]  ;;  %v760_v24 = vld [vmem:[%s8739_s6 + $0x1130] sm:$0xff] }
  0x9e   : > { %757 = vst [vmem:[%s8744_s7 + $0x8b0] sm:$0xff] %v756_v22  ;;  %v762_v25 = vld [vmem:[%s8739_s6 + $0x1138] sm:$0xff]  ;;  %759 = vst [vmem:[%s8744_s7 + $0x8b8] sm:$0xff] %v758_v23  ;;  %v764_v26 = vld [vmem:[%s8739_s6 + $0x1140] sm:$0xff] }
  0x9f   : > { %761 = vst [vmem:[%s8744_s7 + $0x8c0] sm:$0xff] %v760_v24  ;;  %763 = vst [vmem:[%s8744_s7 + $0x8c8] sm:$0xff] %v762_v25  ;;  %v766_v27 = vld [vmem:[%s8739_s6 + $0x1148] sm:$0xff]  ;;  %v768_v28 = vld [vmem:[%s8739_s6 + $0x1150] sm:$0xff] }
  0xa0   : > { %765 = vst [vmem:[%s8744_s7 + $0x8d0] sm:$0xff] %v764_v26  ;;  %767 = vst [vmem:[%s8744_s7 + $0x8d8] sm:$0xff] %v766_v27  ;;  %v770_v29 = vld [vmem:[%s8739_s6 + $0x1158] sm:$0xff]  ;;  %v772_v30 = vld [vmem:[%s8739_s6 + $0x1160] sm:$0xff] }
  0xa1   : > { %769 = vst [vmem:[%s8744_s7 + $0x8e0] sm:$0xff] %v768_v28  ;;  %v774_v31 = vld [vmem:[%s8739_s6 + $0x1168] sm:$0xff]  ;;  %771 = vst [vmem:[%s8744_s7 + $0x8e8] sm:$0xff] %v770_v29 }
  0xa2   : > { %773 = vst [vmem:[%s8744_s7 + $0x8f0] sm:$0xff] %v772_v30  ;;  %775 = vst [vmem:[%s8744_s7 + $0x8f8] sm:$0xff] %v774_v31 }
  0xa3 PF: > { %p6874_p5 = scmp.ge.s32.totalorder %s8668_s20, 1  ;;  %p797_p6 = scmp.lt.s32.totalorder %s8668_s20, 3 }
  0xa5   : > { %p798_p7 = pnand %p6874_p5, %p797_p6 }
  0xa6   : > { %s804_s8 = sand.u32 (!%p798_p7), 1, %s8660_s18   ;;  %s836_s9 = smul.u32 (!%p798_p7), 36, %s8719_s21 }
  0xa7   : > { %801 = sbr.rel (%p798_p7) target bundleno = 1334 (0x536), region = 59  ;;  %p6876_p10 = scmp.ne.s32.totalorder (!%p798_p7), %s8719_s21, 0 }
  0xa8   : > { %s7857_s10 = smul.u32 (!%p798_p7), 2304, %s804_s8  ;;  %p837_p8 = scmp.lt.s32.totalorder (!%p798_p7), %s836_s9, 71 }
  0xa9   : > { %s841_s11 = smul.u32 (!%p798_p7), 576, %s8719_s21 }
  0xaa   : > { %s9334_s23 = scalar_lea.vmem (!%p798_p7), [#allocation4], %s7857_s10 }
  0xab   : > { %p842_p9 = scmp.lt.s32.totalorder (!%p798_p7), %s841_s11, 1151 }
  0xae   : > { %s10279_s9 = smov (!%p837_p8, %s836_s9), 71  ;;  %s10281_s11 = smov (!%p842_p9, %s841_s11), 1151 }
  0xaf   : > { %s9327_s14 = scalar_lea.vmem %s10271_s2, %s10279_s9  ;;  %s6875_s15 = sshll.u32 %s10281_s11, 2  ;;  %vm852_vm0 = vcmask (!%p6876_p10), 523264   ;;  %v854_v32 = vld [vmem:[%s10269_s0] sm:$0xff] (!%p6876_p10)  ;;  %v8670_v33 = vmov (!%p6876_p10), 0.0  }
  0xb0   : > { %s9332_s20 = scalar_lea.vmem %s10272_s3, %s6875_s15  ;;  %851 = sbr.rel (%p6876_p10) target bundleno = 183 (0xb7), region = 67  ;;  %853 = vst.msk [vmem:[#allocation2] sm:$0xff] (!%p6876_p10), %vm852_vm0, %v8670_v33  ;;  %v855_v34 = vpack.c.bf16 (!%p6876_p10), %v854_v32, %v854_v32 }
  0xb2   : > { %856 = vst [vmem:[#allocation3] sm:$0xf] (!%p6876_p10), %v855_v34 }
  0xb7 PF: > { %v7891_v35 = vld [vmem:[%s9334_s23 + $0x4] ss:$144 sps:$4 sm:$0xff]   ;;  %v7893_v36 = vld [vmem:[%s9334_s23 + $0xc] ss:$144 sps:$4 sm:$0xff]   ;;  %v8671_v37 = vmov 0   ;;  %vm6769_vm1 = vcmask 523264  }
  0xb8   : > { %2965 = vmatprep.mubr.bf16.mxu0 %v8671_v37  ;;  %3006 = vmatprep.mubr.bf16.mxu1 %v8671_v37  ;;  %v7895_v38 = vld [vmem:[%s9334_s23] ss:$144 sps:$4 sm:$0xff]   ;;  %v7896_v39 = vld [vmem:[%s9334_s23 + $0x8] ss:$144 sps:$4 sm:$0xff]   ;;  %v7897_v40 = vld [vmem:[%s9334_s23 + $0x124] ss:$144 sps:$4 sm:$0xff]  }
  0xb9   : > { %2933 = vmatprep.subr.bf16.mxu0 %v7891_v35  ;;  %2974 = vmatprep.subr.bf16.mxu1 %v7893_v36  ;;  %v7899_v41 = vld [vmem:[%s9334_s23 + $0x12c] ss:$144 sps:$4 sm:$0xff]   ;;  %v7901_v42 = vld [vmem:[%s9334_s23 + $0x120] ss:$144 sps:$4 sm:$0xff]   ;;  %v7902_v43 = vld [vmem:[%s9334_s23 + $0x128] ss:$144 sps:$4 sm:$0xff]  }
  0xba   : > { %2934 = vmatpush1.bf16.msra.mxu0 %v7895_v38  ;;  %2975 = vmatpush1.bf16.msra.mxu1 %v7896_v39  ;;  %v7903_v44 = vld [vmem:[%s9334_s23 + $0x244] ss:$144 sps:$4 sm:$0xff]   ;;  %v7905_v45 = vld [vmem:[%s9334_s23 + $0x24c] ss:$144 sps:$4 sm:$0xff]   ;;  %v7907_v46 = vld [vmem:[%s9334_s23 + $0x240] ss:$144 sps:$4 sm:$0xff]  }
  0xbb   : > { %2935 = vmatprep.subr.bf16.mxu0 %v7897_v40  ;;  %2976 = vmatprep.subr.bf16.mxu1 %v7899_v41  ;;  %v7908_v47 = vld [vmem:[%s9334_s23 + $0x248] ss:$144 sps:$4 sm:$0xff]   ;;  %v7909_v48 = vld [vmem:[%s9334_s23 + $0x364] ss:$144 sps:$4 sm:$0xff]   ;;  %v7911_v49 = vld [vmem:[%s9334_s23 + $0x36c] ss:$144 sps:$4 sm:$0xff]  }
  0xbc   : > { %v7913_v50 = vld [vmem:[%s9334_s23 + $0x360] ss:$144 sps:$4 sm:$0xff]   ;;  %v7914_v51 = vld [vmem:[%s9334_s23 + $0x368] ss:$144 sps:$4 sm:$0xff]   ;;  %v7915_v52 = vld [vmem:[%s9334_s23 + $0x484] ss:$144 sps:$4 sm:$0xff]  }
  0xbd   : > { %v7917_v53 = vld [vmem:[%s9334_s23 + $0x48c] ss:$144 sps:$4 sm:$0xff]   ;;  %v7919_v54 = vld [vmem:[%s9334_s23 + $0x480] ss:$144 sps:$4 sm:$0xff]   ;;  %v7920_v55 = vld [vmem:[%s9334_s23 + $0x488] ss:$144 sps:$4 sm:$0xff]  }
  0xbe   : > { %2936 = vmatpush1.bf16.msra.mxu0 %v7901_v42  ;;  %2977 = vmatpush1.bf16.msra.mxu1 %v7902_v43  ;;  %v7921_v56 = vld [vmem:[%s9334_s23 + $0x5a4] ss:$144 sps:$4 sm:$0xff]   ;;  %v7923_v57 = vld [vmem:[%s9334_s23 + $0x5ac] ss:$144 sps:$4 sm:$0xff]   ;;  %v7925_v58 = vld [vmem:[%s9334_s23 + $0x5a0] ss:$144 sps:$4 sm:$0xff]  }
  0xbf   : > { %2937 = vmatprep.subr.bf16.mxu0 %v7903_v44  ;;  %2978 = vmatprep.subr.bf16.mxu1 %v7905_v45  ;;  %v7926_v59 = vld [vmem:[%s9334_s23 + $0x5a8] ss:$144 sps:$4 sm:$0xff]   ;;  %v7927_v60 = vld [vmem:[%s9334_s23 + $0x6c4] ss:$144 sps:$4 sm:$0xff]   ;;  %v7929_v61 = vld [vmem:[%s9334_s23 + $0x6cc] ss:$144 sps:$4 sm:$0xff]  }
  0xc0   : > { %v7931_v62 = vld [vmem:[%s9334_s23 + $0x6c0] ss:$144 sps:$4 sm:$0xff]   ;;  %v7932_v63 = vld [vmem:[%s9334_s23 + $0x6c8] ss:$144 sps:$4 sm:$0xff]   ;;  %v7933_v0 = vld [vmem:[%s9334_s23 + $0x7e4] ss:$144 sps:$4 sm:$0xff]  }
  0xc1   : > { %v7935_v1 = vld [vmem:[%s9334_s23 + $0x7ec] ss:$144 sps:$4 sm:$0xff]   ;;  %v7937_v2 = vld [vmem:[%s9334_s23 + $0x7e0] ss:$144 sps:$4 sm:$0xff]   ;;  %v7938_v3 = vld [vmem:[%s9334_s23 + $0x7e8] ss:$144 sps:$4 sm:$0xff]  }
  0xc2   : > { %2938 = vmatpush1.bf16.msra.mxu0 %v7907_v46  ;;  %2979 = vmatpush1.bf16.msra.mxu1 %v7908_v47  ;;  %v7941_v4 = vld [vmem:[%s9334_s23 + $0x14] ss:$144 sps:$4 sm:$0xff]   ;;  %v7944_v5 = vld [vmem:[%s9334_s23 + $0x1c] ss:$144 sps:$4 sm:$0xff]   ;;  %v7939_v7 = vld [vmem:[%s9334_s23 + $0x10] ss:$144 sps:$4 sm:$0xff]  }
  0xc3   : > { %2939 = vmatprep.subr.bf16.mxu0 %v7909_v48  ;;  %2980 = vmatprep.subr.bf16.mxu1 %v7911_v49  ;;  %v9376_v6 = vld [vmem:[#allocation3] sm:$0xf]  ;;  %v7942_v8 = vld [vmem:[%s9334_s23 + $0x18] ss:$144 sps:$4 sm:$0xff]   ;;  %v7947_v9 = vld [vmem:[%s9334_s23 + $0x134] ss:$144 sps:$4 sm:$0xff]  }
  0xc4   : > { %v7950_v10 = vld [vmem:[%s9334_s23 + $0x13c] ss:$144 sps:$4 sm:$0xff]   ;;  %v7945_v11 = vld [vmem:[%s9334_s23 + $0x130] ss:$144 sps:$4 sm:$0xff]   ;;  %v7948_v12 = vld [vmem:[%s9334_s23 + $0x138] ss:$144 sps:$4 sm:$0xff]  }
  0xc5   : > { %v7953_v13 = vld [vmem:[%s9334_s23 + $0x254] ss:$144 sps:$4 sm:$0xff]   ;;  %v7956_v14 = vld [vmem:[%s9334_s23 + $0x25c] ss:$144 sps:$4 sm:$0xff]   ;;  %v7951_v15 = vld [vmem:[%s9334_s23 + $0x250] ss:$144 sps:$4 sm:$0xff]  }
  0xc6   : > { %2940 = vmatpush1.bf16.msra.mxu0 %v7913_v50  ;;  %2981 = vmatpush1.bf16.msra.mxu1 %v7914_v51  ;;  %v7954_v16 = vld [vmem:[%s9334_s23 + $0x258] ss:$144 sps:$4 sm:$0xff]   ;;  %v7959_v17 = vld [vmem:[%s9334_s23 + $0x374] ss:$144 sps:$4 sm:$0xff]   ;;  %v7962_v18 = vld [vmem:[%s9334_s23 + $0x37c] ss:$144 sps:$4 sm:$0xff]  }
  0xc7   : > { %2941 = vmatprep.subr.bf16.mxu0 %v7915_v52  ;;  %2982 = vmatprep.subr.bf16.mxu1 %v7917_v53  ;;  %v7957_v19 = vld [vmem:[%s9334_s23 + $0x370] ss:$144 sps:$4 sm:$0xff]   ;;  %v7960_v20 = vld [vmem:[%s9334_s23 + $0x378] ss:$144 sps:$4 sm:$0xff]   ;;  %v7965_v21 = vld [vmem:[%s9334_s23 + $0x494] ss:$144 sps:$4 sm:$0xff]  }
  0xc8   : > { %v7968_v22 = vld [vmem:[%s9334_s23 + $0x49c] ss:$144 sps:$4 sm:$0xff]   ;;  %v7963_v23 = vld [vmem:[%s9334_s23 + $0x490] ss:$144 sps:$4 sm:$0xff]   ;;  %v7966_v24 = vld [vmem:[%s9334_s23 + $0x498] ss:$144 sps:$4 sm:$0xff]  }
  0xc9   : > { %v7971_v25 = vld [vmem:[%s9334_s23 + $0x5b4] ss:$144 sps:$4 sm:$0xff]   ;;  %v7974_v26 = vld [vmem:[%s9334_s23 + $0x5bc] ss:$144 sps:$4 sm:$0xff]   ;;  %v7969_v27 = vld [vmem:[%s9334_s23 + $0x5b0] ss:$144 sps:$4 sm:$0xff]  }
  0xca   : > { %2942 = vmatpush1.bf16.msra.mxu0 %v7919_v54  ;;  %2983 = vmatpush1.bf16.msra.mxu1 %v7920_v55  ;;  %v7972_v28 = vld [vmem:[%s9334_s23 + $0x5b8] ss:$144 sps:$4 sm:$0xff]   ;;  %v7977_v29 = vld [vmem:[%s9334_s23 + $0x6d4] ss:$144 sps:$4 sm:$0xff]   ;;  %v7980_v30 = vld [vmem:[%s9334_s23 + $0x6dc] ss:$144 sps:$4 sm:$0xff]  }
  0xcb   : > { %2943 = vmatprep.subr.bf16.mxu0 %v7921_v56  ;;  %2984 = vmatprep.subr.bf16.mxu1 %v7923_v57  ;;  %v7975_v31 = vld [vmem:[%s9334_s23 + $0x6d0] ss:$144 sps:$4 sm:$0xff]   ;;  %v7978_v32 = vld [vmem:[%s9334_s23 + $0x6d8] ss:$144 sps:$4 sm:$0xff]   ;;  %v7983_v33 = vld [vmem:[%s9334_s23 + $0x7f4] ss:$144 sps:$4 sm:$0xff]  }
  0xcc   : > { %v7986_v34 = vld [vmem:[%s9334_s23 + $0x7fc] ss:$144 sps:$4 sm:$0xff]   ;;  %v7981_v35 = vld [vmem:[%s9334_s23 + $0x7f0] ss:$144 sps:$4 sm:$0xff]   ;;  %v7984_v36 = vld [vmem:[%s9334_s23 + $0x7f8] ss:$144 sps:$4 sm:$0xff]  }
  0xcd   : > { %v7989_v38 = vld [vmem:[%s9334_s23 + $0x24] ss:$144 sps:$4 sm:$0xff]   ;;  %v7992_v39 = vld [vmem:[%s9334_s23 + $0x2c] ss:$144 sps:$4 sm:$0xff]   ;;  %v7987_v40 = vld [vmem:[%s9334_s23 + $0x20] ss:$144 sps:$4 sm:$0xff]  }
  0xce   : > { %2944 = vmatpush1.bf16.msra.mxu0 %v7925_v58  ;;  %2985 = vmatpush1.bf16.msra.mxu1 %v7926_v59  ;;  %v7990_v41 = vld [vmem:[%s9334_s23 + $0x28] ss:$144 sps:$4 sm:$0xff]   ;;  %v7995_v42 = vld [vmem:[%s9334_s23 + $0x144] ss:$144 sps:$4 sm:$0xff]   ;;  %v7998_v43 = vld [vmem:[%s9334_s23 + $0x14c] ss:$144 sps:$4 sm:$0xff]  }
  0xcf   : > { %2945 = vmatprep.subr.bf16.mxu0 %v7927_v60  ;;  %2986 = vmatprep.subr.bf16.mxu1 %v7929_v61  ;;  %v7993_v44 = vld [vmem:[%s9334_s23 + $0x140] ss:$144 sps:$4 sm:$0xff]   ;;  %v7996_v45 = vld [vmem:[%s9334_s23 + $0x148] ss:$144 sps:$4 sm:$0xff]   ;;  %v8001_v46 = vld [vmem:[%s9334_s23 + $0x264] ss:$144 sps:$4 sm:$0xff]  }
  0xd0   : > { %v8004_v47 = vld [vmem:[%s9334_s23 + $0x26c] ss:$144 sps:$4 sm:$0xff]   ;;  %v7999_v48 = vld [vmem:[%s9334_s23 + $0x260] ss:$144 sps:$4 sm:$0xff]   ;;  %v8002_v49 = vld [vmem:[%s9334_s23 + $0x268] ss:$144 sps:$4 sm:$0xff]  }
  0xd1   : > { %v8007_v50 = vld [vmem:[%s9334_s23 + $0x384] ss:$144 sps:$4 sm:$0xff]   ;;  %v8010_v51 = vld [vmem:[%s9334_s23 + $0x38c] ss:$144 sps:$4 sm:$0xff]   ;;  %v8005_v52 = vld [vmem:[%s9334_s23 + $0x380] ss:$144 sps:$4 sm:$0xff]  }
  0xd2   : > { %2946 = vmatpush1.bf16.msra.mxu0 %v7931_v62  ;;  %2987 = vmatpush1.bf16.msra.mxu1 %v7932_v63  ;;  %v8008_v53 = vld [vmem:[%s9334_s23 + $0x388] ss:$144 sps:$4 sm:$0xff]   ;;  %v8013_v54 = vld [vmem:[%s9334_s23 + $0x4a4] ss:$144 sps:$4 sm:$0xff]   ;;  %v8016_v55 = vld [vmem:[%s9334_s23 + $0x4ac] ss:$144 sps:$4 sm:$0xff]  }
  0xd3   : > { %2947 = vmatprep.subr.bf16.mxu0 %v7933_v0  ;;  %2988 = vmatprep.subr.bf16.mxu1 %v7935_v1  ;;  %v8011_v56 = vld [vmem:[%s9334_s23 + $0x4a0] ss:$144 sps:$4 sm:$0xff]   ;;  %v8014_v57 = vld [vmem:[%s9334_s23 + $0x4a8] ss:$144 sps:$4 sm:$0xff]   ;;  %v8019_v58 = vld [vmem:[%s9334_s23 + $0x5c4] ss:$144 sps:$4 sm:$0xff]  }
  0xd4   : > { %v8022_v59 = vld [vmem:[%s9334_s23 + $0x5cc] ss:$144 sps:$4 sm:$0xff]   ;;  %v8017_v60 = vld [vmem:[%s9334_s23 + $0x5c0] ss:$144 sps:$4 sm:$0xff]   ;;  %v8020_v61 = vld [vmem:[%s9334_s23 + $0x5c8] ss:$144 sps:$4 sm:$0xff]  }
  0xd5   : > { %v8025_v62 = vld [vmem:[%s9334_s23 + $0x6e4] ss:$144 sps:$4 sm:$0xff]   ;;  %v8028_v63 = vld [vmem:[%s9334_s23 + $0x6ec] ss:$144 sps:$4 sm:$0xff]   ;;  %v8023_v0 = vld [vmem:[%s9334_s23 + $0x6e0] ss:$144 sps:$4 sm:$0xff]  }
  0xd6   : > { %2948 = vmatpush1.bf16.msra.mxu0 %v7937_v2  ;;  %2989 = vmatpush1.bf16.msra.mxu1 %v7938_v3  ;;  %v8026_v1 = vld [vmem:[%s9334_s23 + $0x6e8] ss:$144 sps:$4 sm:$0xff]   ;;  %v8031_v2 = vld [vmem:[%s9334_s23 + $0x804] ss:$144 sps:$4 sm:$0xff]   ;;  %v8034_v3 = vld [vmem:[%s9334_s23 + $0x80c] ss:$144 sps:$4 sm:$0xff]  }
  0xd7   : > { %3015 = vmatprep.subr.bf16.mxu0 %v7941_v4  ;;  %3056 = vmatprep.subr.bf16.mxu1 %v7944_v5  ;;  %v8029_v4 = vld [vmem:[%s9334_s23 + $0x800] ss:$144 sps:$4 sm:$0xff]   ;;  %v8032_v5 = vld [vmem:[%s9334_s23 + $0x808] ss:$144 sps:$4 sm:$0xff]   ;;  %p7453_p11 = scmp.ne.s32.totalorder %s8719_s21, 1 }
  0xd9   : > { %2966 = vmatmul.mubr.bf16.vlgmr.msra.gmra.mrb[0].mxu0 %v9376_v6  ;;  %3007 = vmatmul.mubr.bf16.vlgmr.msra.gmra.mrb[0].mxu1 %v9376_v6 }
  0xda   : > { %3016 = vmatpush1.bf16.msra.mxu0 %v7939_v7  ;;  %3057 = vmatpush1.bf16.msra.mxu1 %v7942_v8  ;;  %v8037_v7 = vld [vmem:[%s9334_s23 + $0x34] ss:$144 sps:$4 sm:$0xff]   ;;  %v8040_v8 = vld [vmem:[%s9334_s23 + $0x3c] ss:$144 sps:$4 sm:$0xff]  }
  0xdb   : > { %3017 = vmatprep.subr.bf16.mxu0 %v7947_v9  ;;  %3058 = vmatprep.subr.bf16.mxu1 %v7950_v10  ;;  %v8035_v9 = vld [vmem:[%s9334_s23 + $0x30] ss:$144 sps:$4 sm:$0xff]   ;;  %v8038_v10 = vld [vmem:[%s9334_s23 + $0x38] ss:$144 sps:$4 sm:$0xff]  }
  0xdc   : > { %3047 = vmatprep.mubr.bf16.mxu0 %v8671_v37  ;;  %3088 = vmatprep.mubr.bf16.mxu1 %v8671_v37 }
  0xde   : > { %3018 = vmatpush1.bf16.msra.mxu0 %v7945_v11  ;;  %3059 = vmatpush1.bf16.msra.mxu1 %v7948_v12  ;;  %v8043_v11 = vld [vmem:[%s9334_s23 + $0x154] ss:$144 sps:$4 sm:$0xff]   ;;  %v8046_v12 = vld [vmem:[%s9334_s23 + $0x15c] ss:$144 sps:$4 sm:$0xff]  }
  0xdf   : > { %3019 = vmatprep.subr.bf16.mxu0 %v7953_v13  ;;  %3060 = vmatprep.subr.bf16.mxu1 %v7956_v14  ;;  %v8041_v13 = vld [vmem:[%s9334_s23 + $0x150] ss:$144 sps:$4 sm:$0xff]   ;;  %v8044_v14 = vld [vmem:[%s9334_s23 + $0x158] ss:$144 sps:$4 sm:$0xff]  }
  0xe2   : > { %3020 = vmatpush1.bf16.msra.mxu0 %v7951_v15  ;;  %3061 = vmatpush1.bf16.msra.mxu1 %v7954_v16  ;;  %v8049_v15 = vld [vmem:[%s9334_s23 + $0x274] ss:$144 sps:$4 sm:$0xff]   ;;  %v8052_v16 = vld [vmem:[%s9334_s23 + $0x27c] ss:$144 sps:$4 sm:$0xff]  }
  0xe3   : > { %3021 = vmatprep.subr.bf16.mxu0 %v7959_v17  ;;  %3062 = vmatprep.subr.bf16.mxu1 %v7962_v18  ;;  %v8047_v17 = vld [vmem:[%s9334_s23 + $0x270] ss:$144 sps:$4 sm:$0xff]   ;;  %v8050_v18 = vld [vmem:[%s9334_s23 + $0x278] ss:$144 sps:$4 sm:$0xff]  }
  0xe6   : > { %3022 = vmatpush1.bf16.msra.mxu0 %v7957_v19  ;;  %3063 = vmatpush1.bf16.msra.mxu1 %v7960_v20  ;;  %v8055_v19 = vld [vmem:[%s9334_s23 + $0x394] ss:$144 sps:$4 sm:$0xff]   ;;  %v8058_v20 = vld [vmem:[%s9334_s23 + $0x39c] ss:$144 sps:$4 sm:$0xff]  }
  0xe7   : > { %3023 = vmatprep.subr.bf16.mxu0 %v7965_v21  ;;  %3064 = vmatprep.subr.bf16.mxu1 %v7968_v22  ;;  %v8053_v21 = vld [vmem:[%s9334_s23 + $0x390] ss:$144 sps:$4 sm:$0xff]   ;;  %v8056_v22 = vld [vmem:[%s9334_s23 + $0x398] ss:$144 sps:$4 sm:$0xff]  }
  0xea   : > { %3024 = vmatpush1.bf16.msra.mxu0 %v7963_v23  ;;  %3065 = vmatpush1.bf16.msra.mxu1 %v7966_v24  ;;  %v8061_v23 = vld [vmem:[%s9334_s23 + $0x4b4] ss:$144 sps:$4 sm:$0xff]   ;;  %v8064_v24 = vld [vmem:[%s9334_s23 + $0x4bc] ss:$144 sps:$4 sm:$0xff]  }
  0xeb   : > { %3025 = vmatprep.subr.bf16.mxu0 %v7971_v25  ;;  %3066 = vmatprep.subr.bf16.mxu1 %v7974_v26  ;;  %v8059_v25 = vld [vmem:[%s9334_s23 + $0x4b0] ss:$144 sps:$4 sm:$0xff]   ;;  %v8062_v26 = vld [vmem:[%s9334_s23 + $0x4b8] ss:$144 sps:$4 sm:$0xff]  }
  0xee   : > { %3026 = vmatpush1.bf16.msra.mxu0 %v7969_v27  ;;  %3067 = vmatpush1.bf16.msra.mxu1 %v7972_v28  ;;  %v8067_v27 = vld [vmem:[%s9334_s23 + $0x5d4] ss:$144 sps:$4 sm:$0xff]   ;;  %v8070_v28 = vld [vmem:[%s9334_s23 + $0x5dc] ss:$144 sps:$4 sm:$0xff]  }
  0xef   : > { %3027 = vmatprep.subr.bf16.mxu0 %v7977_v29  ;;  %3068 = vmatprep.subr.bf16.mxu1 %v7980_v30  ;;  %v8065_v29 = vld [vmem:[%s9334_s23 + $0x5d0] ss:$144 sps:$4 sm:$0xff]   ;;  %v8068_v30 = vld [vmem:[%s9334_s23 + $0x5d8] ss:$144 sps:$4 sm:$0xff]  }
  0xf2   : > { %3028 = vmatpush1.bf16.msra.mxu0 %v7975_v31  ;;  %3069 = vmatpush1.bf16.msra.mxu1 %v7978_v32  ;;  %v8073_v31 = vld [vmem:[%s9334_s23 + $0x6f4] ss:$144 sps:$4 sm:$0xff]   ;;  %v8076_v32 = vld [vmem:[%s9334_s23 + $0x6fc] ss:$144 sps:$4 sm:$0xff]  }
  0xf3   : > { %3029 = vmatprep.subr.bf16.mxu0 %v7983_v33  ;;  %3070 = vmatprep.subr.bf16.mxu1 %v7986_v34  ;;  %v8071_v33 = vld [vmem:[%s9334_s23 + $0x6f0] ss:$144 sps:$4 sm:$0xff]   ;;  %v8074_v34 = vld [vmem:[%s9334_s23 + $0x6f8] ss:$144 sps:$4 sm:$0xff]  }
  0xf6   : > { %3030 = vmatpush1.bf16.msra.mxu0 %v7981_v35  ;;  %3071 = vmatpush1.bf16.msra.mxu1 %v7984_v36  ;;  %v8079_v35 = vld [vmem:[%s9334_s23 + $0x814] ss:$144 sps:$4 sm:$0xff]   ;;  %v8082_v36 = vld [vmem:[%s9334_s23 + $0x81c] ss:$144 sps:$4 sm:$0xff]  }
  0xf7   : > { %3097 = vmatprep.subr.bf16.mxu0 %v7989_v38  ;;  %3138 = vmatprep.subr.bf16.mxu1 %v7992_v39  ;;  %v8077_v38 = vld [vmem:[%s9334_s23 + $0x810] ss:$144 sps:$4 sm:$0xff]   ;;  %v8080_v39 = vld [vmem:[%s9334_s23 + $0x818] ss:$144 sps:$4 sm:$0xff]  }
  0xf9   : > { %3048 = vmatmul.mubr.bf16.vlgmr.msra.gmra.mrb[4].mxu0 %v9376_v6  ;;  %3089 = vmatmul.mubr.bf16.vlgmr.msra.gmra.mrb[4].mxu1 %v9376_v6 }
  0xfa   : > { %3098 = vmatpush1.bf16.msra.mxu0 %v7987_v40  ;;  %3139 = vmatpush1.bf16.msra.mxu1 %v7990_v41  ;;  %v8085_v40 = vld [vmem:[%s9334_s23 + $0x44] ss:$144 sps:$4 sm:$0xff]   ;;  %v8088_v41 = vld [vmem:[%s9334_s23 + $0x4c] ss:$144 sps:$4 sm:$0xff]  }
  0xfb   : > { %3099 = vmatprep.subr.bf16.mxu0 %v7995_v42  ;;  %3140 = vmatprep.subr.bf16.mxu1 %v7998_v43  ;;  %v8083_v42 = vld [vmem:[%s9334_s23 + $0x40] ss:$144 sps:$4 sm:$0xff]   ;;  %v8086_v43 = vld [vmem:[%s9334_s23 + $0x48] ss:$144 sps:$4 sm:$0xff]  }
  0xfc   : > { %3129 = vmatprep.mubr.bf16.mxu0 %v8671_v37  ;;  %3170 = vmatprep.mubr.bf16.mxu1 %v8671_v37 }
  0xfe   : > { %3100 = vmatpush1.bf16.msra.mxu0 %v7993_v44  ;;  %3141 = vmatpush1.bf16.msra.mxu1 %v7996_v45  ;;  %v8091_v44 = vld [vmem:[%s9334_s23 + $0x164] ss:$144 sps:$4 sm:$0xff]   ;;  %v8094_v45 = vld [vmem:[%s9334_s23 + $0x16c] ss:$144 sps:$4 sm:$0xff]  }
  0xff   : > { %3101 = vmatprep.subr.bf16.mxu0 %v8001_v46  ;;  %3142 = vmatprep.subr.bf16.mxu1 %v8004_v47  ;;  %v8089_v46 = vld [vmem:[%s9334_s23 + $0x160] ss:$144 sps:$4 sm:$0xff]   ;;  %v8092_v47 = vld [vmem:[%s9334_s23 + $0x168] ss:$144 sps:$4 sm:$0xff]  }
 0x102   : > { %3102 = vmatpush1.bf16.msra.mxu0 %v7999_v48  ;;  %3143 = vmatpush1.bf16.msra.mxu1 %v8002_v49  ;;  %v8097_v48 = vld [vmem:[%s9334_s23 + $0x284] ss:$144 sps:$4 sm:$0xff]   ;;  %v8100_v49 = vld [vmem:[%s9334_s23 + $0x28c] ss:$144 sps:$4 sm:$0xff]  }
 0x103   : > { %3103 = vmatprep.subr.bf16.mxu0 %v8007_v50  ;;  %3144 = vmatprep.subr.bf16.mxu1 %v8010_v51  ;;  %v8095_v50 = vld [vmem:[%s9334_s23 + $0x280] ss:$144 sps:$4 sm:$0xff]   ;;  %v8098_v51 = vld [vmem:[%s9334_s23 + $0x288] ss:$144 sps:$4 sm:$0xff]  }
 0x106   : > { %3104 = vmatpush1.bf16.msra.mxu0 %v8005_v52  ;;  %3145 = vmatpush1.bf16.msra.mxu1 %v8008_v53  ;;  %v8103_v52 = vld [vmem:[%s9334_s23 + $0x3a4] ss:$144 sps:$4 sm:$0xff]   ;;  %v8106_v53 = vld [vmem:[%s9334_s23 + $0x3ac] ss:$144 sps:$4 sm:$0xff]  }
 0x107   : > { %3105 = vmatprep.subr.bf16.mxu0 %v8013_v54  ;;  %3146 = vmatprep.subr.bf16.mxu1 %v8016_v55  ;;  %v8101_v54 = vld [vmem:[%s9334_s23 + $0x3a0] ss:$144 sps:$4 sm:$0xff]   ;;  %v8104_v55 = vld [vmem:[%s9334_s23 + $0x3a8] ss:$144 sps:$4 sm:$0xff]  }
 0x10a   : > { %3106 = vmatpush1.bf16.msra.mxu0 %v8011_v56  ;;  %3147 = vmatpush1.bf16.msra.mxu1 %v8014_v57  ;;  %v8109_v56 = vld [vmem:[%s9334_s23 + $0x4c4] ss:$144 sps:$4 sm:$0xff]   ;;  %v8112_v57 = vld [vmem:[%s9334_s23 + $0x4cc] ss:$144 sps:$4 sm:$0xff]  }
 0x10b   : > { %3107 = vmatprep.subr.bf16.mxu0 %v8019_v58  ;;  %3148 = vmatprep.subr.bf16.mxu1 %v8022_v59  ;;  %v8107_v58 = vld [vmem:[%s9334_s23 + $0x4c0] ss:$144 sps:$4 sm:$0xff]   ;;  %v8110_v59 = vld [vmem:[%s9334_s23 + $0x4c8] ss:$144 sps:$4 sm:$0xff]  }
 0x10e   : > { %3108 = vmatpush1.bf16.msra.mxu0 %v8017_v60  ;;  %3149 = vmatpush1.bf16.msra.mxu1 %v8020_v61  ;;  %v8115_v60 = vld [vmem:[%s9334_s23 + $0x5e4] ss:$144 sps:$4 sm:$0xff]   ;;  %v8118_v61 = vld [vmem:[%s9334_s23 + $0x5ec] ss:$144 sps:$4 sm:$0xff]  }
 0x10f   : > { %3109 = vmatprep.subr.bf16.mxu0 %v8025_v62  ;;  %3150 = vmatprep.subr.bf16.mxu1 %v8028_v63  ;;  %v8113_v62 = vld [vmem:[%s9334_s23 + $0x5e0] ss:$144 sps:$4 sm:$0xff]   ;;  %v8116_v63 = vld [vmem:[%s9334_s23 + $0x5e8] ss:$144 sps:$4 sm:$0xff]  }
 0x112   : > { %3110 = vmatpush1.bf16.msra.mxu0 %v8023_v0  ;;  %3151 = vmatpush1.bf16.msra.mxu1 %v8026_v1  ;;  %v8121_v0 = vld [vmem:[%s9334_s23 + $0x704] ss:$144 sps:$4 sm:$0xff]   ;;  %v8124_v1 = vld [vmem:[%s9334_s23 + $0x70c] ss:$144 sps:$4 sm:$0xff]  }
 0x113   : > { %3111 = vmatprep.subr.bf16.mxu0 %v8031_v2  ;;  %3152 = vmatprep.subr.bf16.mxu1 %v8034_v3  ;;  %v8119_v2 = vld [vmem:[%s9334_s23 + $0x700] ss:$144 sps:$4 sm:$0xff]   ;;  %v8122_v3 = vld [vmem:[%s9334_s23 + $0x708] ss:$144 sps:$4 sm:$0xff]  }
 0x116   : > { %3112 = vmatpush1.bf16.msra.mxu0 %v8029_v4  ;;  %3153 = vmatpush1.bf16.msra.mxu1 %v8032_v5  ;;  %v8127_v4 = vld [vmem:[%s9334_s23 + $0x824] ss:$144 sps:$4 sm:$0xff]   ;;  %v8130_v5 = vld [vmem:[%s9334_s23 + $0x82c] ss:$144 sps:$4 sm:$0xff]  }
 0x117   : > { %3179 = vmatprep.subr.bf16.mxu0 %v8037_v7  ;;  %3220 = vmatprep.subr.bf16.mxu1 %v8040_v8  ;;  %v8125_v7 = vld [vmem:[%s9334_s23 + $0x820] ss:$144 sps:$4 sm:$0xff]   ;;  %v8128_v8 = vld [vmem:[%s9334_s23 + $0x828] ss:$144 sps:$4 sm:$0xff]  }
 0x119   : > { %3130 = vmatmul.mubr.bf16.vlgmr.msra.gmra.mrb[8].mxu0 %v9376_v6  ;;  %3171 = vmatmul.mubr.bf16.vlgmr.msra.gmra.mrb[8].mxu1 %v9376_v6 }
 0x11a   : > { %3180 = vmatpush1.bf16.msra.mxu0 %v8035_v9  ;;  %3221 = vmatpush1.bf16.msra.mxu1 %v8038_v10  ;;  %v8133_v9 = vld [vmem:[%s9334_s23 + $0x54] ss:$144 sps:$4 sm:$0xff]   ;;  %v8136_v10 = vld [vmem:[%s9334_s23 + $0x5c] ss:$144 sps:$4 sm:$0xff]  }
 0x11b   : > { %3181 = vmatprep.subr.bf16.mxu0 %v8043_v11  ;;  %3222 = vmatprep.subr.bf16.mxu1 %v8046_v12  ;;  %v8131_v11 = vld [vmem:[%s9334_s23 + $0x50] ss:$144 sps:$4 sm:$0xff]   ;;  %v8134_v12 = vld [vmem:[%s9334_s23 + $0x58] ss:$144 sps:$4 sm:$0xff]  }
 0x11c   : > { %3211 = vmatprep.mubr.bf16.mxu0 %v8671_v37  ;;  %3252 = vmatprep.mubr.bf16.mxu1 %v8671_v37 }
 0x11e   : > { %3182 = vmatpush1.bf16.msra.mxu0 %v8041_v13  ;;  %3223 = vmatpush1.bf16.msra.mxu1 %v8044_v14  ;;  %v8139_v13 = vld [vmem:[%s9334_s23 + $0x174] ss:$144 sps:$4 sm:$0xff]   ;;  %v8142_v14 = vld [vmem:[%s9334_s23 + $0x17c] ss:$144 sps:$4 sm:$0xff]  }
 0x11f   : > { %3183 = vmatprep.subr.bf16.mxu0 %v8049_v15  ;;  %3224 = vmatprep.subr.bf16.mxu1 %v8052_v16  ;;  %v8137_v15 = vld [vmem:[%s9334_s23 + $0x170] ss:$144 sps:$4 sm:$0xff]   ;;  %v8140_v16 = vld [vmem:[%s9334_s23 + $0x178] ss:$144 sps:$4 sm:$0xff]  }
 0x122   : > { %3184 = vmatpush1.bf16.msra.mxu0 %v8047_v17  ;;  %3225 = vmatpush1.bf16.msra.mxu1 %v8050_v18  ;;  %v8145_v17 = vld [vmem:[%s9334_s23 + $0x294] ss:$144 sps:$4 sm:$0xff]   ;;  %v8148_v18 = vld [vmem:[%s9334_s23 + $0x29c] ss:$144 sps:$4 sm:$0xff]  }
 0x123   : > { %3185 = vmatprep.subr.bf16.mxu0 %v8055_v19  ;;  %3226 = vmatprep.subr.bf16.mxu1 %v8058_v20  ;;  %v8146_v19 = vld [vmem:[%s9334_s23 + $0x298] ss:$144 sps:$4 sm:$0xff]   ;;  %v8151_v20 = vld [vmem:[%s9334_s23 + $0x3b4] ss:$144 sps:$4 sm:$0xff]  }
 0x126   : > { %3186 = vmatpush1.bf16.msra.mxu0 %v8053_v21  ;;  %3227 = vmatpush1.bf16.msra.mxu1 %v8056_v22  ;;  %v8154_v21 = vld [vmem:[%s9334_s23 + $0x3bc] ss:$144 sps:$4 sm:$0xff]   ;;  %v8149_v22 = vld [vmem:[%s9334_s23 + $0x3b0] ss:$144 sps:$4 sm:$0xff]  }
 0x127   : > { %3187 = vmatprep.subr.bf16.mxu0 %v8061_v23  ;;  %3228 = vmatprep.subr.bf16.mxu1 %v8064_v24  ;;  %v8152_v23 = vld [vmem:[%s9334_s23 + $0x3b8] ss:$144 sps:$4 sm:$0xff]   ;;  %v8157_v24 = vld [vmem:[%s9334_s23 + $0x4d4] ss:$144 sps:$4 sm:$0xff]  }
 0x12a   : > { %3188 = vmatpush1.bf16.msra.mxu0 %v8059_v25  ;;  %3229 = vmatpush1.bf16.msra.mxu1 %v8062_v26  ;;  %v8160_v25 = vld [vmem:[%s9334_s23 + $0x4dc] ss:$144 sps:$4 sm:$0xff]   ;;  %v8155_v26 = vld [vmem:[%s9334_s23 + $0x4d0] ss:$144 sps:$4 sm:$0xff]  }
 0x12b   : > { %3189 = vmatprep.subr.bf16.mxu0 %v8067_v27  ;;  %3230 = vmatprep.subr.bf16.mxu1 %v8070_v28  ;;  %v8158_v27 = vld [vmem:[%s9334_s23 + $0x4d8] ss:$144 sps:$4 sm:$0xff]   ;;  %v8163_v28 = vld [vmem:[%s9334_s23 + $0x5f4] ss:$144 sps:$4 sm:$0xff]  }
 0x12e   : > { %3190 = vmatpush1.bf16.msra.mxu0 %v8065_v29  ;;  %3231 = vmatpush1.bf16.msra.mxu1 %v8068_v30  ;;  %v8166_v29 = vld [vmem:[%s9334_s23 + $0x5fc] ss:$144 sps:$4 sm:$0xff]   ;;  %v8161_v30 = vld [vmem:[%s9334_s23 + $0x5f0] ss:$144 sps:$4 sm:$0xff]  }
 0x12f   : > { %3191 = vmatprep.subr.bf16.mxu0 %v8073_v31  ;;  %3232 = vmatprep.subr.bf16.mxu1 %v8076_v32  ;;  %v8164_v31 = vld [vmem:[%s9334_s23 + $0x5f8] ss:$144 sps:$4 sm:$0xff]   ;;  %v8169_v32 = vld [vmem:[%s9334_s23 + $0x714] ss:$144 sps:$4 sm:$0xff]  }
 0x132   : > { %3192 = vmatpush1.bf16.msra.mxu0 %v8071_v33  ;;  %3233 = vmatpush1.bf16.msra.mxu1 %v8074_v34  ;;  %v8172_v33 = vld [vmem:[%s9334_s23 + $0x71c] ss:$144 sps:$4 sm:$0xff]   ;;  %v1169_v34 = vlaneseq }
 0x133   : > { %3193 = vmatprep.subr.bf16.mxu0 %v8079_v35  ;;  %3234 = vmatprep.subr.bf16.mxu1 %v8082_v36  ;;  %v8167_v35 = vld [vmem:[%s9334_s23 + $0x710] ss:$144 sps:$4 sm:$0xff]   ;;  %v8170_v36 = vld [vmem:[%s9334_s23 + $0x718] ss:$144 sps:$4 sm:$0xff]  }
 0x136   : > { %3194 = vmatpush1.bf16.msra.mxu0 %v8077_v38  ;;  %3235 = vmatpush1.bf16.msra.mxu1 %v8080_v39  ;;  %v8175_v38 = vld [vmem:[%s9334_s23 + $0x834] ss:$144 sps:$4 sm:$0xff]   ;;  %v8178_v39 = vld [vmem:[%s9334_s23 + $0x83c] ss:$144 sps:$4 sm:$0xff]  }
 0x137   : > { %3261 = vmatprep.subr.bf16.mxu0 %v8085_v40  ;;  %3302 = vmatprep.subr.bf16.mxu1 %v8088_v41  ;;  %v9554_v40 = vshrl.u32 %v1169_v34, 7  ;;  %v8173_v41 = vld [vmem:[%s9334_s23 + $0x830] ss:$144 sps:$4 sm:$0xff]   ;;  %v8254_v34 = vld [vmem:[%s9334_s23 + $0x4f8] ss:$144 sps:$4 sm:$0xff]  }
 0x139   : > { %3212 = vmatmul.mubr.bf16.vlgmr.msra.gmra.mrb[12].mxu0 %v9376_v6  ;;  %3253 = vmatmul.mubr.bf16.vlgmr.msra.gmra.mrb[12].mxu1 %v9376_v6 }
 0x13a   : > { %3262 = vmatpush1.bf16.msra.mxu0 %v8083_v42  ;;  %3303 = vmatpush1.bf16.msra.mxu1 %v8086_v43  ;;  %v8176_v42 = vld [vmem:[%s9334_s23 + $0x838] ss:$144 sps:$4 sm:$0xff]   ;;  %v8181_v43 = vld [vmem:[%s9334_s23 + $0x64] ss:$144 sps:$4 sm:$0xff]  }
 0x13b   : > { %3263 = vmatprep.subr.bf16.mxu0 %v8091_v44  ;;  %3304 = vmatprep.subr.bf16.mxu1 %v8094_v45  ;;  %v8184_v44 = vld [vmem:[%s9334_s23 + $0x6c] ss:$144 sps:$4 sm:$0xff]   ;;  %v8179_v45 = vld [vmem:[%s9334_s23 + $0x60] ss:$144 sps:$4 sm:$0xff]  }
 0x13c   : > { %3293 = vmatprep.mubr.bf16.mxu0 %v8671_v37  ;;  %3334 = vmatprep.mubr.bf16.mxu1 %v8671_v37 }
 0x13e   : > { %3264 = vmatpush1.bf16.msra.mxu0 %v8089_v46  ;;  %3305 = vmatpush1.bf16.msra.mxu1 %v8092_v47  ;;  %v9562_v46 = vsub.s32 0, %v9554_v40  ;;  %v8182_v47 = vld [vmem:[%s9334_s23 + $0x68] ss:$144 sps:$4 sm:$0xff]  }
 0x13f   : > { %3265 = vmatprep.subr.bf16.mxu0 %v8097_v48  ;;  %3306 = vmatprep.subr.bf16.mxu1 %v8100_v49  ;;  %v8187_v48 = vld [vmem:[%s9334_s23 + $0x184] ss:$144 sps:$4 sm:$0xff]   ;;  %v8190_v49 = vld [vmem:[%s9334_s23 + $0x18c] ss:$144 sps:$4 sm:$0xff]  }
 0x142   : > { %3266 = vmatpush1.bf16.msra.mxu0 %v8095_v50  ;;  %3307 = vmatpush1.bf16.msra.mxu1 %v8098_v51  ;;  %v8185_v50 = vld [vmem:[%s9334_s23 + $0x180] ss:$144 sps:$4 sm:$0xff]   ;;  %v9568_v51 = vld [vmem:[#allocation3] sm:$0xf] }
 0x143   : > { %3267 = vmatprep.subr.bf16.mxu0 %v8103_v52  ;;  %3308 = vmatprep.subr.bf16.mxu1 %v8106_v53  ;;  %v8188_v52 = vld [vmem:[%s9334_s23 + $0x188] ss:$144 sps:$4 sm:$0xff]   ;;  %v8193_v53 = vld [vmem:[%s9334_s23 + $0x2a4] ss:$144 sps:$4 sm:$0xff]  }
 0x146   : > { %3268 = vmatpush1.bf16.msra.mxu0 %v8101_v54  ;;  %3309 = vmatpush1.bf16.msra.mxu1 %v8104_v55  ;;  %v8196_v54 = vld [vmem:[%s9334_s23 + $0x2ac] ss:$144 sps:$4 sm:$0xff]   ;;  %v8191_v55 = vld [vmem:[%s9334_s23 + $0x2a0] ss:$144 sps:$4 sm:$0xff]  }
 0x147   : > { %3269 = vmatprep.subr.bf16.mxu0 %v8109_v56  ;;  %3310 = vmatprep.subr.bf16.mxu1 %v8112_v57  ;;  %v8194_v56 = vld [vmem:[%s9334_s23 + $0x2a8] ss:$144 sps:$4 sm:$0xff]   ;;  %v8199_v57 = vld [vmem:[%s9334_s23 + $0x3c4] ss:$144 sps:$4 sm:$0xff]  }
 0x14a   : > { %3270 = vmatpush1.bf16.msra.mxu0 %v8107_v58  ;;  %3311 = vmatpush1.bf16.msra.mxu1 %v8110_v59  ;;  %v8202_v58 = vld [vmem:[%s9334_s23 + $0x3cc] ss:$144 sps:$4 sm:$0xff]   ;;  %v8197_v59 = vld [vmem:[%s9334_s23 + $0x3c0] ss:$144 sps:$4 sm:$0xff]  }
 0x14b   : > { %3271 = vmatprep.subr.bf16.mxu0 %v8115_v60  ;;  %3312 = vmatprep.subr.bf16.mxu1 %v8118_v61  ;;  %v8200_v60 = vld [vmem:[%s9334_s23 + $0x3c8] ss:$144 sps:$4 sm:$0xff]   ;;  %v8205_v61 = vld [vmem:[%s9334_s23 + $0x4e4] ss:$144 sps:$4 sm:$0xff]  }
 0x14e   : > { %3272 = vmatpush1.bf16.msra.mxu0 %v8113_v62  ;;  %3313 = vmatpush1.bf16.msra.mxu1 %v8116_v63  ;;  %v8208_v62 = vld [vmem:[%s9334_s23 + $0x4ec] ss:$144 sps:$4 sm:$0xff]   ;;  %v8203_v63 = vld [vmem:[%s9334_s23 + $0x4e0] ss:$144 sps:$4 sm:$0xff]  }
 0x14f   : > { %3273 = vmatprep.subr.bf16.mxu0 %v8121_v0  ;;  %3314 = vmatprep.subr.bf16.mxu1 %v8124_v1  ;;  %v8206_v0 = vld [vmem:[%s9334_s23 + $0x4e8] ss:$144 sps:$4 sm:$0xff]   ;;  %v8211_v1 = vld [vmem:[%s9334_s23 + $0x604] ss:$144 sps:$4 sm:$0xff]  }
 0x152   : > { %3274 = vmatpush1.bf16.msra.mxu0 %v8119_v2  ;;  %3315 = vmatpush1.bf16.msra.mxu1 %v8122_v3  ;;  %v8214_v2 = vld [vmem:[%s9334_s23 + $0x60c] ss:$144 sps:$4 sm:$0xff]   ;;  %v9590_v3 = vsub.s32 2, %v9554_v40 }
 0x153   : > { %3275 = vmatprep.subr.bf16.mxu0 %v8127_v4  ;;  %3316 = vmatprep.subr.bf16.mxu1 %v8130_v5  ;;  %v9593_v4 = vsub.s32 6, %v9554_v40  ;;  %v8209_v5 = vld [vmem:[%s9334_s23 + $0x600] ss:$144 sps:$4 sm:$0xff]  }
 0x156   : > { %3276 = vmatpush1.bf16.msra.mxu0 %v8125_v7  ;;  %3317 = vmatpush1.bf16.msra.mxu1 %v8128_v8  ;;  %v8212_v7 = vld [vmem:[%s9334_s23 + $0x608] ss:$144 sps:$4 sm:$0xff]   ;;  %v8217_v8 = vld [vmem:[%s9334_s23 + $0x724] ss:$144 sps:$4 sm:$0xff]  }
 0x157   : > { %3343 = vmatprep.subr.bf16.mxu0 %v8133_v9  ;;  %3384 = vmatprep.subr.bf16.mxu1 %v8136_v10  ;;  %v8220_v9 = vld [vmem:[%s9334_s23 + $0x72c] ss:$144 sps:$4 sm:$0xff]   ;;  %v8215_v10 = vld [vmem:[%s9334_s23 + $0x720] ss:$144 sps:$4 sm:$0xff]  }
 0x159   : > { %3294 = vmatmul.mubr.bf16.vlgmr.msra.gmra.mrb[16].mxu0 %v9376_v6  ;;  %3335 = vmatmul.mubr.bf16.vlgmr.msra.gmra.mrb[16].mxu1 %v9376_v6  ;;  %v8143_v6 = vld [vmem:[%s9334_s23 + $0x290] ss:$144 sps:$4 sm:$0xff]  }
 0x15a   : > { %3344 = vmatpush1.bf16.msra.mxu0 %v8131_v11  ;;  %3385 = vmatpush1.bf16.msra.mxu1 %v8134_v12  ;;  %v8218_v11 = vld [vmem:[%s9334_s23 + $0x728] ss:$144 sps:$4 sm:$0xff]   ;;  %v8223_v12 = vld [vmem:[%s9334_s23 + $0x844] ss:$144 sps:$4 sm:$0xff]  }
 0x15b   : > { %3345 = vmatprep.subr.bf16.mxu0 %v8139_v13  ;;  %3386 = vmatprep.subr.bf16.mxu1 %v8142_v14  ;;  %v8226_v13 = vld [vmem:[%s9334_s23 + $0x84c] ss:$144 sps:$4 sm:$0xff]   ;;  %v8221_v14 = vld [vmem:[%s9334_s23 + $0x840] ss:$144 sps:$4 sm:$0xff]  }
 0x15c   : > { %3375 = vmatprep.mubr.bf16.mxu0 %v8671_v37  ;;  %3416 = vmatprep.mubr.bf16.mxu1 %v8671_v37 }
 0x15e   : > { %3346 = vmatpush1.bf16.msra.mxu0 %v8137_v15  ;;  %3387 = vmatpush1.bf16.msra.mxu1 %v8140_v16  ;;  %v8224_v15 = vld [vmem:[%s9334_s23 + $0x848] ss:$144 sps:$4 sm:$0xff]   ;;  %v8229_v16 = vld [vmem:[%s9334_s23 + $0x74] ss:$144 sps:$4 sm:$0xff]  }
 0x15f   : > { %3347 = vmatprep.subr.bf16.mxu0 %v8145_v17  ;;  %3388 = vmatprep.subr.bf16.mxu1 %v8148_v18  ;;  %v8232_v17 = vld [vmem:[%s9334_s23 + $0x7c] ss:$144 sps:$4 sm:$0xff]   ;;  %v8227_v18 = vld [vmem:[%s9334_s23 + $0x70] ss:$144 sps:$4 sm:$0xff]  }
 0x162   : > { %3348 = vmatpush1.bf16.msra.mxu0 %v8143_v6  ;;  %3389 = vmatpush1.bf16.msra.mxu1 %v8146_v19  ;;  %v8230_v6 = vld [vmem:[%s9334_s23 + $0x78] ss:$144 sps:$4 sm:$0xff]   ;;  %v8235_v19 = vld [vmem:[%s9334_s23 + $0x194] ss:$144 sps:$4 sm:$0xff]  }
 0x163   : > { %3349 = vmatprep.subr.bf16.mxu0 %v8151_v20  ;;  %3390 = vmatprep.subr.bf16.mxu1 %v8154_v21  ;;  %v8238_v20 = vld [vmem:[%s9334_s23 + $0x19c] ss:$144 sps:$4 sm:$0xff]   ;;  %v8233_v21 = vld [vmem:[%s9334_s23 + $0x190] ss:$144 sps:$4 sm:$0xff]  }
 0x166   : > { %3350 = vmatpush1.bf16.msra.mxu0 %v8149_v22  ;;  %3391 = vmatpush1.bf16.msra.mxu1 %v8152_v23  ;;  %v8236_v22 = vld [vmem:[%s9334_s23 + $0x198] ss:$144 sps:$4 sm:$0xff]   ;;  %v8241_v23 = vld [vmem:[%s9334_s23 + $0x2b4] ss:$144 sps:$4 sm:$0xff]  }
 0x167   : > { %3351 = vmatprep.subr.bf16.mxu0 %v8157_v24  ;;  %3392 = vmatprep.subr.bf16.mxu1 %v8160_v25  ;;  %v8244_v24 = vld [vmem:[%s9334_s23 + $0x2bc] ss:$144 sps:$4 sm:$0xff]   ;;  %v8239_v25 = vld [vmem:[%s9334_s23 + $0x2b0] ss:$144 sps:$4 sm:$0xff]  }
 0x16a   : > { %3352 = vmatpush1.bf16.msra.mxu0 %v8155_v26  ;;  %3393 = vmatpush1.bf16.msra.mxu1 %v8158_v27  ;;  %v8242_v26 = vld [vmem:[%s9334_s23 + $0x2b8] ss:$144 sps:$4 sm:$0xff]   ;;  %v8247_v27 = vld [vmem:[%s9334_s23 + $0x3d4] ss:$144 sps:$4 sm:$0xff]  }
 0x16b   : > { %3353 = vmatprep.subr.bf16.mxu0 %v8163_v28  ;;  %3394 = vmatprep.subr.bf16.mxu1 %v8166_v29  ;;  %v8250_v28 = vld [vmem:[%s9334_s23 + $0x3dc] ss:$144 sps:$4 sm:$0xff]   ;;  %v8245_v29 = vld [vmem:[%s9334_s23 + $0x3d0] ss:$144 sps:$4 sm:$0xff]  }
 0x16e   : > { %3354 = vmatpush1.bf16.msra.mxu0 %v8161_v30  ;;  %3395 = vmatpush1.bf16.msra.mxu1 %v8164_v31  ;;  %v8248_v30 = vld [vmem:[%s9334_s23 + $0x3d8] ss:$144 sps:$4 sm:$0xff]   ;;  %v8253_v31 = vld [vmem:[%s9334_s23 + $0x4f4] ss:$144 sps:$4 sm:$0xff]  }
 0x16f   : > { %3355 = vmatprep.subr.bf16.mxu0 %v8169_v32  ;;  %3396 = vmatprep.subr.bf16.mxu1 %v8172_v33  ;;  %v8256_v32 = vld [vmem:[%s9334_s23 + $0x4fc] ss:$144 sps:$4 sm:$0xff]   ;;  %v8251_v33 = vld [vmem:[%s9334_s23 + $0x4f0] ss:$144 sps:$4 sm:$0xff]  }
 0x172   : > { %3356 = vmatpush1.bf16.msra.mxu0 %v8167_v35  ;;  %3397 = vmatpush1.bf16.msra.mxu1 %v8170_v36  ;;  %v8259_v35 = vld [vmem:[%s9334_s23 + $0x614] ss:$144 sps:$4 sm:$0xff]   ;;  %v8262_v36 = vld [vmem:[%s9334_s23 + $0x61c] ss:$144 sps:$4 sm:$0xff]  }
 0x173   : > { %3357 = vmatprep.subr.bf16.mxu0 %v8175_v38  ;;  %3398 = vmatprep.subr.bf16.mxu1 %v8178_v39  ;;  %v8257_v38 = vld [vmem:[%s9334_s23 + $0x610] ss:$144 sps:$4 sm:$0xff]   ;;  %v8260_v39 = vld [vmem:[%s9334_s23 + $0x618] ss:$144 sps:$4 sm:$0xff]  }
 0x176   : > { %3358 = vmatpush1.bf16.msra.mxu0 %v8173_v41  ;;  %3399 = vmatpush1.bf16.msra.mxu1 %v8176_v42  ;;  %v8265_v41 = vld [vmem:[%s9334_s23 + $0x734] ss:$144 sps:$4 sm:$0xff]   ;;  %v8268_v42 = vld [vmem:[%s9334_s23 + $0x73c] ss:$144 sps:$4 sm:$0xff]  }
 0x177   : > { %3425 = vmatprep.subr.bf16.mxu0 %v8181_v43  ;;  %3466 = vmatprep.subr.bf16.mxu1 %v8184_v44 }
 0x179   : > { %3376 = vmatmul.mubr.bf16.vlgmr.msra.gmra.mrb[20].mxu0 %v9568_v51  ;;  %3417 = vmatmul.mubr.bf16.vlgmr.msra.gmra.mrb[20].mxu1 %v9568_v51 }
 0x17a   : > { %3426 = vmatpush1.bf16.msra.mxu0 %v8179_v45  ;;  %3467 = vmatpush1.bf16.msra.mxu1 %v8182_v47  ;;  %v8263_v45 = vld [vmem:[%s9334_s23 + $0x730] ss:$144 sps:$4 sm:$0xff]   ;;  %v8266_v47 = vld [vmem:[%s9334_s23 + $0x738] ss:$144 sps:$4 sm:$0xff]  }
 0x17b   : > { %3427 = vmatprep.subr.bf16.mxu0 %v8187_v48  ;;  %3468 = vmatprep.subr.bf16.mxu1 %v8190_v49 }
 0x17c   : > { %3457 = vmatprep.mubr.bf16.mxu0 %v8671_v37  ;;  %3498 = vmatprep.mubr.bf16.mxu1 %v8671_v37 }
 0x17e   : > { %3428 = vmatpush1.bf16.msra.mxu0 %v8185_v50  ;;  %3469 = vmatpush1.bf16.msra.mxu1 %v8188_v52  ;;  %v8271_v50 = vld [vmem:[%s9334_s23 + $0x854] ss:$144 sps:$4 sm:$0xff]  }
 0x17f   : > { %3429 = vmatprep.subr.bf16.mxu0 %v8193_v53  ;;  %3470 = vmatprep.subr.bf16.mxu1 %v8196_v54 }
 0x182   : > { %3430 = vmatpush1.bf16.msra.mxu0 %v8191_v55  ;;  %3471 = vmatpush1.bf16.msra.mxu1 %v8194_v56  ;;  %v8274_v56 = vld [vmem:[%s9334_s23 + $0x85c] ss:$144 sps:$4 sm:$0xff]  }
 0x183   : > { %3431 = vmatprep.subr.bf16.mxu0 %v8199_v57  ;;  %3472 = vmatprep.subr.bf16.mxu1 %v8202_v58  ;;  %v8269_v57 = vld [vmem:[%s9334_s23 + $0x850] ss:$144 sps:$4 sm:$0xff]   ;;  %v8272_v58 = vld [vmem:[%s9334_s23 + $0x858] ss:$144 sps:$4 sm:$0xff]  }
 0x186   : > { %3432 = vmatpush1.bf16.msra.mxu0 %v8197_v59  ;;  %3473 = vmatpush1.bf16.msra.mxu1 %v8200_v60  ;;  %v8277_v59 = vld [vmem:[%s9334_s23 + $0x84] ss:$144 sps:$4 sm:$0xff]   ;;  %v8280_v60 = vld [vmem:[%s9334_s23 + $0x8c] ss:$144 sps:$4 sm:$0xff]  }
 0x187   : > { %3433 = vmatprep.subr.bf16.mxu0 %v8205_v61  ;;  %3474 = vmatprep.subr.bf16.mxu1 %v8208_v62  ;;  %v8275_v61 = vld [vmem:[%s9334_s23 + $0x80] ss:$144 sps:$4 sm:$0xff]   ;;  %v8278_v62 = vld [vmem:[%s9334_s23 + $0x88] ss:$144 sps:$4 sm:$0xff]  }
 0x18a   : > { %3434 = vmatpush1.bf16.msra.mxu0 %v8203_v63  ;;  %3475 = vmatpush1.bf16.msra.mxu1 %v8206_v0  ;;  %v8283_v63 = vld [vmem:[%s9334_s23 + $0x1a4] ss:$144 sps:$4 sm:$0xff]   ;;  %v8286_v0 = vld [vmem:[%s9334_s23 + $0x1ac] ss:$144 sps:$4 sm:$0xff]  }
 0x18b   : > { %3435 = vmatprep.subr.bf16.mxu0 %v8211_v1  ;;  %3476 = vmatprep.subr.bf16.mxu1 %v8214_v2  ;;  %v8281_v1 = vld [vmem:[%s9334_s23 + $0x1a0] ss:$144 sps:$4 sm:$0xff]   ;;  %v8284_v2 = vld [vmem:[%s9334_s23 + $0x1a8] ss:$144 sps:$4 sm:$0xff]  }
 0x18e   : > { %3436 = vmatpush1.bf16.msra.mxu0 %v8209_v5  ;;  %3477 = vmatpush1.bf16.msra.mxu1 %v8212_v7  ;;  %v8289_v5 = vld [vmem:[%s9334_s23 + $0x2c4] ss:$144 sps:$4 sm:$0xff]   ;;  %v8292_v7 = vld [vmem:[%s9334_s23 + $0x2cc] ss:$144 sps:$4 sm:$0xff]  }
 0x18f   : > { %3437 = vmatprep.subr.bf16.mxu0 %v8217_v8  ;;  %3478 = vmatprep.subr.bf16.mxu1 %v8220_v9  ;;  %v8287_v8 = vld [vmem:[%s9334_s23 + $0x2c0] ss:$144 sps:$4 sm:$0xff]   ;;  %v8290_v9 = vld [vmem:[%s9334_s23 + $0x2c8] ss:$144 sps:$4 sm:$0xff]  }
 0x192   : > { %3438 = vmatpush1.bf16.msra.mxu0 %v8215_v10  ;;  %3479 = vmatpush1.bf16.msra.mxu1 %v8218_v11  ;;  %v8295_v10 = vld [vmem:[%s9334_s23 + $0x3e4] ss:$144 sps:$4 sm:$0xff]  }
 0x193   : > { %3439 = vmatprep.subr.bf16.mxu0 %v8223_v12  ;;  %3480 = vmatprep.subr.bf16.mxu1 %v8226_v13  ;;  %v9667_v11 = vld [vmem:[%s9327_s14] sm:$0xff]  ;;  %v8298_v12 = vld [vmem:[%s9334_s23 + $0x3ec] ss:$144 sps:$4 sm:$0xff]   ;;  %v8293_v13 = vld [vmem:[%s9334_s23 + $0x3e0] ss:$144 sps:$4 sm:$0xff]  }
 0x196   : > { %3440 = vmatpush1.bf16.msra.mxu0 %v8221_v14  ;;  %3481 = vmatpush1.bf16.msra.mxu1 %v8224_v15  ;;  %v8296_v14 = vld [vmem:[%s9334_s23 + $0x3e8] ss:$144 sps:$4 sm:$0xff]   ;;  %v8304_v15 = vld [vmem:[%s9334_s23 + $0x50c] ss:$144 sps:$4 sm:$0xff]  }
 0x197   : > { %3507 = vmatprep.subr.bf16.mxu0 %v8229_v16  ;;  %3548 = vmatprep.subr.bf16.mxu1 %v8232_v17  ;;  %v9675_v16 = vunpack.c.l.bf16 %v9667_v11  ;;  %v8299_v17 = vld [vmem:[%s9334_s23 + $0x500] ss:$144 sps:$4 sm:$0xff]  }
 0x199   : > { %3458 = vmatmul.mubr.bf16.vlgmr.msra.gmra.mrb[24].mxu0 %v9568_v51  ;;  %3499 = vmatmul.mubr.bf16.vlgmr.msra.gmra.mrb[24].mxu1 %v9568_v51 }
 0x19a   : > { %3508 = vmatpush1.bf16.msra.mxu0 %v8227_v18  ;;  %3549 = vmatpush1.bf16.msra.mxu1 %v8230_v6  ;;  %v8302_v18 = vld [vmem:[%s9334_s23 + $0x508] ss:$144 sps:$4 sm:$0xff]   ;;  %v8307_v6 = vld [vmem:[%s9334_s23 + $0x624] ss:$144 sps:$4 sm:$0xff]  }
 0x19b   : > { %3509 = vmatprep.subr.bf16.mxu0 %v8235_v19  ;;  %3550 = vmatprep.subr.bf16.mxu1 %v8238_v20  ;;  %v8310_v19 = vld [vmem:[%s9334_s23 + $0x62c] ss:$144 sps:$4 sm:$0xff]   ;;  %v1176_v20 = vrot.slane %v9675_v16, %v9590_v3 }
 0x19c   : > { %3539 = vmatprep.mubr.bf16.mxu0 %v8671_v37  ;;  %3580 = vmatprep.mubr.bf16.mxu1 %v8671_v37 }
 0x19e   : > { %3510 = vmatpush1.bf16.msra.mxu0 %v8233_v21  ;;  %3551 = vmatpush1.bf16.msra.mxu1 %v8236_v22  ;;  %v8305_v21 = vld [vmem:[%s9334_s23 + $0x620] ss:$144 sps:$4 sm:$0xff]   ;;  %v1184_v22 = vrot.slane %v9675_v16, %v9593_v4 }
 0x19f   : > { %3511 = vmatprep.subr.bf16.mxu0 %v8241_v23  ;;  %3552 = vmatprep.subr.bf16.mxu1 %v8244_v24  ;;  %v8308_v23 = vld [vmem:[%s9334_s23 + $0x628] ss:$144 sps:$4 sm:$0xff]   ;;  %v8313_v24 = vld [vmem:[%s9334_s23 + $0x744] ss:$144 sps:$4 sm:$0xff]  }
 0x1a2   : > { %3512 = vmatpush1.bf16.msra.mxu0 %v8239_v25  ;;  %3553 = vmatpush1.bf16.msra.mxu1 %v8242_v26  ;;  %v8316_v25 = vld [vmem:[%s9334_s23 + $0x74c] ss:$144 sps:$4 sm:$0xff]   ;;  %v1356_v26 = vrot.slane %v1176_v20, %v9562_v46 }
 0x1a3   : > { %3513 = vmatprep.subr.bf16.mxu0 %v8247_v27  ;;  %3554 = vmatprep.subr.bf16.mxu1 %v8250_v28 }
 0x1a6   : > { %3514 = vmatpush1.bf16.msra.mxu0 %v8245_v29  ;;  %3555 = vmatpush1.bf16.msra.mxu1 %v8248_v30  ;;  %v8311_v29 = vld [vmem:[%s9334_s23 + $0x740] ss:$144 sps:$4 sm:$0xff]   ;;  %v8314_v30 = vld [vmem:[%s9334_s23 + $0x748] ss:$144 sps:$4 sm:$0xff]  }
 0x1a7   : > { %3515 = vmatprep.subr.bf16.mxu0 %v8253_v31  ;;  %3556 = vmatprep.subr.bf16.mxu1 %v8256_v32  ;;  %v1364_v31 = vrot.slane %v1184_v22, %v9562_v46 }
 0x1aa   : > { %3516 = vmatpush1.bf16.msra.mxu0 %v8251_v33  ;;  %3557 = vmatpush1.bf16.msra.mxu1 %v8254_v34  ;;  %v8319_v34 = vld [vmem:[%s9334_s23 + $0x864] ss:$144 sps:$4 sm:$0xff]  }
 0x1ab   : > { %3517 = vmatprep.subr.bf16.mxu0 %v8259_v35  ;;  %3558 = vmatprep.subr.bf16.mxu1 %v8262_v36 }
 0x1ac   : > { %v9635_v43 = vpop.f32.mrb[0].mxu0  ;;  %v9637_v44 = vpop.f32.mrb[0].mxu1 }
 0x1ad   : > { %v9641_v48 = vpop.f32.mrb[1].mxu0  ;;  %v9643_v49 = vpop.f32.mrb[1].mxu1 }
 0x1ae   : > { %v2971_v52 = vpop.f32.mrb[2].mxu0  ;;  %v3012_v53 = vpop.f32.mrb[2].mxu1  ;;  %3518 = vmatpush1.bf16.msra.mxu0 %v8257_v38  ;;  %3559 = vmatpush1.bf16.msra.mxu1 %v8260_v39 }
 0x1af   : > { %v2972_v54 = vpop.f32.mrb[3].mxu0  ;;  %v3013_v55 = vpop.f32.mrb[3].mxu1  ;;  %3519 = vmatprep.subr.bf16.mxu0 %v8265_v41  ;;  %3560 = vmatprep.subr.bf16.mxu1 %v8268_v42  ;;  %v8322_v41 = vld [vmem:[%s9334_s23 + $0x86c] ss:$144 sps:$4 sm:$0xff]   ;;  %v2970_v42 = vadd.f32 %v9641_v48, %v1356_v26  ;;  %v8323_v52 = vld [vmem:[%s9332_s20 + $0x40] sm:$0xff]  }
 0x1b0   : > { %v8324_v53 = vld [vmem:[%s9332_s20 + $0xc0] sm:$0xff]  }
 0x1b1   : > { %v3672_v54 = vmax.f32 %v2970_v42, 0.0  ;;  %v8326_v48 = vld [vmem:[%s9332_s20 + $0x80] sm:$0xff]   ;;  %v8351_v42 = vld [vmem:[%s9332_s20 + $0x78] sm:$0xff]  }
 0x1b2   : > { %3520 = vmatpush1.bf16.msra.mxu0 %v8263_v45  ;;  %3561 = vmatpush1.bf16.msra.mxu1 %v8266_v47  ;;  %v8317_v45 = vld [vmem:[%s9334_s23 + $0x860] ss:$144 sps:$4 sm:$0xff]   ;;  %v8320_v47 = vld [vmem:[%s9334_s23 + $0x868] ss:$144 sps:$4 sm:$0xff]  }
 0x1b3   : > { %3521 = vmatprep.subr.bf16.mxu0 %v8271_v50  ;;  %3562 = vmatprep.subr.bf16.mxu1 %v8274_v56  ;;  %v3011_v50 = vadd.f32 %v9643_v49, %v1364_v31  ;;  %v8325_v56 = vld [vmem:[%s9332_s20] sm:$0xff]   ;;  %v8327_v49 = vld [vmem:[%s9332_s20 + $0x48] sm:$0xff]  }
 0x1b5   : > { %v3674_v55 = vmax.f32 %v3011_v50, 0.0  ;;  %v8353_v50 = vld [vmem:[%s9332_s20 + $0x38] sm:$0xff]  }
 0x1b6   : > { %3522 = vmatpush1.bf16.msra.mxu0 %v8269_v57  ;;  %3563 = vmatpush1.bf16.msra.mxu1 %v8272_v58  ;;  %v3709_v57 = vpack.c.bf16 %v3672_v54, %v3672_v54  ;;  %v8328_v58 = vld [vmem:[%s9332_s20 + $0xc8] sm:$0xff]   ;;  %v8355_v54 = vld [vmem:[%s9332_s20 + $0x140] sm:$0xff]  }
 0x1b7   : > { %3589 = vmatprep.subr.bf16.mxu0 %v8277_v59  ;;  %3630 = vmatprep.subr.bf16.mxu1 %v8280_v60  ;;  %v3711_v59 = vpack.c.bf16 %v3674_v55, %v3674_v55  ;;  %v8329_v60 = vld [vmem:[%s9332_s20 + $0x8] sm:$0xff]  }
 0x1b9   : > { %3540 = vmatmul.mubr.bf16.vlgmr.msra.gmra.mrb[28].mxu0 %v9568_v51  ;;  %3581 = vmatmul.mubr.bf16.vlgmr.msra.gmra.mrb[28].mxu1 %v9568_v51 }
 0x1ba   : > { %3590 = vmatpush1.bf16.msra.mxu0 %v8275_v61  ;;  %3631 = vmatpush1.bf16.msra.mxu1 %v8278_v62  ;;  %v8330_v61 = vld [vmem:[%s9332_s20 + $0x88] sm:$0xff]   ;;  %v8331_v62 = vld [vmem:[%s9332_s20 + $0x50] sm:$0xff]  }
 0x1bb   : > { %3591 = vmatprep.subr.bf16.mxu0 %v8283_v63  ;;  %3632 = vmatprep.subr.bf16.mxu1 %v8286_v0  ;;  %v8332_v63 = vld [vmem:[%s9332_s20 + $0xd0] sm:$0xff]  }
 0x1bc   : > { %3621 = vmatprep.mubr.bf16.mxu0 %v8671_v37  ;;  %3662 = vmatprep.mubr.bf16.mxu1 %v8671_v37  ;;  %v8301_v37 = vld [vmem:[%s9334_s23 + $0x504] ss:$144 sps:$4 sm:$0xff]  }
 0x1bd   : > { %v8333_v0 = vld [vmem:[%s9332_s20 + $0x10] sm:$0xff]  }
 0x1be   : > { %3592 = vmatpush1.bf16.msra.mxu0 %v8281_v1  ;;  %3633 = vmatpush1.bf16.msra.mxu1 %v8284_v2  ;;  %v8334_v1 = vld [vmem:[%s9332_s20 + $0x90] sm:$0xff]   ;;  %v8336_v2 = vld [vmem:[%s9332_s20 + $0xd8] sm:$0xff]  }
 0x1bf   : > { %3593 = vmatprep.subr.bf16.mxu0 %v8289_v5  ;;  %3634 = vmatprep.subr.bf16.mxu1 %v8292_v7  ;;  %v8337_v5 = vld [vmem:[%s9332_s20 + $0x18] sm:$0xff]  }
 0x1c0   : > { %v8338_v7 = vld [vmem:[%s9332_s20 + $0x98] sm:$0xff]  }
 0x1c2   : > { %3594 = vmatpush1.bf16.msra.mxu0 %v8287_v8  ;;  %3635 = vmatpush1.bf16.msra.mxu1 %v8290_v9  ;;  %v8339_v8 = vld [vmem:[%s9332_s20 + $0x60] sm:$0xff]   ;;  %v9727_v9 = vsub.s32 4, %v9554_v40 }
 0x1c3   : > { %3595 = vmatprep.subr.bf16.mxu0 %v8295_v10  ;;  %3636 = vmatprep.subr.bf16.mxu1 %v8298_v12  ;;  %v8340_v10 = vld [vmem:[%s9332_s20 + $0xe0] sm:$0xff]   ;;  %v9731_v12 = vunpack.c.h.bf16 %v9667_v11 }
 0x1c4   : > { %v1180_v40 = vrot.slane %v9675_v16, %v9727_v9 }
 0x1c5   : > { %v1192_v11 = vrot.slane %v9731_v12, %v9590_v3 }
 0x1c6   : > { %3596 = vmatpush1.bf16.msra.mxu0 %v8293_v13  ;;  %3637 = vmatpush1.bf16.msra.mxu1 %v8296_v14  ;;  %v8341_v13 = vld [vmem:[%s9332_s20 + $0x20] sm:$0xff]  }
 0x1c7   : > { %3597 = vmatprep.subr.bf16.mxu0 %v8301_v37  ;;  %3638 = vmatprep.subr.bf16.mxu1 %v8304_v15  ;;  %v8342_v14 = vld [vmem:[%s9332_s20 + $0xa0] sm:$0xff]   ;;  %v1172_v37 = vrot.slane %v9675_v16, %v9562_v46  ;;  %v8343_v15 = vld [vmem:[%s9332_s20 + $0x68] sm:$0xff]   ;;  %v1360_v16 = vrot.slane %v1180_v40, %v9562_v46  ;;  %v1372_v26 = vrot.slane %v1192_v11, %v9562_v46 }
 0x1c8   : > { %v8373_v40 = vld [vmem:[%s9332_s20 + $0x120] sm:$0xff]  }
 0x1c9   : > { %v1352_v20 = vrot.slane %v1172_v37, %v9562_v46  ;;  %v8371_v37 = vld [vmem:[%s9332_s20 + $0x160] sm:$0xff]  }
 0x1ca   : > { %3598 = vmatpush1.bf16.msra.mxu0 %v8299_v17  ;;  %3639 = vmatpush1.bf16.msra.mxu1 %v8302_v18  ;;  %v8344_v17 = vld [vmem:[%s9332_s20 + $0xe8] sm:$0xff]   ;;  %v8374_v11 = vld [vmem:[%s9332_s20 + $0x1a0] sm:$0xff]  }
 0x1cb   : > { %3599 = vmatprep.subr.bf16.mxu0 %v8307_v6  ;;  %3640 = vmatprep.subr.bf16.mxu1 %v8310_v19  ;;  %v8345_v18 = vld [vmem:[%s9332_s20 + $0x28] sm:$0xff]   ;;  %v1200_v6 = vrot.slane %v9731_v12, %v9593_v4 }
 0x1cc   : > { %v9690_v27 = vpop.f32.mrb[4].mxu0  ;;  %v9692_v28 = vpop.f32.mrb[4].mxu1  ;;  %v8346_v19 = vld [vmem:[%s9332_s20 + $0xa8] sm:$0xff]  }
 0x1cd   : > { %v9697_v32 = vpop.f32.mrb[5].mxu0  ;;  %v9699_v33 = vpop.f32.mrb[5].mxu1  ;;  %v1380_v31 = vrot.slane %v1200_v6, %v9562_v46  ;;  %v1188_v6 = vrot.slane %v9731_v12, %v9562_v46 }
 0x1ce   : > { %v3053_v35 = vpop.f32.mrb[6].mxu0  ;;  %v3094_v36 = vpop.f32.mrb[6].mxu1  ;;  %3600 = vmatpush1.bf16.msra.mxu0 %v8305_v21  ;;  %3641 = vmatpush1.bf16.msra.mxu1 %v8308_v23  ;;  %v8347_v21 = vld [vmem:[%s9332_s20 + $0x70] sm:$0xff]  }
 0x1cf   : > { %v3054_v38 = vpop.f32.mrb[7].mxu0  ;;  %v3095_v39 = vpop.f32.mrb[7].mxu1  ;;  %3601 = vmatprep.subr.bf16.mxu0 %v8313_v24  ;;  %3642 = vmatprep.subr.bf16.mxu1 %v8316_v25  ;;  %v8348_v24 = vld [vmem:[%s9332_s20 + $0xf0] sm:$0xff]   ;;  %v2968_v36 = vadd.f32 %v9635_v43, %v1352_v20  ;;  %v3093_v43 = vadd.f32 %v9699_v33, %v1380_v31  ;;  %v8360_v33 = vld [vmem:[%s9332_s20 + $0x1c8] sm:$0xff]   ;;  %v1196_v20 = vrot.slane %v9731_v12, %v9727_v9 }
 0x1d0   : > { %v8349_v25 = vld [vmem:[%s9332_s20 + $0x30] sm:$0xff]   ;;  %v1368_v31 = vrot.slane %v1188_v6, %v9562_v46  ;;  %v8404_v6 = vld [vmem:[%s9332_s20 + $0x2e0] sm:$0xff]  }
 0x1d1   : > { %v3671_v55 = vmax.f32 %v2968_v36, 0.0 }
 0x1d2   : > { %3602 = vmatpush1.bf16.msra.mxu0 %v8311_v29  ;;  %3643 = vmatpush1.bf16.msra.mxu1 %v8314_v30 }
 0x1d3   : > { %3603 = vmatprep.subr.bf16.mxu0 %v8319_v34  ;;  %3644 = vmatprep.subr.bf16.mxu1 %v8322_v41  ;;  %v8350_v41 = vld [vmem:[%s9332_s20 + $0xb0] sm:$0xff]  }
 0x1d6   : > { %3604 = vmatpush1.bf16.msra.mxu0 %v8317_v45  ;;  %3645 = vmatpush1.bf16.msra.mxu1 %v8320_v47  ;;  %v8352_v45 = vld [vmem:[%s9332_s20 + $0xf8] sm:$0xff]   ;;  %v3009_v47 = vadd.f32 %v9637_v44, %v1360_v16  ;;  %v8357_v44 = vld [vmem:[%s9332_s20 + $0x100] sm:$0xff]  }
 0x1d7   : > { %7460 = vmatprep.subr.bf16.mxu0 %v8323_v52  ;;  %7482 = vmatprep.subr.bf16.mxu1 %v8324_v53  ;;  %v3052_v52 = vadd.f32 %v9697_v32, %v1372_v26  ;;  %v8354_v53 = vld [vmem:[%s9332_s20 + $0xb8] sm:$0xff]   ;;  %v8359_v32 = vld [vmem:[%s9332_s20 + $0x148] sm:$0xff]   ;;  %v8379_v26 = vld [vmem:[%s9332_s20 + $0x170] sm:$0xff]  }
 0x1d9   : > { %3622 = vmatmul.mubr.bf16.vlgmr.msra.gmra.mrb[32].mxu0 %v9568_v51  ;;  %3663 = vmatmul.mubr.bf16.vlgmr.msra.gmra.mrb[32].mxu1 %v9568_v51  ;;  %v8335_v51 = vld [vmem:[%s9332_s20 + $0x58] sm:$0xff]  }
 0x1da   : > { %7461 = vmatpush3.bf16.msra.mxu0 %v8325_v56  ;;  %6080 = vmatprep.mubr.bf16.mxu0 %v3709_v57  ;;  %v8356_v56 = vld [vmem:[%s9332_s20 + $0x1c0] sm:$0xff]  }
 0x1db   : > { %7483 = vmatpush3.bf16.msra.mxu1 %v8326_v48  ;;  %6120 = vmatprep.mubr.bf16.mxu1 %v3711_v59  ;;  %v3673_v48 = vmax.f32 %v3009_v47, 0.0  ;;  %v8358_v57 = vld [vmem:[%s9332_s20 + $0x180] sm:$0xff]   ;;  %v3708_v59 = vpack.c.bf16 %v3671_v55, %v3671_v55  ;;  %v8383_v55 = vld [vmem:[%s9332_s20 + $0x178] sm:$0xff]  }
 0x1dc   : > { %7462 = vmatprep.subr.bf16.mxu0 %v8327_v49  ;;  %7484 = vmatprep.subr.bf16.mxu1 %v8328_v58  ;;  %v3676_v49 = vmax.f32 %v3052_v52, 0.0  ;;  %v3678_v58 = vmax.f32 %v3093_v43, 0.0  ;;  %v3050_v52 = vadd.f32 %v9690_v27, %v1368_v31  ;;  %v8386_v27 = vld [vmem:[%s9332_s20 + $0x1b8] sm:$0xff]   ;;  %v8409_v31 = vld [vmem:[%s9332_s20 + $0x228] sm:$0xff]  }
 0x1de   : > { %7463 = vmatpush3.bf16.msra.mxu0 %v8329_v60  ;;  %v3710_v60 = vpack.c.bf16 %v3673_v48, %v3673_v48  ;;  %v8384_v48 = vld [vmem:[%s9332_s20 + $0x1f8] sm:$0xff]  }
 0x1df   : > { %7485 = vmatpush3.bf16.msra.mxu1 %v8330_v61  ;;  %7464 = vmatprep.subr.bf16.mxu0 %v8331_v62  ;;  %v8361_v61 = vld [vmem:[%s9332_s20 + $0x108] sm:$0xff]   ;;  %v3713_v62 = vpack.c.bf16 %v3676_v49, %v3676_v49  ;;  %v8385_v49 = vld [vmem:[%s9332_s20 + $0x138] sm:$0xff]  }
 0x1e0   : > { %7486 = vmatprep.subr.bf16.mxu1 %v8332_v63  ;;  %v8362_v63 = vld [vmem:[%s9332_s20 + $0x188] sm:$0xff]  }
 0x1e2   : > { %7465 = vmatpush3.bf16.msra.mxu0 %v8333_v0  ;;  %v3715_v0 = vpack.c.bf16 %v3678_v58, %v3678_v58  ;;  %v3675_v58 = vmax.f32 %v3050_v52, 0.0  ;;  %v8413_v52 = vld [vmem:[%s9332_s20 + $0x230] sm:$0xff]  }
 0x1e3   : > { %7487 = vmatpush3.bf16.msra.mxu1 %v8334_v1  ;;  %7466 = vmatprep.subr.bf16.mxu0 %v8335_v51  ;;  %v8363_v1 = vld [vmem:[%s9332_s20 + $0x150] sm:$0xff]  }
 0x1e4   : > { %7488 = vmatprep.subr.bf16.mxu1 %v8336_v2  ;;  %v8364_v51 = vld [vmem:[%s9332_s20 + $0x1d0] sm:$0xff]  }
 0x1e5   : > { %v8365_v2 = vld [vmem:[%s9332_s20 + $0x110] sm:$0xff]  }
 0x1e6   : > { %7467 = vmatpush3.bf16.msra.mxu0 %v8337_v5  ;;  %v8366_v5 = vld [vmem:[%s9332_s20 + $0x190] sm:$0xff]  }
 0x1e7   : > { %7489 = vmatpush3.bf16.msra.mxu1 %v8338_v7  ;;  %7468 = vmatprep.subr.bf16.mxu0 %v8339_v8  ;;  %v8367_v7 = vld [vmem:[%s9332_s20 + $0x158] sm:$0xff]  }
 0x1e8   : > { %7490 = vmatprep.subr.bf16.mxu1 %v8340_v10  ;;  %v8368_v8 = vld [vmem:[%s9332_s20 + $0x1d8] sm:$0xff]   ;;  %v9786_v10 = vld [vmem:[%s9327_s14 + $0x8] sm:$0xff] }
 0x1ea   : > { %7469 = vmatpush3.bf16.msra.mxu0 %v8341_v13  ;;  %v8369_v13 = vld [vmem:[%s9332_s20 + $0x118] sm:$0xff]  }
 0x1eb   : > { %7491 = vmatpush3.bf16.msra.mxu1 %v8342_v14  ;;  %7470 = vmatprep.subr.bf16.mxu0 %v8343_v15  ;;  %v8370_v14 = vld [vmem:[%s9332_s20 + $0x198] sm:$0xff]   ;;  %v8372_v15 = vld [vmem:[%s9332_s20 + $0x1e0] sm:$0xff]  }
 0x1ec   : > { %v9750_v22 = vpop.f32.mrb[8].mxu0  ;;  %v9752_v23 = vpop.f32.mrb[8].mxu1  ;;  %7492 = vmatprep.subr.bf16.mxu1 %v8344_v17  ;;  %v9794_v17 = vunpack.c.l.bf16 %v9786_v10 }
 0x1ed   : > { %v9757_v29 = vpop.f32.mrb[9].mxu0  ;;  %v9759_v30 = vpop.f32.mrb[9].mxu1 }
 0x1ee   : > { %v3135_v34 = vpop.f32.mrb[10].mxu0  ;;  %v3176_v35 = vpop.f32.mrb[10].mxu1  ;;  %7471 = vmatpush3.bf16.msra.mxu0 %v8345_v18  ;;  %v8375_v18 = vld [vmem:[%s9332_s20 + $0x168] sm:$0xff]   ;;  %v1208_v16 = vrot.slane %v9794_v17, %v9590_v3 }
 0x1ef   : > { %7493 = vmatpush3.bf16.msra.mxu1 %v8346_v19  ;;  %v3136_v38 = vpop.f32.mrb[11].mxu0  ;;  %v3177_v39 = vpop.f32.mrb[11].mxu1  ;;  %7472 = vmatprep.subr.bf16.mxu0 %v8347_v21  ;;  %v8376_v19 = vld [vmem:[%s9332_s20 + $0x1e8] sm:$0xff]   ;;  %v8380_v34 = vld [vmem:[%s9332_s20 + $0x1f0] sm:$0xff]   ;;  %v1376_v35 = vrot.slane %v1196_v20, %v9562_v46  ;;  %v8405_v20 = vld [vmem:[%s9332_s20 + $0x220] sm:$0xff]  }
 0x1f0   : > { %7494 = vmatprep.subr.bf16.mxu1 %v8348_v24  ;;  %v8377_v21 = vld [vmem:[%s9332_s20 + $0x128] sm:$0xff]   ;;  %v1388_v38 = vrot.slane %v1208_v16, %v9562_v46  ;;  %v1204_v16 = vrot.slane %v9794_v17, %v9562_v46 }
 0x1f1   : > { %v8378_v24 = vld [vmem:[%s9332_s20 + $0x1a8] sm:$0xff]  }
 0x1f2   : > { %7473 = vmatpush3.bf16.msra.mxu0 %v8349_v25  ;;  %v1216_v25 = vrot.slane %v9794_v17, %v9593_v4 }
 0x1f3   : > { %7495 = vmatpush3.bf16.msra.mxu1 %v8350_v41  ;;  %7474 = vmatprep.subr.bf16.mxu0 %v8351_v42  ;;  %v8381_v42 = vld [vmem:[%s9332_s20 + $0x130] sm:$0xff]  }
 0x1f4   : > { %7496 = vmatprep.subr.bf16.mxu1 %v8352_v45  ;;  %v1396_v45 = vrot.slane %v1216_v25, %v9562_v46  ;;  %v1212_v25 = vrot.slane %v9794_v17, %v9727_v9 }
 0x1f6   : > { %7475 = vmatpush3.bf16.msra.mxu0 %v8353_v50  ;;  %v1392_v17 = vrot.slane %v1212_v25, %v9562_v46  ;;  %v8437_v25 = vld [vmem:[%s9332_s20 + $0x320] sm:$0xff]  }
 0x1f7   : > { %7497 = vmatpush3.bf16.msra.mxu1 %v8354_v53  ;;  %7504 = vmatprep.subr.bf16.mxu0 %v8355_v54  ;;  %v8382_v54 = vld [vmem:[%s9332_s20 + $0x1b0] sm:$0xff]  }
 0x1f8   : > { %7526 = vmatprep.subr.bf16.mxu1 %v8356_v56  ;;  %v3091_v56 = vadd.f32 %v9692_v28, %v1376_v35  ;;  %v8388_v28 = vld [vmem:[%s9332_s20 + $0x2c0] sm:$0xff]   ;;  %v8410_v35 = vld [vmem:[%s9332_s20 + $0x2a8] sm:$0xff]  }
 0x1f9   : > { %6081 = vmatmul.mubr.bf16.vlgmr.msra.gmra.mrb[36].mxu0 %v3708_v59 }
 0x1fa   : > { %6121 = vmatmul.mubr.bf16.vlgmr.msra.gmra.mrb[36].mxu1 %v3710_v60  ;;  %7505 = vmatpush3.bf16.msra.mxu0 %v8357_v44  ;;  %v3134_v44 = vadd.f32 %v9757_v29, %v1388_v38  ;;  %v3677_v59 = vmax.f32 %v3091_v56, 0.0  ;;  %v8389_v60 = vld [vmem:[%s9332_s20 + $0x200] sm:$0xff]   ;;  %v1384_v38 = vrot.slane %v1204_v16, %v9562_v46 }
 0x1fb   : > { %6160 = vmatprep.mubr.bf16.mxu0 %v3713_v62  ;;  %7527 = vmatpush3.bf16.msra.mxu1 %v8358_v57  ;;  %v3175_v57 = vadd.f32 %v9759_v30, %v1396_v45  ;;  %v8390_v29 = vld [vmem:[%s9332_s20 + $0x280] sm:$0xff]   ;;  %v3712_v62 = vpack.c.bf16 %v3675_v58, %v3675_v58  ;;  %v8391_v30 = vld [vmem:[%s9332_s20 + $0x248] sm:$0xff]   ;;  %v8415_v58 = vld [vmem:[%s9332_s20 + $0x278] sm:$0xff]  }
 0x1fc   : > { %6200 = vmatprep.mubr.bf16.mxu1 %v3715_v0  ;;  %7506 = vmatprep.subr.bf16.mxu0 %v8359_v32  ;;  %v8387_v32 = vld [vmem:[%s9332_s20 + $0x240] sm:$0xff]   ;;  %v8392_v0 = vld [vmem:[%s9332_s20 + $0x2c8] sm:$0xff]  }
 0x1fd   : > { %7528 = vmatprep.subr.bf16.mxu1 %v8360_v33  ;;  %v3680_v33 = vmax.f32 %v3134_v44, 0.0  ;;  %v3132_v44 = vadd.f32 %v9750_v22, %v1384_v38  ;;  %v8435_v16 = vld [vmem:[%s9332_s20 + $0x360] sm:$0xff]  }
 0x1fe   : > { %7507 = vmatpush3.bf16.msra.mxu0 %v8361_v61  ;;  %v3682_v61 = vmax.f32 %v3175_v57, 0.0 }
 0x1ff   : > { %7529 = vmatpush3.bf16.msra.mxu1 %v8362_v63  ;;  %7508 = vmatprep.subr.bf16.mxu0 %v8363_v1  ;;  %v3714_v63 = vpack.c.bf16 %v3677_v59, %v3677_v59  ;;  %v3717_v1 = vpack.c.bf16 %v3680_v33, %v3680_v33  ;;  %v3173_v59 = vadd.f32 %v9752_v23, %v1392_v17  ;;  %v8421_v23 = vld [vmem:[%s9332_s20 + $0x300] sm:$0xff]  }
 0x200   : > { %7530 = vmatprep.subr.bf16.mxu1 %v8364_v51  ;;  %v8393_v51 = vld [vmem:[%s9332_s20 + $0x208] sm:$0xff]  }
 0x202   : > { %7509 = vmatpush3.bf16.msra.mxu0 %v8365_v2  ;;  %v3719_v2 = vpack.c.bf16 %v3682_v61, %v3682_v61  ;;  %v8419_v61 = vld [vmem:[%s9332_s20 + $0x340] sm:$0xff]  }
 0x203   : > { %7531 = vmatpush3.bf16.msra.mxu1 %v8366_v5  ;;  %7510 = vmatprep.subr.bf16.mxu0 %v8367_v7  ;;  %v8394_v5 = vld [vmem:[%s9332_s20 + $0x288] sm:$0xff]   ;;  %v8395_v7 = vld [vmem:[%s9332_s20 + $0x250] sm:$0xff]  }
 0x204   : > { %7532 = vmatprep.subr.bf16.mxu1 %v8368_v8  ;;  %v8396_v8 = vld [vmem:[%s9332_s20 + $0x2d0] sm:$0xff]  }
 0x206   : > { %7511 = vmatpush3.bf16.msra.mxu0 %v8369_v13  ;;  %v8397_v13 = vld [vmem:[%s9332_s20 + $0x210] sm:$0xff]  }
 0x207   : > { %7533 = vmatpush3.bf16.msra.mxu1 %v8370_v14  ;;  %7512 = vmatprep.subr.bf16.mxu0 %v8371_v37  ;;  %v8398_v14 = vld [vmem:[%s9332_s20 + $0x290] sm:$0xff]   ;;  %v8399_v37 = vld [vmem:[%s9332_s20 + $0x258] sm:$0xff]  }
 0x208   : > { %7534 = vmatprep.subr.bf16.mxu1 %v8372_v15  ;;  %v8400_v15 = vld [vmem:[%s9332_s20 + $0x2d8] sm:$0xff]  }
 0x20a   : > { %7513 = vmatpush3.bf16.msra.mxu0 %v8373_v40  ;;  %v8401_v40 = vld [vmem:[%s9332_s20 + $0x218] sm:$0xff]  }
 0x20b   : > { %7535 = vmatpush3.bf16.msra.mxu1 %v8374_v11  ;;  %7514 = vmatprep.subr.bf16.mxu0 %v8375_v18  ;;  %v8402_v11 = vld [vmem:[%s9332_s20 + $0x298] sm:$0xff]   ;;  %v8403_v18 = vld [vmem:[%s9332_s20 + $0x260] sm:$0xff]  }
 0x20c   : > { %v9813_v12 = vpop.f32.mrb[12].mxu0  ;;  %v9815_v36 = vpop.f32.mrb[12].mxu1  ;;  %7536 = vmatprep.subr.bf16.mxu1 %v8376_v19  ;;  %v9852_v19 = vunpack.c.h.bf16 %v9786_v10 }
 0x20d   : > { %v9818_v39 = vpop.f32.mrb[13].mxu0  ;;  %v9820_v41 = vpop.f32.mrb[13].mxu1 }
 0x20e   : > { %v3217_v47 = vpop.f32.mrb[14].mxu0  ;;  %v3258_v50 = vpop.f32.mrb[14].mxu1  ;;  %7515 = vmatpush3.bf16.msra.mxu0 %v8377_v21  ;;  %v8406_v21 = vld [vmem:[%s9332_s20 + $0x2a0] sm:$0xff]   ;;  %v1224_v10 = vrot.slane %v9852_v19, %v9590_v3  ;;  %v1228_v38 = vrot.slane %v9852_v19, %v9727_v9 }
 0x20f   : > { %7537 = vmatpush3.bf16.msra.mxu1 %v8378_v24  ;;  %v3218_v53 = vpop.f32.mrb[15].mxu0  ;;  %v3259_v43 = vpop.f32.mrb[15].mxu1  ;;  %7516 = vmatprep.subr.bf16.mxu0 %v8379_v26  ;;  %v8407_v24 = vld [vmem:[%s9332_s20 + $0x268] sm:$0xff]   ;;  %v8412_v50 = vld [vmem:[%s9332_s20 + $0x2f0] sm:$0xff]  }
 0x210   : > { %7538 = vmatprep.subr.bf16.mxu1 %v8380_v34  ;;  %v8408_v26 = vld [vmem:[%s9332_s20 + $0x2e8] sm:$0xff]   ;;  %v1232_v34 = vrot.slane %v9852_v19, %v9593_v4  ;;  %v1404_v53 = vrot.slane %v1224_v10, %v9562_v46  ;;  %v8438_v10 = vld [vmem:[%s9332_s20 + $0x3a0] sm:$0xff]  }
 0x212   : > { %7517 = vmatpush3.bf16.msra.mxu0 %v8381_v42  ;;  %v8411_v42 = vld [vmem:[%s9332_s20 + $0x270] sm:$0xff]   ;;  %v3216_v33 = vadd.f32 %v9818_v39, %v1404_v53  ;;  %v8423_v39 = vld [vmem:[%s9332_s20 + $0x348] sm:$0xff]  }
 0x213   : > { %7539 = vmatpush3.bf16.msra.mxu1 %v8382_v54  ;;  %7518 = vmatprep.subr.bf16.mxu0 %v8383_v55  ;;  %v1412_v55 = vrot.slane %v1232_v34, %v9562_v46  ;;  %v1220_v34 = vrot.slane %v9852_v19, %v9562_v46  ;;  %v8443_v53 = vld [vmem:[%s9332_s20 + $0x370] sm:$0xff]  }
 0x214   : > { %7540 = vmatprep.subr.bf16.mxu1 %v8384_v48 }
 0x215   : > { %v3257_v22 = vadd.f32 %v9820_v41, %v1412_v55  ;;  %v8424_v41 = vld [vmem:[%s9332_s20 + $0x3c8] sm:$0xff]   ;;  %v1400_v55 = vrot.slane %v1220_v34, %v9562_v46  ;;  %v8468_v34 = vld [vmem:[%s9332_s20 + $0x4e0] sm:$0xff]  }
 0x216   : > { %7519 = vmatpush3.bf16.msra.mxu0 %v8385_v49 }
 0x217   : > { %7541 = vmatpush3.bf16.msra.mxu1 %v8386_v27  ;;  %7548 = vmatprep.subr.bf16.mxu0 %v8387_v32  ;;  %v8414_v27 = vld [vmem:[%s9332_s20 + $0x2b0] sm:$0xff]   ;;  %v8416_v32 = vld [vmem:[%s9332_s20 + $0x2f8] sm:$0xff]  }
 0x218   : > { %7570 = vmatprep.subr.bf16.mxu1 %v8388_v28  ;;  %v8417_v28 = vld [vmem:[%s9332_s20 + $0x238] sm:$0xff]  }
 0x219   : > { %6161 = vmatmul.mubr.bf16.vlgmr.msra.gmra.mrb[40].mxu0 %v3712_v62  ;;  %v8420_v62 = vld [vmem:[%s9332_s20 + $0x3c0] sm:$0xff]  }
 0x21a   : > { %6201 = vmatmul.mubr.bf16.vlgmr.msra.gmra.mrb[40].mxu1 %v3714_v63  ;;  %7549 = vmatpush3.bf16.msra.mxu0 %v8389_v60  ;;  %v8418_v60 = vld [vmem:[%s9332_s20 + $0x2b8] sm:$0xff]   ;;  %v3684_v63 = vmax.f32 %v3216_v33, 0.0  ;;  %v3214_v33 = vadd.f32 %v9813_v12, %v1400_v55  ;;  %v8473_v55 = vld [vmem:[%s9332_s20 + $0x428] sm:$0xff]  }
 0x21b   : > { %6240 = vmatprep.mubr.bf16.mxu0 %v3717_v1  ;;  %7571 = vmatpush3.bf16.msra.mxu1 %v8390_v29  ;;  %v3679_v29 = vmax.f32 %v3132_v44, 0.0  ;;  %v3686_v1 = vmax.f32 %v3257_v22, 0.0  ;;  %v8449_v12 = vld [vmem:[%s9332_s20 + $0x338] sm:$0xff]  }
 0x21c   : > { %6280 = vmatprep.mubr.bf16.mxu1 %v3719_v2  ;;  %7550 = vmatprep.subr.bf16.mxu0 %v8391_v30  ;;  %v3681_v30 = vmax.f32 %v3173_v59, 0.0 }
 0x21d   : > { %7572 = vmatprep.subr.bf16.mxu1 %v8392_v0  ;;  %v8422_v0 = vld [vmem:[%s9332_s20 + $0x380] sm:$0xff]  }
 0x21e   : > { %7551 = vmatpush3.bf16.msra.mxu0 %v8393_v51  ;;  %v3716_v51 = vpack.c.bf16 %v3679_v29, %v3679_v29  ;;  %v3718_v2 = vpack.c.bf16 %v3681_v30, %v3681_v30  ;;  %v8447_v29 = vld [vmem:[%s9332_s20 + $0x378] sm:$0xff]  }
 0x21f   : > { %7573 = vmatpush3.bf16.msra.mxu1 %v8394_v5  ;;  %7552 = vmatprep.subr.bf16.mxu0 %v8395_v7  ;;  %v8425_v5 = vld [vmem:[%s9332_s20 + $0x308] sm:$0xff]   ;;  %v3721_v7 = vpack.c.bf16 %v3684_v63, %v3684_v63  ;;  %v8448_v30 = vld [vmem:[%s9332_s20 + $0x3f8] sm:$0xff]  }
 0x220   : > { %7574 = vmatprep.subr.bf16.mxu1 %v8396_v8  ;;  %v8426_v8 = vld [vmem:[%s9332_s20 + $0x388] sm:$0xff]  }
 0x222   : > { %7553 = vmatpush3.bf16.msra.mxu0 %v8397_v13  ;;  %v3723_v13 = vpack.c.bf16 %v3686_v1, %v3686_v1  ;;  %v8450_v1 = vld [vmem:[%s9332_s20 + $0x3b8] sm:$0xff]  }
 0x223   : > { %7575 = vmatpush3.bf16.msra.mxu1 %v8398_v14  ;;  %7554 = vmatprep.subr.bf16.mxu0 %v8399_v37  ;;  %v8427_v14 = vld [vmem:[%s9332_s20 + $0x350] sm:$0xff]  }
 0x224   : > { %7576 = vmatprep.subr.bf16.mxu1 %v8400_v15  ;;  %v8428_v37 = vld [vmem:[%s9332_s20 + $0x3d0] sm:$0xff]  }
 0x225   : > { %v8429_v15 = vld [vmem:[%s9332_s20 + $0x310] sm:$0xff]  }
 0x226   : > { %7555 = vmatpush3.bf16.msra.mxu0 %v8401_v40  ;;  %v8430_v40 = vld [vmem:[%s9332_s20 + $0x390] sm:$0xff]  }
 0x227   : > { %7577 = vmatpush3.bf16.msra.mxu1 %v8402_v11  ;;  %7556 = vmatprep.subr.bf16.mxu0 %v8403_v18  ;;  %v8431_v11 = vld [vmem:[%s9332_s20 + $0x358] sm:$0xff]  }
 0x228   : > { %7578 = vmatprep.subr.bf16.mxu1 %v8404_v6  ;;  %v8432_v18 = vld [vmem:[%s9332_s20 + $0x3d8] sm:$0xff]   ;;  %v9907_v6 = vld [vmem:[%s9327_s14 + $0x10] sm:$0xff] }
 0x22a   : > { %7557 = vmatpush3.bf16.msra.mxu0 %v8405_v20  ;;  %v8433_v20 = vld [vmem:[%s9332_s20 + $0x318] sm:$0xff]  }
 0x22b   : > { %7579 = vmatpush3.bf16.msra.mxu1 %v8406_v21  ;;  %7558 = vmatprep.subr.bf16.mxu0 %v8407_v24  ;;  %v8434_v21 = vld [vmem:[%s9332_s20 + $0x398] sm:$0xff]   ;;  %v8436_v24 = vld [vmem:[%s9332_s20 + $0x3e0] sm:$0xff]  }
 0x22c   : > { %v9871_v45 = vpop.f32.mrb[16].mxu0  ;;  %v9873_v47 = vpop.f32.mrb[16].mxu1  ;;  %7580 = vmatprep.subr.bf16.mxu1 %v8408_v26  ;;  %v9915_v26 = vunpack.c.l.bf16 %v9907_v6 }
 0x22d   : > { %v9878_v43 = vpop.f32.mrb[17].mxu0  ;;  %v9880_v54 = vpop.f32.mrb[17].mxu1 }
 0x22e   : > { %v3299_v56 = vpop.f32.mrb[18].mxu0  ;;  %v3340_v48 = vpop.f32.mrb[18].mxu1  ;;  %7559 = vmatpush3.bf16.msra.mxu0 %v8409_v31  ;;  %v8439_v31 = vld [vmem:[%s9332_s20 + $0x368] sm:$0xff]   ;;  %v1240_v17 = vrot.slane %v9915_v26, %v9590_v3 }
 0x22f   : > { %7581 = vmatpush3.bf16.msra.mxu1 %v8410_v35  ;;  %v3300_v49 = vpop.f32.mrb[19].mxu0  ;;  %v3341_v57 = vpop.f32.mrb[19].mxu1  ;;  %7560 = vmatprep.subr.bf16.mxu0 %v8411_v42  ;;  %v8440_v35 = vld [vmem:[%s9332_s20 + $0x3e8] sm:$0xff]   ;;  %v8444_v56 = vld [vmem:[%s9332_s20 + $0x3f0] sm:$0xff]   ;;  %v1408_v48 = vrot.slane %v1228_v38, %v9562_v46  ;;  %v8469_v38 = vld [vmem:[%s9332_s20 + $0x420] sm:$0xff]  }
 0x230   : > { %7582 = vmatprep.subr.bf16.mxu1 %v8412_v50  ;;  %v8441_v42 = vld [vmem:[%s9332_s20 + $0x328] sm:$0xff]   ;;  %v1420_v49 = vrot.slane %v1240_v17, %v9562_v46  ;;  %v1236_v17 = vrot.slane %v9915_v26, %v9562_v46 }
 0x231   : > { %v8442_v50 = vld [vmem:[%s9332_s20 + $0x3a8] sm:$0xff]  }
 0x232   : > { %7561 = vmatpush3.bf16.msra.mxu0 %v8413_v52  ;;  %v1248_v52 = vrot.slane %v9915_v26, %v9593_v4 }
 0x233   : > { %7583 = vmatpush3.bf16.msra.mxu1 %v8414_v27  ;;  %7562 = vmatprep.subr.bf16.mxu0 %v8415_v58  ;;  %v8445_v58 = vld [vmem:[%s9332_s20 + $0x330] sm:$0xff]  }
 0x234   : > { %7584 = vmatprep.subr.bf16.mxu1 %v8416_v32  ;;  %v1428_v32 = vrot.slane %v1248_v52, %v9562_v46  ;;  %v1244_v52 = vrot.slane %v9915_v26, %v9727_v9 }
 0x236   : > { %7563 = vmatpush3.bf16.msra.mxu0 %v8417_v28  ;;  %v3339_v63 = vadd.f32 %v9880_v54, %v1428_v32  ;;  %v1424_v26 = vrot.slane %v1244_v52, %v9562_v46  ;;  %v8501_v52 = vld [vmem:[%s9332_s20 + $0x520] sm:$0xff]  }
 0x237   : > { %7585 = vmatpush3.bf16.msra.mxu1 %v8418_v60  ;;  %7592 = vmatprep.subr.bf16.mxu0 %v8419_v61  ;;  %v8446_v61 = vld [vmem:[%s9332_s20 + $0x3b0] sm:$0xff]  }
 0x238   : > { %7614 = vmatprep.subr.bf16.mxu1 %v8420_v62  ;;  %v3255_v62 = vadd.f32 %v9815_v36, %v1408_v48  ;;  %v8452_v36 = vld [vmem:[%s9332_s20 + $0x4c0] sm:$0xff]   ;;  %v8474_v48 = vld [vmem:[%s9332_s20 + $0x4a8] sm:$0xff]  }
 0x239   : > { %6241 = vmatmul.mubr.bf16.vlgmr.msra.gmra.mrb[44].mxu0 %v3716_v51 }
 0x23a   : > { %6281 = vmatmul.mubr.bf16.vlgmr.msra.gmra.mrb[44].mxu1 %v3718_v2  ;;  %7593 = vmatpush3.bf16.msra.mxu0 %v8421_v23  ;;  %v3298_v23 = vadd.f32 %v9878_v43, %v1420_v49  ;;  %v3685_v51 = vmax.f32 %v3255_v62, 0.0  ;;  %v8453_v2 = vld [vmem:[%s9332_s20 + $0x400] sm:$0xff]   ;;  %v1416_v49 = vrot.slane %v1236_v17, %v9562_v46 }
 0x23b   : > { %6320 = vmatprep.mubr.bf16.mxu0 %v3721_v7  ;;  %7615 = vmatpush3.bf16.msra.mxu1 %v8422_v0  ;;  %v3683_v0 = vmax.f32 %v3214_v33, 0.0  ;;  %v8454_v43 = vld [vmem:[%s9332_s20 + $0x480] sm:$0xff]   ;;  %v8455_v7 = vld [vmem:[%s9332_s20 + $0x448] sm:$0xff]   ;;  %v8477_v33 = vld [vmem:[%s9332_s20 + $0x430] sm:$0xff]  }
 0x23c   : > { %6360 = vmatprep.mubr.bf16.mxu1 %v3723_v13  ;;  %7594 = vmatprep.subr.bf16.mxu0 %v8423_v39  ;;  %v8451_v39 = vld [vmem:[%s9332_s20 + $0x440] sm:$0xff]   ;;  %v8456_v13 = vld [vmem:[%s9332_s20 + $0x4c8] sm:$0xff]  }
 0x23d   : > { %7616 = vmatprep.subr.bf16.mxu1 %v8424_v41  ;;  %v3688_v41 = vmax.f32 %v3298_v23, 0.0  ;;  %v3720_v54 = vpack.c.bf16 %v3683_v0, %v3683_v0  ;;  %v3296_v23 = vadd.f32 %v9871_v45, %v1416_v49  ;;  %v8478_v0 = vld [vmem:[%s9332_s20 + $0x4b0] sm:$0xff]   ;;  %v8499_v17 = vld [vmem:[%s9332_s20 + $0x560] sm:$0xff]  }
 0x23e   : > { %7595 = vmatpush3.bf16.msra.mxu0 %v8425_v5  ;;  %v3690_v5 = vmax.f32 %v3339_v63, 0.0 }
 0x23f   : > { %7617 = vmatpush3.bf16.msra.mxu1 %v8426_v8  ;;  %7596 = vmatprep.subr.bf16.mxu0 %v8427_v14  ;;  %v3722_v8 = vpack.c.bf16 %v3685_v51, %v3685_v51  ;;  %v3725_v14 = vpack.c.bf16 %v3688_v41, %v3688_v41  ;;  %v3337_v51 = vadd.f32 %v9873_v47, %v1424_v26  ;;  %v8485_v47 = vld [vmem:[%s9332_s20 + $0x500] sm:$0xff]  }
 0x240   : > { %7618 = vmatprep.subr.bf16.mxu1 %v8428_v37  ;;  %v8457_v37 = vld [vmem:[%s9332_s20 + $0x408] sm:$0xff]  }
 0x242   : > { %7597 = vmatpush3.bf16.msra.mxu0 %v8429_v15  ;;  %v3727_v15 = vpack.c.bf16 %v3690_v5, %v3690_v5  ;;  %v8483_v5 = vld [vmem:[%s9332_s20 + $0x540] sm:$0xff]  }
 0x243   : > { %7619 = vmatpush3.bf16.msra.mxu1 %v8430_v40  ;;  %7598 = vmatprep.subr.bf16.mxu0 %v8431_v11  ;;  %v8458_v40 = vld [vmem:[%s9332_s20 + $0x488] sm:$0xff]   ;;  %v8459_v11 = vld [vmem:[%s9332_s20 + $0x450] sm:$0xff]  }
 0x244   : > { %7620 = vmatprep.subr.bf16.mxu1 %v8432_v18  ;;  %v8460_v18 = vld [vmem:[%s9332_s20 + $0x4d0] sm:$0xff]  }
 0x246   : > { %7599 = vmatpush3.bf16.msra.mxu0 %v8433_v20  ;;  %v8461_v20 = vld [vmem:[%s9332_s20 + $0x410] sm:$0xff]  }
 0x247   : > { %7621 = vmatpush3.bf16.msra.mxu1 %v8434_v21  ;;  %7600 = vmatprep.subr.bf16.mxu0 %v8435_v16  ;;  %v8462_v21 = vld [vmem:[%s9332_s20 + $0x490] sm:$0xff]   ;;  %v8463_v16 = vld [vmem:[%s9332_s20 + $0x458] sm:$0xff]  }
 0x248   : > { %7622 = vmatprep.subr.bf16.mxu1 %v8436_v24  ;;  %v8464_v24 = vld [vmem:[%s9332_s20 + $0x4d8] sm:$0xff]  }
 0x24a   : > { %7601 = vmatpush3.bf16.msra.mxu0 %v8437_v25  ;;  %v8465_v25 = vld [vmem:[%s9332_s20 + $0x418] sm:$0xff]  }
 0x24b   : > { %7623 = vmatpush3.bf16.msra.mxu1 %v8438_v10  ;;  %7602 = vmatprep.subr.bf16.mxu0 %v8439_v31  ;;  %v8466_v10 = vld [vmem:[%s9332_s20 + $0x498] sm:$0xff]   ;;  %v8467_v31 = vld [vmem:[%s9332_s20 + $0x460] sm:$0xff]  }
 0x24c   : > { %v9934_v19 = vpop.f32.mrb[20].mxu0  ;;  %v9936_v44 = vpop.f32.mrb[20].mxu1  ;;  %7624 = vmatprep.subr.bf16.mxu1 %v8440_v35  ;;  %v9973_v35 = vunpack.c.h.bf16 %v9907_v6 }
 0x24d   : > { %v9939_v57 = vpop.f32.mrb[21].mxu0  ;;  %v9941_v27 = vpop.f32.mrb[21].mxu1 }
 0x24e   : > { %v3381_v59 = vpop.f32.mrb[22].mxu0  ;;  %v3422_v28 = vpop.f32.mrb[22].mxu1  ;;  %7603 = vmatpush3.bf16.msra.mxu0 %v8441_v42  ;;  %v8470_v42 = vld [vmem:[%s9332_s20 + $0x4a0] sm:$0xff]   ;;  %v1256_v6 = vrot.slane %v9973_v35, %v9590_v3  ;;  %v1260_v49 = vrot.slane %v9973_v35, %v9727_v9 }
 0x24f   : > { %7625 = vmatpush3.bf16.msra.mxu1 %v8442_v50  ;;  %v3382_v60 = vpop.f32.mrb[23].mxu0  ;;  %v3423_v22 = vpop.f32.mrb[23].mxu1  ;;  %7604 = vmatprep.subr.bf16.mxu0 %v8443_v53  ;;  %v8471_v50 = vld [vmem:[%s9332_s20 + $0x468] sm:$0xff]   ;;  %v8476_v28 = vld [vmem:[%s9332_s20 + $0x4f0] sm:$0xff]  }
 0x250   : > { %7626 = vmatprep.subr.bf16.mxu1 %v8444_v56  ;;  %v8472_v53 = vld [vmem:[%s9332_s20 + $0x4e8] sm:$0xff]   ;;  %v1264_v56 = vrot.slane %v9973_v35, %v9593_v4  ;;  %v1436_v60 = vrot.slane %v1256_v6, %v9562_v46  ;;  %v8502_v6 = vld [vmem:[%s9332_s20 + $0x5a0] sm:$0xff]  }
 0x252   : > { %7605 = vmatpush3.bf16.msra.mxu0 %v8445_v58  ;;  %v8475_v58 = vld [vmem:[%s9332_s20 + $0x470] sm:$0xff]   ;;  %v3380_v41 = vadd.f32 %v9939_v57, %v1436_v60  ;;  %v8487_v57 = vld [vmem:[%s9332_s20 + $0x548] sm:$0xff]  }
 0x253   : > { %7627 = vmatpush3.bf16.msra.mxu1 %v8446_v61  ;;  %7606 = vmatprep.subr.bf16.mxu0 %v8447_v29  ;;  %v1444_v29 = vrot.slane %v1264_v56, %v9562_v46  ;;  %v1252_v56 = vrot.slane %v9973_v35, %v9562_v46  ;;  %v8507_v60 = vld [vmem:[%s9332_s20 + $0x570] sm:$0xff]  }
 0x254   : > { %7628 = vmatprep.subr.bf16.mxu1 %v8448_v30 }
 0x255   : > { %v3421_v45 = vadd.f32 %v9941_v27, %v1444_v29  ;;  %v8488_v27 = vld [vmem:[%s9332_s20 + $0x5c8] sm:$0xff]   ;;  %v1432_v29 = vrot.slane %v1252_v56, %v9562_v46  ;;  %v8532_v56 = vld [vmem:[%s9332_s20 + $0x6e0] sm:$0xff]  }
 0x256   : > { %7607 = vmatpush3.bf16.msra.mxu0 %v8449_v12 }
 0x257   : > { %7629 = vmatpush3.bf16.msra.mxu1 %v8450_v1  ;;  %7636 = vmatprep.subr.bf16.mxu0 %v8451_v39  ;;  %v8479_v1 = vld [vmem:[%s9332_s20 + $0x478] sm:$0xff]  }
 0x258   : > { %7658 = vmatprep.subr.bf16.mxu1 %v8452_v36  ;;  %v8480_v39 = vld [vmem:[%s9332_s20 + $0x4f8] sm:$0xff]  }
 0x259   : > { %6321 = vmatmul.mubr.bf16.vlgmr.msra.gmra.mrb[48].mxu0 %v3720_v54  ;;  %v8481_v36 = vld [vmem:[%s9332_s20 + $0x438] sm:$0xff]   ;;  %v8484_v54 = vld [vmem:[%s9332_s20 + $0x5c0] sm:$0xff]  }
 0x25a   : > { %6361 = vmatmul.mubr.bf16.vlgmr.msra.gmra.mrb[48].mxu1 %v3722_v8  ;;  %7637 = vmatpush3.bf16.msra.mxu0 %v8453_v2  ;;  %v8482_v2 = vld [vmem:[%s9332_s20 + $0x4b8] sm:$0xff]   ;;  %v3692_v8 = vmax.f32 %v3380_v41, 0.0  ;;  %v3378_v41 = vadd.f32 %v9934_v19, %v1432_v29 }
 0x25b   : > { %6400 = vmatprep.mubr.bf16.mxu0 %v3725_v14  ;;  %7659 = vmatpush3.bf16.msra.mxu1 %v8454_v43  ;;  %v3687_v43 = vmax.f32 %v3296_v23, 0.0  ;;  %v3694_v14 = vmax.f32 %v3421_v45, 0.0  ;;  %v8514_v19 = vld [vmem:[%s9332_s20 + $0x5b8] sm:$0xff]  }
 0x25c   : > { %6440 = vmatprep.mubr.bf16.mxu1 %v3727_v15  ;;  %7638 = vmatprep.subr.bf16.mxu0 %v8455_v7  ;;  %v3689_v7 = vmax.f32 %v3337_v51, 0.0 }
 0x25d   : > { %7660 = vmatprep.subr.bf16.mxu1 %v8456_v13  ;;  %v8486_v13 = vld [vmem:[%s9332_s20 + $0x580] sm:$0xff]  }
 0x25e   : > { %7639 = vmatpush3.bf16.msra.mxu0 %v8457_v37  ;;  %v3724_v37 = vpack.c.bf16 %v3687_v43, %v3687_v43  ;;  %v3726_v15 = vpack.c.bf16 %v3689_v7, %v3689_v7  ;;  %v8511_v43 = vld [vmem:[%s9332_s20 + $0x578] sm:$0xff]  }
 0x25f   : > { %7661 = vmatpush3.bf16.msra.mxu1 %v8458_v40  ;;  %7640 = vmatprep.subr.bf16.mxu0 %v8459_v11  ;;  %v8489_v40 = vld [vmem:[%s9332_s20 + $0x508] sm:$0xff]   ;;  %v3729_v11 = vpack.c.bf16 %v3692_v8, %v3692_v8  ;;  %v8512_v7 = vld [vmem:[%s9332_s20 + $0x5f8] sm:$0xff]  }
 0x260   : > { %7662 = vmatprep.subr.bf16.mxu1 %v8460_v18  ;;  %v8490_v18 = vld [vmem:[%s9332_s20 + $0x588] sm:$0xff]  }
 0x262   : > { %7641 = vmatpush3.bf16.msra.mxu0 %v8461_v20  ;;  %v3731_v20 = vpack.c.bf16 %v3694_v14, %v3694_v14  ;;  %v3691_v14 = vmax.f32 %v3378_v41, 0.0 }
 0x263   : > { %7663 = vmatpush3.bf16.msra.mxu1 %v8462_v21  ;;  %7642 = vmatprep.subr.bf16.mxu0 %v8463_v16  ;;  %v8491_v21 = vld [vmem:[%s9332_s20 + $0x550] sm:$0xff]  }
 0x264   : > { %7664 = vmatprep.subr.bf16.mxu1 %v8464_v24  ;;  %v8492_v16 = vld [vmem:[%s9332_s20 + $0x5d0] sm:$0xff]  }
 0x265   : > { %v8493_v24 = vld [vmem:[%s9332_s20 + $0x510] sm:$0xff]  }
 0x266   : > { %7643 = vmatpush3.bf16.msra.mxu0 %v8465_v25  ;;  %v8494_v25 = vld [vmem:[%s9332_s20 + $0x590] sm:$0xff]  }
 0x267   : > { %7665 = vmatpush3.bf16.msra.mxu1 %v8466_v10  ;;  %7644 = vmatprep.subr.bf16.mxu0 %v8467_v31  ;;  %v8495_v10 = vld [vmem:[%s9332_s20 + $0x558] sm:$0xff]  }
 0x268   : > { %7666 = vmatprep.subr.bf16.mxu1 %v8468_v34  ;;  %v8496_v31 = vld [vmem:[%s9332_s20 + $0x5d8] sm:$0xff]  }
 0x269   : > { %v10028_v34 = vld [vmem:[%s9327_s14 + $0x18] sm:$0xff] }
 0x26a   : > { %7645 = vmatpush3.bf16.msra.mxu0 %v8469_v38  ;;  %v8497_v38 = vld [vmem:[%s9332_s20 + $0x518] sm:$0xff]  }
 0x26b   : > { %7667 = vmatpush3.bf16.msra.mxu1 %v8470_v42  ;;  %7646 = vmatprep.subr.bf16.mxu0 %v8471_v50  ;;  %v8498_v42 = vld [vmem:[%s9332_s20 + $0x598] sm:$0xff]   ;;  %v8500_v50 = vld [vmem:[%s9332_s20 + $0x5e0] sm:$0xff]  }
 0x26c   : > { %v9992_v32 = vpop.f32.mrb[24].mxu0  ;;  %v9994_v59 = vpop.f32.mrb[24].mxu1  ;;  %7668 = vmatprep.subr.bf16.mxu1 %v8472_v53  ;;  %v10036_v53 = vunpack.c.l.bf16 %v10028_v34 }
 0x26d   : > { %v9999_v22 = vpop.f32.mrb[25].mxu0  ;;  %v10001_v61 = vpop.f32.mrb[25].mxu1 }
 0x26e   : > { %v3463_v62 = vpop.f32.mrb[26].mxu0  ;;  %v3504_v30 = vpop.f32.mrb[26].mxu1  ;;  %7647 = vmatpush3.bf16.msra.mxu0 %v8473_v55  ;;  %v8503_v55 = vld [vmem:[%s9332_s20 + $0x568] sm:$0xff]   ;;  %v1272_v26 = vrot.slane %v10036_v53, %v9590_v3 }
 0x26f   : > { %7669 = vmatpush3.bf16.msra.mxu1 %v8474_v48  ;;  %v3464_v63 = vpop.f32.mrb[27].mxu0  ;;  %v3505_v12 = vpop.f32.mrb[27].mxu1  ;;  %7648 = vmatprep.subr.bf16.mxu0 %v8475_v58  ;;  %v8504_v48 = vld [vmem:[%s9332_s20 + $0x5e8] sm:$0xff]   ;;  %v8508_v62 = vld [vmem:[%s9332_s20 + $0x5f0] sm:$0xff]   ;;  %v1440_v30 = vrot.slane %v1260_v49, %v9562_v46  ;;  %v8533_v49 = vld [vmem:[%s9332_s20 + $0x620] sm:$0xff]  }
 0x270   : > { %7670 = vmatprep.subr.bf16.mxu1 %v8476_v28  ;;  %v8505_v58 = vld [vmem:[%s9332_s20 + $0x528] sm:$0xff]   ;;  %v1452_v63 = vrot.slane %v1272_v26, %v9562_v46  ;;  %v8534_v26 = vld [vmem:[%s9332_s20 + $0x6a0] sm:$0xff]  }
 0x271   : > { %v8506_v28 = vld [vmem:[%s9332_s20 + $0x5a8] sm:$0xff]  }
 0x272   : > { %7649 = vmatpush3.bf16.msra.mxu0 %v8477_v33  ;;  %v1280_v33 = vrot.slane %v10036_v53, %v9593_v4  ;;  %v3462_v8 = vadd.f32 %v9999_v22, %v1452_v63  ;;  %v8518_v22 = vld [vmem:[%s9332_s20 + $0x680] sm:$0xff]   ;;  %v8538_v63 = vld [vmem:[%s9332_s20 + $0x6a8] sm:$0xff]  }
 0x273   : > { %7671 = vmatpush3.bf16.msra.mxu1 %v8478_v0  ;;  %7650 = vmatprep.subr.bf16.mxu0 %v8479_v1  ;;  %v8509_v1 = vld [vmem:[%s9332_s20 + $0x530] sm:$0xff]  }
 0x274   : > { %7672 = vmatprep.subr.bf16.mxu1 %v8480_v39  ;;  %v1460_v39 = vrot.slane %v1280_v33, %v9562_v46  ;;  %v1276_v33 = vrot.slane %v10036_v53, %v9727_v9 }
 0x276   : > { %7651 = vmatpush3.bf16.msra.mxu0 %v8481_v36 }
 0x277   : > { %7673 = vmatpush3.bf16.msra.mxu1 %v8482_v2  ;;  %7680 = vmatprep.subr.bf16.mxu0 %v8483_v5  ;;  %v8510_v5 = vld [vmem:[%s9332_s20 + $0x5b0] sm:$0xff]  }
 0x278   : > { %7702 = vmatprep.subr.bf16.mxu1 %v8484_v54  ;;  %v3419_v54 = vadd.f32 %v9936_v44, %v1440_v30  ;;  %v8516_v44 = vld [vmem:[%s9332_s20 + $0x6c0] sm:$0xff]  }
 0x279   : > { %6401 = vmatmul.mubr.bf16.vlgmr.msra.gmra.mrb[52].mxu0 %v3724_v37 }
 0x27a   : > { %6441 = vmatmul.mubr.bf16.vlgmr.msra.gmra.mrb[52].mxu1 %v3726_v15  ;;  %7681 = vmatpush3.bf16.msra.mxu0 %v8485_v47  ;;  %v8513_v47 = vld [vmem:[%s9332_s20 + $0x538] sm:$0xff]   ;;  %v3693_v37 = vmax.f32 %v3419_v54, 0.0  ;;  %v8517_v15 = vld [vmem:[%s9332_s20 + $0x600] sm:$0xff]  }
 0x27b   : > { %6480 = vmatprep.mubr.bf16.mxu0 %v3729_v11  ;;  %7703 = vmatpush3.bf16.msra.mxu1 %v8486_v13  ;;  %v3503_v13 = vadd.f32 %v10001_v61, %v1460_v39  ;;  %v3728_v11 = vpack.c.bf16 %v3691_v14, %v3691_v14  ;;  %v8519_v61 = vld [vmem:[%s9332_s20 + $0x648] sm:$0xff]   ;;  %v8543_v14 = vld [vmem:[%s9332_s20 + $0x678] sm:$0xff]  }
 0x27c   : > { %6520 = vmatprep.mubr.bf16.mxu1 %v3731_v20  ;;  %7682 = vmatprep.subr.bf16.mxu0 %v8487_v57  ;;  %v8515_v57 = vld [vmem:[%s9332_s20 + $0x640] sm:$0xff]   ;;  %v8520_v20 = vld [vmem:[%s9332_s20 + $0x6c8] sm:$0xff]  }
 0x27d   : > { %7704 = vmatprep.subr.bf16.mxu1 %v8488_v27  ;;  %v3696_v27 = vmax.f32 %v3462_v8, 0.0 }
 0x27e   : > { %7683 = vmatpush3.bf16.msra.mxu0 %v8489_v40  ;;  %v3698_v40 = vmax.f32 %v3503_v13, 0.0 }
 0x27f   : > { %7705 = vmatpush3.bf16.msra.mxu1 %v8490_v18  ;;  %7684 = vmatprep.subr.bf16.mxu0 %v8491_v21  ;;  %v3730_v18 = vpack.c.bf16 %v3693_v37, %v3693_v37  ;;  %v3733_v21 = vpack.c.bf16 %v3696_v27, %v3696_v27  ;;  %v8544_v37 = vld [vmem:[%s9332_s20 + $0x6f8] sm:$0xff]  }
 0x280   : > { %7706 = vmatprep.subr.bf16.mxu1 %v8492_v16  ;;  %v8521_v16 = vld [vmem:[%s9332_s20 + $0x608] sm:$0xff]  }
 0x282   : > { %7685 = vmatpush3.bf16.msra.mxu0 %v8493_v24  ;;  %v3735_v24 = vpack.c.bf16 %v3698_v40, %v3698_v40  ;;  %v8546_v40 = vld [vmem:[%s9332_s20 + $0x6b8] sm:$0xff]  }
 0x283   : > { %7707 = vmatpush3.bf16.msra.mxu1 %v8494_v25  ;;  %7686 = vmatprep.subr.bf16.mxu0 %v8495_v10  ;;  %v8522_v25 = vld [vmem:[%s9332_s20 + $0x688] sm:$0xff]   ;;  %v8523_v10 = vld [vmem:[%s9332_s20 + $0x650] sm:$0xff]  }
 0x284   : > { %7708 = vmatprep.subr.bf16.mxu1 %v8496_v31  ;;  %v8524_v31 = vld [vmem:[%s9332_s20 + $0x6d0] sm:$0xff]  }
 0x286   : > { %7687 = vmatpush3.bf16.msra.mxu0 %v8497_v38  ;;  %v8525_v38 = vld [vmem:[%s9332_s20 + $0x610] sm:$0xff]  }
 0x287   : > { %7709 = vmatpush3.bf16.msra.mxu1 %v8498_v42  ;;  %7688 = vmatprep.subr.bf16.mxu0 %v8499_v17  ;;  %v8526_v42 = vld [vmem:[%s9332_s20 + $0x690] sm:$0xff]   ;;  %v8527_v17 = vld [vmem:[%s9332_s20 + $0x658] sm:$0xff]  }
 0x288   : > { %7710 = vmatprep.subr.bf16.mxu1 %v8500_v50  ;;  %v8528_v50 = vld [vmem:[%s9332_s20 + $0x6d8] sm:$0xff]  }
 0x28a   : > { %7689 = vmatpush3.bf16.msra.mxu0 %v8501_v52  ;;  %v8529_v52 = vld [vmem:[%s9332_s20 + $0x618] sm:$0xff]  }
 0x28b   : > { %7711 = vmatpush3.bf16.msra.mxu1 %v8502_v6  ;;  %7690 = vmatprep.subr.bf16.mxu0 %v8503_v55  ;;  %v8530_v6 = vld [vmem:[%s9332_s20 + $0x698] sm:$0xff]   ;;  %v8531_v55 = vld [vmem:[%s9332_s20 + $0x660] sm:$0xff]  }
 0x28c   : > { %v10055_v35 = vpop.f32.mrb[28].mxu0  ;;  %v10057_v23 = vpop.f32.mrb[28].mxu1  ;;  %7712 = vmatprep.subr.bf16.mxu1 %v8504_v48  ;;  %v10094_v48 = vunpack.c.h.bf16 %v10028_v34 }
 0x28d   : > { %v10060_v12 = vpop.f32.mrb[29].mxu0  ;;  %v10062_v0 = vpop.f32.mrb[29].mxu1 }
 0x28e   : > { %v3545_v51 = vpop.f32.mrb[30].mxu0  ;;  %v3586_v36 = vpop.f32.mrb[30].mxu1  ;;  %7691 = vmatpush3.bf16.msra.mxu0 %v8505_v58  ;;  %v1268_v58 = vrot.slane %v10036_v53, %v9562_v46  ;;  %v1288_v34 = vrot.slane %v10094_v48, %v9590_v3  ;;  %v1296_v29 = vrot.slane %v10094_v48, %v9593_v4  ;;  %v1456_v53 = vrot.slane %v1276_v33, %v9562_v46 }
 0x28f   : > { %7713 = vmatpush3.bf16.msra.mxu1 %v8506_v28  ;;  %v3546_v2 = vpop.f32.mrb[31].mxu0  ;;  %v3587_v45 = vpop.f32.mrb[31].mxu1  ;;  %7692 = vmatprep.subr.bf16.mxu0 %v8507_v60  ;;  %v8535_v28 = vld [vmem:[%s9332_s20 + $0x668] sm:$0xff]   ;;  %v8540_v36 = vld [vmem:[%s9332_s20 + $0x6f0] sm:$0xff]  }
 0x290   : > { %7714 = vmatprep.subr.bf16.mxu1 %v8508_v62  ;;  %v8536_v60 = vld [vmem:[%s9332_s20 + $0x6e8] sm:$0xff]   ;;  %v1448_v30 = vrot.slane %v1268_v58, %v9562_v46  ;;  %v1468_v41 = vrot.slane %v1288_v34, %v9562_v46  ;;  %v8562_v58 = vld [vmem:[%s9332_s20 + $0x798] sm:$0xff]   ;;  %v1284_v34 = vrot.slane %v10094_v48, %v9562_v46 }
 0x291   : > { %v8537_v62 = vld [vmem:[%s9332_s20 + $0x628] sm:$0xff]  }
 0x292   : > { %7693 = vmatpush3.bf16.msra.mxu0 %v8509_v1  ;;  %v8539_v1 = vld [vmem:[%s9332_s20 + $0x670] sm:$0xff]  }
 0x293   : > { %7715 = vmatpush3.bf16.msra.mxu1 %v8510_v5  ;;  %7694 = vmatprep.subr.bf16.mxu0 %v8511_v43  ;;  %v1476_v5 = vrot.slane %v1296_v29, %v9562_v46  ;;  %v8566_v29 = vld [vmem:[%s9332_s20 + $0x7a0] sm:$0xff]  }
 0x294   : > { %7716 = vmatprep.subr.bf16.mxu1 %v8512_v7  ;;  %v8541_v7 = vld [vmem:[%s9332_s20 + $0x630] sm:$0xff]  }
 0x295   : > { %v3585_v27 = vadd.f32 %v10062_v0, %v1476_v5  ;;  %v8550_v0 = vld [vmem:[%s9332_s20 + $0x780] sm:$0xff]   ;;  %v8570_v5 = vld [vmem:[%s9332_s20 + $0x7a8] sm:$0xff]  }
 0x296   : > { %7695 = vmatpush3.bf16.msra.mxu0 %v8513_v47  ;;  %v3460_v47 = vadd.f32 %v9992_v32, %v1448_v30  ;;  %v8545_v32 = vld [vmem:[%s9332_s20 + $0x638] sm:$0xff]   ;;  %v1292_v30 = vrot.slane %v10094_v48, %v9727_v9 }
 0x297   : > { %7717 = vmatpush3.bf16.msra.mxu1 %v8514_v19  ;;  %7724 = vmatprep.subr.bf16.mxu0 %v8515_v57  ;;  %v8542_v19 = vld [vmem:[%s9332_s20 + $0x6b0] sm:$0xff]   ;;  %v3501_v57 = vadd.f32 %v9994_v59, %v1456_v53  ;;  %v8548_v59 = vld [vmem:[%s9332_s20 + $0x7c0] sm:$0xff]  }
 0x298   : > { %7746 = vmatprep.subr.bf16.mxu1 %v8516_v44  ;;  %v3544_v44 = vadd.f32 %v10060_v12, %v1468_v41  ;;  %v8549_v12 = vld [vmem:[%s9332_s20 + $0x700] sm:$0xff]   ;;  %v1464_v41 = vrot.slane %v1284_v34, %v9562_v46  ;;  %v8594_v34 = vld [vmem:[%s9332_s20 + $0x898] sm:$0xff]  }
 0x299   : > { %6481 = vmatmul.mubr.bf16.vlgmr.msra.gmra.mrb[56].mxu0 %v3728_v11  ;;  %v3697_v11 = vmax.f32 %v3501_v57, 0.0  ;;  %v8573_v57 = vld [vmem:[%s9332_s20 + $0x730] sm:$0xff]  }
 0x29a   : > { %6521 = vmatmul.mubr.bf16.vlgmr.msra.gmra.mrb[56].mxu1 %v3730_v18  ;;  %7725 = vmatpush3.bf16.msra.mxu0 %v8517_v15  ;;  %v3695_v15 = vmax.f32 %v3460_v47, 0.0  ;;  %v3702_v18 = vmax.f32 %v3585_v27, 0.0 }
 0x29b   : > { %6560 = vmatprep.mubr.bf16.mxu0 %v3733_v21  ;;  %7747 = vmatpush3.bf16.msra.mxu1 %v8518_v22  ;;  %v8547_v22 = vld [vmem:[%s9332_s20 + $0x740] sm:$0xff]   ;;  %v3734_v21 = vpack.c.bf16 %v3697_v11, %v3697_v11 }
 0x29c   : > { %6600 = vmatprep.mubr.bf16.mxu1 %v3735_v24  ;;  %7726 = vmatprep.subr.bf16.mxu0 %v8519_v61  ;;  %v3700_v61 = vmax.f32 %v3544_v44, 0.0 }
 0x29d   : > { %7748 = vmatprep.subr.bf16.mxu1 %v8520_v20  ;;  %v3732_v20 = vpack.c.bf16 %v3695_v15, %v3695_v15  ;;  %v8574_v15 = vld [vmem:[%s9332_s20 + $0x7b0] sm:$0xff]  }
 0x29e   : > { %7727 = vmatpush3.bf16.msra.mxu0 %v8521_v16  ;;  %v8551_v16 = vld [vmem:[%s9332_s20 + $0x748] sm:$0xff]   ;;  %v3737_v24 = vpack.c.bf16 %v3700_v61, %v3700_v61 }
 0x29f   : > { %7749 = vmatpush3.bf16.msra.mxu1 %v8522_v25  ;;  %7728 = vmatprep.subr.bf16.mxu0 %v8523_v10  ;;  %v8552_v25 = vld [vmem:[%s9332_s20 + $0x7c8] sm:$0xff]   ;;  %v3739_v10 = vpack.c.bf16 %v3702_v18, %v3702_v18 }
 0x2a0   : > { %7750 = vmatprep.subr.bf16.mxu1 %v8524_v31  ;;  %v8553_v31 = vld [vmem:[%s9332_s20 + $0x708] sm:$0xff]  }
 0x2a2   : > { %7729 = vmatpush3.bf16.msra.mxu0 %v8525_v38  ;;  %v8554_v38 = vld [vmem:[%s9332_s20 + $0x788] sm:$0xff]  }
 0x2a3   : > { %7751 = vmatpush3.bf16.msra.mxu1 %v8526_v42  ;;  %7730 = vmatprep.subr.bf16.mxu0 %v8527_v17  ;;  %v8555_v42 = vld [vmem:[%s9332_s20 + $0x750] sm:$0xff]  }
 0x2a4   : > { %7752 = vmatprep.subr.bf16.mxu1 %v8528_v50  ;;  %v8556_v17 = vld [vmem:[%s9332_s20 + $0x7d0] sm:$0xff]  }
 0x2a5   : > { %v8557_v50 = vld [vmem:[%s9332_s20 + $0x710] sm:$0xff]  }
 0x2a6   : > { %7731 = vmatpush3.bf16.msra.mxu0 %v8529_v52  ;;  %v8558_v52 = vld [vmem:[%s9332_s20 + $0x790] sm:$0xff]  }
 0x2a7   : > { %7753 = vmatpush3.bf16.msra.mxu1 %v8530_v6  ;;  %7732 = vmatprep.subr.bf16.mxu0 %v8531_v55  ;;  %v8559_v6 = vld [vmem:[%s9332_s20 + $0x758] sm:$0xff]  }
 0x2a8   : > { %7754 = vmatprep.subr.bf16.mxu1 %v8532_v56  ;;  %v8560_v55 = vld [vmem:[%s9332_s20 + $0x7d8] sm:$0xff]   ;;  %v1150_v56 = vld [vmem:[%s9327_s14 + $0x20] sm:$0xf] }
 0x2a9   : > { %v10153_v33 = vunpack.c.l.bf16 %v1150_v56  ;;  %v8588_v56 = vld [vmem:[%s9332_s20 + $0x8d0] sm:$0xff]  }
 0x2aa   : > { %7733 = vmatpush3.bf16.msra.mxu0 %v8533_v49  ;;  %v8561_v49 = vld [vmem:[%s9332_s20 + $0x718] sm:$0xff]  }
 0x2ab   : > { %7755 = vmatpush3.bf16.msra.mxu1 %v8534_v26  ;;  %7734 = vmatprep.subr.bf16.mxu0 %v8535_v28  ;;  %v8563_v26 = vld [vmem:[%s9332_s20 + $0x760] sm:$0xff]   ;;  %v1312_v53 = vrot.slane %v10153_v33, %v9593_v4 }
 0x2ac   : > { %v10113_v39 = vpop.f32.mrb[32].mxu0  ;;  %v10115_v51 = vpop.f32.mrb[32].mxu1  ;;  %7756 = vmatprep.subr.bf16.mxu1 %v8536_v60  ;;  %v8564_v28 = vld [vmem:[%s9332_s20 + $0x7e0] sm:$0xff]  }
 0x2ad   : > { %v10119_v2 = vpop.f32.mrb[33].mxu0  ;;  %v10121_v45 = vpop.f32.mrb[33].mxu1  ;;  %v8565_v60 = vld [vmem:[%s9332_s20 + $0x720] sm:$0xff]  }
 0x2ae   : > { %v3627_v43 = vpop.f32.mrb[34].mxu0  ;;  %v3668_v54 = vpop.f32.mrb[34].mxu1  ;;  %7735 = vmatpush3.bf16.msra.mxu0 %v8537_v62  ;;  %v8567_v62 = vld [vmem:[%s9332_s20 + $0x768] sm:$0xff]  }
 0x2af   : > { %7757 = vmatpush3.bf16.msra.mxu1 %v8538_v63  ;;  %v3628_v8 = vpop.f32.mrb[35].mxu0  ;;  %v3669_v13 = vpop.f32.mrb[35].mxu1  ;;  %7736 = vmatprep.subr.bf16.mxu0 %v8539_v1  ;;  %v8568_v63 = vld [vmem:[%s9332_s20 + $0x7e8] sm:$0xff]   ;;  %v1304_v1 = vrot.slane %v10153_v33, %v9590_v3  ;;  %v8571_v43 = vld [vmem:[%s9332_s20 + $0x770] sm:$0xff]   ;;  %v1472_v54 = vrot.slane %v1292_v30, %v9562_v46  ;;  %v8597_v30 = vld [vmem:[%s9332_s20 + $0x820] sm:$0xff]  }
 0x2b0   : > { %7758 = vmatprep.subr.bf16.mxu1 %v8540_v36  ;;  %v8569_v36 = vld [vmem:[%s9332_s20 + $0x728] sm:$0xff]   ;;  %v1492_v8 = vrot.slane %v1312_v53, %v9562_v46 }
 0x2b1   : > { %v1484_v3 = vrot.slane %v1304_v1, %v9562_v46  ;;  %v8598_v1 = vld [vmem:[%s9332_s20 + $0x8a0] sm:$0xff]   ;;  %v8599_v53 = vld [vmem:[%s9332_s20 + $0x868] sm:$0xff]  }
 0x2b2   : > { %7737 = vmatpush3.bf16.msra.mxu0 %v8541_v7  ;;  %v8572_v7 = vld [vmem:[%s9332_s20 + $0x7f0] sm:$0xff]   ;;  %v3667_v18 = vadd.f32 %v10121_v45, %v1492_v8  ;;  %v8582_v45 = vld [vmem:[%s9332_s20 + $0x880] sm:$0xff]  }
 0x2b3   : > { %7759 = vmatpush3.bf16.msra.mxu1 %v8542_v19  ;;  %7738 = vmatprep.subr.bf16.mxu0 %v8543_v14  ;;  %v3626_v61 = vadd.f32 %v10119_v2, %v1484_v3 }
 0x2b4   : > { %7760 = vmatprep.subr.bf16.mxu1 %v8544_v37  ;;  %v3542_v37 = vadd.f32 %v10055_v35, %v1464_v41  ;;  %v3706_v2 = vmax.f32 %v3667_v18, 0.0  ;;  %v8600_v41 = vld [vmem:[%s9332_s20 + $0x8e8] sm:$0xff]  }
 0x2b6   : > { %7739 = vmatpush3.bf16.msra.mxu0 %v8545_v32 }
 0x2b7   : > { %7761 = vmatpush3.bf16.msra.mxu1 %v8546_v40  ;;  %7768 = vmatprep.subr.bf16.mxu0 %v8547_v22  ;;  %v8575_v40 = vld [vmem:[%s9332_s20 + $0x778] sm:$0xff]   ;;  %v3583_v22 = vadd.f32 %v10057_v23, %v1472_v54  ;;  %v8579_v23 = vld [vmem:[%s9332_s20 + $0x840] sm:$0xff]   ;;  %v8602_v54 = vld [vmem:[%s9332_s20 + $0x8a8] sm:$0xff]  }
 0x2b8   : > { %7790 = vmatprep.subr.bf16.mxu1 %v8548_v59  ;;  %v8576_v59 = vld [vmem:[%s9332_s20 + $0x7f8] sm:$0xff]  }
 0x2b9   : > { %6561 = vmatmul.mubr.bf16.vlgmr.msra.gmra.mrb[60].mxu0 %v3732_v20  ;;  %v3699_v20 = vmax.f32 %v3542_v37, 0.0 }
 0x2ba   : > { %6601 = vmatmul.mubr.bf16.vlgmr.msra.gmra.mrb[60].mxu1 %v3734_v21  ;;  %7769 = vmatpush3.bf16.msra.mxu0 %v8549_v12  ;;  %v8577_v12 = vld [vmem:[%s9332_s20 + $0x738] sm:$0xff]   ;;  %v3701_v21 = vmax.f32 %v3583_v22, 0.0 }
 0x2bb   : > { %6640 = vmatprep.mubr.bf16.mxu0 %v3737_v24  ;;  %7791 = vmatpush3.bf16.msra.mxu1 %v8550_v0  ;;  %v8578_v0 = vld [vmem:[%s9332_s20 + $0x7b8] sm:$0xff]   ;;  %v3704_v24 = vmax.f32 %v3626_v61, 0.0 }
 0x2bc   : > { %6680 = vmatprep.mubr.bf16.mxu1 %v3739_v10  ;;  %7770 = vmatprep.subr.bf16.mxu0 %v8551_v16  ;;  %v8580_v16 = vld [vmem:[%s9332_s20 + $0x8c0] sm:$0xff]   ;;  %v3736_v10 = vpack.c.bf16 %v3699_v20, %v3699_v20  ;;  %v8608_v22 = vld [vmem:[%s9332_s20 + $0x8f8] sm:$0xff]  }
 0x2bd   : > { %7792 = vmatprep.subr.bf16.mxu1 %v8552_v25  ;;  %v8581_v25 = vld [vmem:[%s9332_s20 + $0x800] sm:$0xff]  }
 0x2be   : > { %7771 = vmatpush3.bf16.msra.mxu0 %v8553_v31  ;;  %v3738_v31 = vpack.c.bf16 %v3701_v21, %v3701_v21 }
 0x2bf   : > { %7793 = vmatpush3.bf16.msra.mxu1 %v8554_v38  ;;  %7772 = vmatprep.subr.bf16.mxu0 %v8555_v42  ;;  %v8583_v38 = vld [vmem:[%s9332_s20 + $0x848] sm:$0xff]   ;;  %v3741_v42 = vpack.c.bf16 %v3704_v24, %v3704_v24 }
 0x2c0   : > { %7794 = vmatprep.subr.bf16.mxu1 %v8556_v17  ;;  %v8584_v17 = vld [vmem:[%s9332_s20 + $0x8c8] sm:$0xff]  }
 0x2c2   : > { %7773 = vmatpush3.bf16.msra.mxu0 %v8557_v50  ;;  %v3743_v50 = vpack.c.bf16 %v3706_v2, %v3706_v2 }
 0x2c3   : > { %7795 = vmatpush3.bf16.msra.mxu1 %v8558_v52  ;;  %7774 = vmatprep.subr.bf16.mxu0 %v8559_v6  ;;  %v8585_v52 = vld [vmem:[%s9332_s20 + $0x808] sm:$0xff]  }
 0x2c4   : > { %7796 = vmatprep.subr.bf16.mxu1 %v8560_v55  ;;  %v8586_v6 = vld [vmem:[%s9332_s20 + $0x888] sm:$0xff]   ;;  %v8587_v55 = vld [vmem:[%s9332_s20 + $0x850] sm:$0xff]  }
 0x2c6   : > { %7775 = vmatpush3.bf16.msra.mxu0 %v8561_v49  ;;  %v8589_v49 = vld [vmem:[%s9332_s20 + $0x810] sm:$0xff]  }
 0x2c7   : > { %7797 = vmatpush3.bf16.msra.mxu1 %v8562_v58  ;;  %7776 = vmatprep.subr.bf16.mxu0 %v8563_v26  ;;  %v8590_v58 = vld [vmem:[%s9332_s20 + $0x890] sm:$0xff]   ;;  %v8591_v26 = vld [vmem:[%s9332_s20 + $0x858] sm:$0xff]  }
 0x2c8   : > { %7798 = vmatprep.subr.bf16.mxu1 %v8564_v28  ;;  %v8592_v28 = vld [vmem:[%s9332_s20 + $0x8d8] sm:$0xff]  }
 0x2ca   : > { %7777 = vmatpush3.bf16.msra.mxu0 %v8565_v60  ;;  %v8593_v60 = vld [vmem:[%s9332_s20 + $0x818] sm:$0xff]  }
 0x2cb   : > { %7799 = vmatpush3.bf16.msra.mxu1 %v8566_v29  ;;  %7778 = vmatprep.subr.bf16.mxu0 %v8567_v62  ;;  %v8595_v29 = vld [vmem:[%s9332_s20 + $0x860] sm:$0xff]  }
 0x2cc   : > { %v7476_v48 = vpop.f32.mrb[36].mxu0  ;;  %7800 = vmatprep.subr.bf16.mxu1 %v8568_v63  ;;  %v8596_v62 = vld [vmem:[%s9332_s20 + $0x8e0] sm:$0xff]   ;;  %v1300_v63 = vrot.slane %v10153_v33, %v9562_v46 }
 0x2cd   : > { %v7498_v47 = vpop.f32.mrb[36].mxu1  ;;  %v7477_v4 = vpop.f32.mrb[37].mxu0 }
 0x2ce   : > { %v7478_v13 = vadd.f32 %v7477_v4, %v7476_v48  ;;  %v7499_v19 = vpop.f32.mrb[37].mxu1  ;;  %v7479_v14 = vpop.f32.mrb[38].mxu0  ;;  %7779 = vmatpush3.bf16.msra.mxu0 %v8569_v36  ;;  %v1308_v36 = vrot.slane %v10153_v33, %v9727_v9  ;;  %v8603_v48 = vld [vmem:[%s9332_s20 + $0x870] sm:$0xff]  }
 0x2cf   : > { %v7500_v44 = vadd.f32 %v7499_v19, %v7498_v47  ;;  %v7501_v27 = vpop.f32.mrb[38].mxu1  ;;  %7801 = vmatpush3.bf16.msra.mxu1 %v8570_v5  ;;  %v7480_v32 = vpop.f32.mrb[39].mxu0  ;;  %7780 = vmatprep.subr.bf16.mxu0 %v8571_v43  ;;  %v8601_v5 = vld [vmem:[%s9332_s20 + $0x828] sm:$0xff]   ;;  %v1480_v43 = vrot.slane %v1300_v63, %v9562_v46  ;;  %v8604_v47 = vld [vmem:[%s9332_s20 + $0x8f0] sm:$0xff]  }
 0x2d0   : > { %v7502_v11 = vpop.f32.mrb[39].mxu1  ;;  %7802 = vmatprep.subr.bf16.mxu1 %v8572_v7  ;;  %v1488_v7 = vrot.slane %v1308_v36, %v9562_v46  ;;  %v8605_v19 = vld [vmem:[%s9332_s20 + $0x830] sm:$0xff]   ;;  %v8607_v27 = vld [vmem:[%s9332_s20 + $0x878] sm:$0xff]  }
 0x2d1   : > { %v10182_v35 = vadd.f32 %v7500_v44, %v7478_v13  ;;  %v3624_v14 = vadd.f32 %v10113_v39, %v1480_v43  ;;  %v8606_v44 = vld [vmem:[%s9332_s20 + $0x8b0] sm:$0xff]   ;;  %v8610_v39 = vld [vmem:[%s9332_s20 + $0x8b8] sm:$0xff]  }
 0x2d2   : > { %7781 = vmatpush3.bf16.msra.mxu0 %v8573_v57  ;;  %v3665_v32 = vadd.f32 %v10115_v51, %v1488_v7 }
 0x2d3   : > { %7803 = vmatpush3.bf16.msra.mxu1 %v8574_v15  ;;  %7782 = vmatprep.subr.bf16.mxu0 %v8575_v40  ;;  %v3703_v61 = vmax.f32 %v3624_v14, 0.0 }
 0x2d4   : > { %7804 = vmatprep.subr.bf16.mxu1 %v8576_v59  ;;  %v8609_v59 = vld [vmem:[%s9332_s20 + $0x838] sm:$0xff]   ;;  %v3705_v18 = vmax.f32 %v3665_v32, 0.0 }
 0x2d6   : > { %7783 = vmatpush3.bf16.msra.mxu0 %v8577_v12  ;;  %v3740_v12 = vpack.c.bf16 %v3703_v61, %v3703_v61  ;;  %v3742_v20 = vpack.c.bf16 %v3705_v18, %v3705_v18 }
 0x2d7   : > { %7805 = vmatpush3.bf16.msra.mxu1 %v8578_v0  ;;  %7812 = vmatprep.subr.bf16.mxu0 %v8579_v23 }
 0x2d8   : > { %7834 = vmatprep.subr.bf16.mxu1 %v8580_v16 }
 0x2d9   : > { %6641 = vmatmul.mubr.bf16.vlgmr.msra.gmra.mrb[64].mxu0 %v3736_v10 }
 0x2da   : > { %6681 = vmatmul.mubr.bf16.vlgmr.msra.gmra.mrb[64].mxu1 %v3738_v31  ;;  %7813 = vmatpush3.bf16.msra.mxu0 %v8581_v25 }
 0x2db   : > { %6720 = vmatprep.mubr.bf16.mxu0 %v3741_v42  ;;  %7835 = vmatpush3.bf16.msra.mxu1 %v8582_v45 }
 0x2dc   : > { %6760 = vmatprep.mubr.bf16.mxu1 %v3743_v50  ;;  %7814 = vmatprep.subr.bf16.mxu0 %v8583_v38 }
 0x2dd   : > { %7836 = vmatprep.subr.bf16.mxu1 %v8584_v17 }
 0x2de   : > { %7815 = vmatpush3.bf16.msra.mxu0 %v8585_v52 }
 0x2df   : > { %7837 = vmatpush3.bf16.msra.mxu1 %v8586_v6  ;;  %7816 = vmatprep.subr.bf16.mxu0 %v8587_v55 }
 0x2e0   : > { %7838 = vmatprep.subr.bf16.mxu1 %v8588_v56 }
 0x2e2   : > { %7817 = vmatpush3.bf16.msra.mxu0 %v8589_v49 }
 0x2e3   : > { %7839 = vmatpush3.bf16.msra.mxu1 %v8590_v58  ;;  %7818 = vmatprep.subr.bf16.mxu0 %v8591_v26 }
 0x2e4   : > { %7840 = vmatprep.subr.bf16.mxu1 %v8592_v28 }
 0x2e6   : > { %7819 = vmatpush3.bf16.msra.mxu0 %v8593_v60 }
 0x2e7   : > { %7841 = vmatpush3.bf16.msra.mxu1 %v8594_v34  ;;  %7820 = vmatprep.subr.bf16.mxu0 %v8595_v29 }
 0x2e8   : > { %7842 = vmatprep.subr.bf16.mxu1 %v8596_v62 }
 0x2ea   : > { %7821 = vmatpush3.bf16.msra.mxu0 %v8597_v30 }
 0x2eb   : > { %7843 = vmatpush3.bf16.msra.mxu1 %v8598_v1  ;;  %7822 = vmatprep.subr.bf16.mxu0 %v8599_v53 }
 0x2ec   : > { %v7520_v3 = vpop.f32.mrb[40].mxu0  ;;  %7844 = vmatprep.subr.bf16.mxu1 %v8600_v41 }
 0x2ed   : > { %v7542_v4 = vpop.f32.mrb[40].mxu1  ;;  %v7521_v9 = vpop.f32.mrb[41].mxu0 }
 0x2ee   : > { %v7522_v33 = vadd.f32 %v7521_v9, %v7520_v3  ;;  %v7543_v8 = vpop.f32.mrb[41].mxu1  ;;  %v7523_v13 = vpop.f32.mrb[42].mxu0  ;;  %7823 = vmatpush3.bf16.msra.mxu0 %v8601_v5 }
 0x2ef   : > { %v7544_v57 = vadd.f32 %v7543_v8, %v7542_v4  ;;  %v7545_v37 = vpop.f32.mrb[42].mxu1  ;;  %7845 = vmatpush3.bf16.msra.mxu1 %v8602_v54  ;;  %v7524_v46 = vpop.f32.mrb[43].mxu0  ;;  %7824 = vmatprep.subr.bf16.mxu0 %v8603_v48 }
 0x2f0   : > { %v6163_v15 = vadd.f32 %v7522_v33, %v10182_v35  ;;  %v7546_v40 = vpop.f32.mrb[43].mxu1  ;;  %7846 = vmatprep.subr.bf16.mxu1 %v8604_v47 }
 0x2f2   : > { %v6203_v11 = vadd.f32 %v7544_v57, %v6163_v15  ;;  %7825 = vmatpush3.bf16.msra.mxu0 %v8605_v19 }
 0x2f3   : > { %7847 = vmatpush3.bf16.msra.mxu1 %v8606_v44  ;;  %7826 = vmatprep.subr.bf16.mxu0 %v8607_v27 }
 0x2f4   : > { %7848 = vmatprep.subr.bf16.mxu1 %v8608_v22 }
 0x2f6   : > { %7827 = vmatpush3.bf16.msra.mxu0 %v8609_v59 }
 0x2f7   : > { %7849 = vmatpush3.bf16.msra.mxu1 %v8610_v39 }
 0x2f9   : > { %6721 = vmatmul.mubr.bf16.vlgmr.msra.gmra.mrb[68].mxu0 %v3740_v12 }
 0x2fa   : > { %6761 = vmatmul.mubr.bf16.vlgmr.msra.gmra.mrb[68].mxu1 %v3742_v20 }
 0x30c   : > { %v7564_v51 = vpop.f32.mrb[44].mxu0 }
 0x30d   : > { %v7586_v35 = vpop.f32.mrb[44].mxu1  ;;  %v7565_v0 = vpop.f32.mrb[45].mxu0 }
 0x30e   : > { %v7566_v23 = vadd.f32 %v7565_v0, %v7564_v51  ;;  %v7587_v21 = vpop.f32.mrb[45].mxu1  ;;  %v7567_v16 = vpop.f32.mrb[46].mxu0 }
 0x30f   : > { %v7588_v24 = vadd.f32 %v7587_v21, %v7586_v35  ;;  %v7589_v2 = vpop.f32.mrb[46].mxu1  ;;  %v7568_v25 = vpop.f32.mrb[47].mxu0 }
 0x310   : > { %v6243_v10 = vadd.f32 %v7566_v23, %v6203_v11  ;;  %v7590_v45 = vpop.f32.mrb[47].mxu1 }
 0x312   : > { %v6283_v31 = vadd.f32 %v7588_v24, %v6243_v10 }
 0x32c   : > { %v7608_v38 = vpop.f32.mrb[48].mxu0 }
 0x32d   : > { %v7630_v42 = vpop.f32.mrb[48].mxu1  ;;  %v7609_v17 = vpop.f32.mrb[49].mxu0 }
 0x32e   : > { %v7610_v50 = vadd.f32 %v7609_v17, %v7608_v38  ;;  %v7631_v52 = vpop.f32.mrb[49].mxu1  ;;  %v7611_v6 = vpop.f32.mrb[50].mxu0 }
 0x32f   : > { %v7632_v55 = vadd.f32 %v7631_v52, %v7630_v42  ;;  %v7633_v56 = vpop.f32.mrb[50].mxu1  ;;  %v7612_v49 = vpop.f32.mrb[51].mxu0 }
 0x330   : > { %v6323_v58 = vadd.f32 %v7610_v50, %v6283_v31  ;;  %v7634_v26 = vpop.f32.mrb[51].mxu1  ;;  %v3707_v56 = vld [vmem:[#allocation2] sm:$0xff] }
 0x332   : > { %v6363_v28 = vadd.f32 %v7632_v55, %v6323_v58 }
 0x34c   : > { %v7652_v60 = vpop.f32.mrb[52].mxu0 }
 0x34d   : > { %v7674_v34 = vpop.f32.mrb[52].mxu1  ;;  %v7653_v29 = vpop.f32.mrb[53].mxu0 }
 0x34e   : > { %v7654_v62 = vadd.f32 %v7653_v29, %v7652_v60  ;;  %v7675_v30 = vpop.f32.mrb[53].mxu1  ;;  %v7655_v63 = vpop.f32.mrb[54].mxu0 }
 0x34f   : > { %v7676_v1 = vadd.f32 %v7675_v30, %v7674_v34  ;;  %v7677_v53 = vpop.f32.mrb[54].mxu1  ;;  %v7656_v36 = vpop.f32.mrb[55].mxu0 }
 0x350   : > { %v6403_v41 = vadd.f32 %v7654_v62, %v6363_v28  ;;  %v7678_v5 = vpop.f32.mrb[55].mxu1  ;;  %v7454_v28 = vld [vmem:[%s10273_s4] ss:$0 sm:$0xff] (!%p7453_p11) }
 0x352   : > { %v6443_v43 = vadd.f32 %v7676_v1, %v6403_v41 }
 0x36c   : > { %v7696_v54 = vpop.f32.mrb[56].mxu0 }
 0x36d   : > { %v7718_v48 = vpop.f32.mrb[56].mxu1  ;;  %v7697_v7 = vpop.f32.mrb[57].mxu0 }
 0x36e   : > { %v7698_v3 = vadd.f32 %v7697_v7, %v7696_v54  ;;  %v7719_v47 = vpop.f32.mrb[57].mxu1  ;;  %v7699_v4 = vpop.f32.mrb[58].mxu0 }
 0x36f   : > { %v7720_v9 = vadd.f32 %v7719_v47, %v7718_v48  ;;  %v7721_v33 = vpop.f32.mrb[58].mxu1  ;;  %v7700_v8 = vpop.f32.mrb[59].mxu0 }
 0x370   : > { %v6483_v13 = vadd.f32 %v7698_v3, %v6443_v43  ;;  %v7722_v19 = vpop.f32.mrb[59].mxu1 }
 0x372   : > { %v6523_v14 = vadd.f32 %v7720_v9, %v6483_v13 }
 0x38c   : > { %v7740_v57 = vpop.f32.mrb[60].mxu0 }
 0x38d   : > { %v7762_v37 = vpop.f32.mrb[60].mxu1  ;;  %v7741_v46 = vpop.f32.mrb[61].mxu0 }
 0x38e   : > { %v7742_v44 = vadd.f32 %v7741_v46, %v7740_v57  ;;  %v7763_v27 = vpop.f32.mrb[61].mxu1  ;;  %v7743_v32 = vpop.f32.mrb[62].mxu0 }
 0x38f   : > { %v7764_v15 = vadd.f32 %v7763_v27, %v7762_v37  ;;  %v7765_v40 = vpop.f32.mrb[62].mxu1  ;;  %v7744_v22 = vpop.f32.mrb[63].mxu0 }
 0x390   : > { %v6563_v11 = vadd.f32 %v7742_v44, %v6523_v14  ;;  %v7766_v59 = vpop.f32.mrb[63].mxu1 }
 0x392   : > { %v6603_v61 = vadd.f32 %v7764_v15, %v6563_v11 }
 0x3ac   : > { %v7784_v39 = vpop.f32.mrb[64].mxu0 }
 0x3ad   : > { %v7806_v18 = vpop.f32.mrb[64].mxu1  ;;  %v7785_v12 = vpop.f32.mrb[65].mxu0 }
 0x3ae   : > { %v7786_v20 = vadd.f32 %v7785_v12, %v7784_v39  ;;  %v7807_v51 = vpop.f32.mrb[65].mxu1  ;;  %v7787_v35 = vpop.f32.mrb[66].mxu0 }
 0x3af   : > { %v7808_v0 = vadd.f32 %v7807_v51, %v7806_v18  ;;  %v7809_v23 = vpop.f32.mrb[66].mxu1  ;;  %v7788_v21 = vpop.f32.mrb[67].mxu0 }
 0x3b0   : > { %v6643_v16 = vadd.f32 %v7786_v20, %v6603_v61  ;;  %v7810_v24 = vpop.f32.mrb[67].mxu1 }
 0x3b2   : > { %v6683_v2 = vadd.f32 %v7808_v0, %v6643_v16 }
 0x3cc   : > { %v7828_v25 = vpop.f32.mrb[68].mxu0 }
 0x3cd   : > { %v7850_v10 = vpop.f32.mrb[68].mxu1  ;;  %v7829_v45 = vpop.f32.mrb[69].mxu0 }
 0x3ce   : > { %v7830_v31 = vadd.f32 %v7829_v45, %v7828_v25  ;;  %v7851_v38 = vpop.f32.mrb[69].mxu1  ;;  %v7831_v42 = vpop.f32.mrb[70].mxu0 }
 0x3cf   : > { %v7852_v17 = vadd.f32 %v7851_v38, %v7850_v10  ;;  %v7853_v50 = vpop.f32.mrb[70].mxu1  ;;  %v7832_v52 = vpop.f32.mrb[71].mxu0 }
 0x3d0   : > { %v6723_v6 = vadd.f32 %v7830_v31, %v6683_v2  ;;  %v7854_v55 = vpop.f32.mrb[71].mxu1  ;;  %6774 = sbr.rel (%p7453_p11) target bundleno = 1309 (0x51d), region = 71 }
 0x3d2   : > { %v6763_v49 = vadd.f32 %v7852_v17, %v6723_v6 }
 0x3d4   : > { %v6768_v58 = vadd.f32 %v6763_v49, %v3707_v56 }
 0x3d6   : > { %6770 = vst.msk [vmem:[#allocation2] sm:$0xff] %vm6769_vm1, %v6768_v58 }
 0x3dd   : > { %v6775_v26 = vld [vmem:[#allocation2] sm:$0xff] }
 0x3de   : > { %v6783_v60 = vadd.f32 %v7454_v28, %v6775_v26 }
 0x3e0   : > { %v6784_v34 = vsel %vm6769_vm1, %v6783_v60, -inf }
 0x3e1   : > { %6785 = vmax.xlane.f32.xlu0 %v6784_v34 }
 0x46e   : > { %v6786_v29 = vpop.xlane.xlu0 %6785 }
 0x46f   : > { %v6787_v62 = vsub.f32 %v6783_v60, %v6786_v29 }
 0x471   : > { %v6788_v30 = vmul.f32 1.442695, %v6787_v62 }
 0x473   : > { %8612 = vpow2.f32 %v6788_v30 }
 0x47d   : > { %v8613_v63 = vpop.eup %8612 }
 0x47e   : > { %v6790_v1 = vsel %vm6769_vm1, %v8613_v63, 0.0 }
 0x47f   : > { %6791 = vadd.xlane.f32.xlu0 %v6790_v1 }
 0x50c   : > { %v6792_v53 = vpop.xlane.xlu0 %6791 }
 0x50d   : > { %8614 = vlog2.f32 %v6792_v53 }
 0x517   : > { %v8615_v36 = vpop.eup %8614 }
 0x518   : > { %v6794_v41 = vmul.f32 0.6931472, %v8615_v36 }
 0x51a   : > { %v6795_v5 = vsub.f32 %v6787_v62, %v6794_v41 }
 0x51c   : > { %6796 = vst.msk [vmem:[#allocation5] sm:$0xff] %vm6769_vm1, %v6795_v5 }
 0x51d PF: > { %p7862_p12 = scmp.eq.s32.totalorder %s8719_s21, 1  ;;  %s8672_s28 = smov [#allocation5]  }
 0x51e   : > { %s6804_s29 = sshll.u32 %s8672_s28, 4  ;;  %s6805_s29 = int_to_ptr.vmem [resolvable:$true] %s6804_s29 }
 0x51f   : > { %s8616_s30 = scalar_lea.vmem %s6805_s29, 128  ;;  %p8623_p2 = scmp.lt.s32.totalorder %s6805_s29, %s6805_s29 }
 0x520   : > { %p8617_p13 = scmp.ne.s32.totalorder %s6805_s29, %s8616_s30  ;;  %p8624_p3 = scmp.lt.s32.totalorder %s8616_s30, %s8616_s30 }
 0x522   : > { %p8618_p0 = pnand %p8617_p13, %p7862_p12  ;;  %p8625_p4 = por %p8624_p3, %p8623_p2 }
 0x524   : > { %p8619_p1 = pneg %p8618_p0 }
 0x526   : > { %p8626_p5 = pnand %p8625_p4, %p8619_p1 }
 0x528   : > { %8629 = shalt.err (!%p8626_p5)
}
 0x529   : > { %s8630_s8 = scalar_lea.hbm %s10274_s5, 128 }
 0x52a   : > { %p8631_p6 = scmp.ne.s32.totalorder %s10274_s5, %s8630_s8  ;;  %p8636_p9 = scmp.lt.u32.totalorder %s8630_s8, %s10274_s5 }
 0x52c   : > { %p8632_p7 = pnand %p8631_p6, %p7862_p12 }
 0x52e   : > { %p8633_p8 = pneg %p8632_p7 }
 0x530   : > { %p8638_p10 = pnand %p8636_p9, %p8633_p8 }
 0x532   : > { %8641 = shalt.err (!%p8638_p10)
}
 0x533   : > { %7859 = dma.vmem_to_hbm [thread:$0]  (%p7862_p12), %s6805_s29, 128, %s10274_s5, [#allocation6]  }
 0x534   : > { %8655 = dma.done.wait (%p7862_p12), [#allocation6], 128  }
 0x535   : > { %8657 = vsyncadd (%p7862_p12), [#allocation6], 4294967168 }
 0x536 PF: > { %p13_p11 = scmp.ge.s32.totalorder %s8722_s22, 4   ;;  %s10275_s18 = smov %s8664_s19 }
 0x537   : > { %s10276_s19 = smov %s8731_s25  ;;  %s10277_s20 = smov %s8722_s22 }
 0x538   :  { %15 = sbr.rel (!%p13_p11) target bundleno = 2 (0x2), region = 109 }
 0x53f   :  { %6817 = vsyncpa [#allocation6], 1 }
 0x540   :  { %6819 = vsyncpa [#allocation6 + $0x1], 1 }

</bundles_post_ra>
